<compile_context>
chip_gen: v7x
topology: tpu7x:2x2x1
jax: 0.10.0
libtpu: 0.0.40
codegen_flags: <defaults>
</compile_context>

<pallas_src>
import functools
import math

import jax
import jax.numpy as jnp
from jax.experimental import pallas as pl
from jax.experimental.pallas import tpu as pltpu

# ----------------------------- config (small) --------------------------------
DIM = 16                 # config.dim
D34 = DIM * 3 // 4       # 12
D32 = DIM * 3 // 2       # 24
SEM_INTERVAL = 4         # config.semDim_interval
NUM_SLICES = DIM // SEM_INTERVAL
SAMPLE_NUM_TRAIN = 2     # config.sampleNum_train
PATCH = 16               # ga/gs stand-in downsample factor (H/16, W/16 latents)
LANE = 128
SCALE_BOUND = 0.11       # compressai GaussianConditional default lower bound
_INV_SQRT2 = 1.0 / math.sqrt(2.0)

# M-tile for the gridded GEMMs.  1024 rows x 768 K (bf16, double buffered) plus
# a 1024 x Np f32 output double buffer is ~9 MiB — comfortably inside the
# scoped-VMEM default on v5e/v6e/v7x, and big enough to amortize the ~0.35 us
# per-grid-step pipeline overhead once image sizes grow.  At the toy sizes in
# __main__ every grid is length 1 anyway.
GEMM_TM = 1024

VMEM_SPEC = pl.BlockSpec(memory_space=pltpu.MemorySpace.VMEM)


def _round_up(x, m):
    return ((x + m - 1) // m) * m


# --------------------------- GEMM (bias + activation) --------------------------
def _apply_act(acc, act):
    if act == "leaky_relu":
        return jnp.where(acc >= 0.0, acc, 0.01 * acc)
    if act == "relu":
        return jnp.maximum(acc, 0.0)
    if act == "clamp01":
        return jnp.clip(acc, 0.0, 1.0)
    return acc


def _gemm_kernel(x_ref, w_ref, b_ref, o_ref, *, act):
    acc = jnp.dot(x_ref[...], w_ref[...], preferred_element_type=jnp.float32)
    acc = _apply_act(acc + b_ref[...], act)
    o_ref[...] = acc.astype(o_ref.dtype)


def gemm_bias_act(x, wp, bp, n_out, act="none", out_dtype=jnp.float32,
                  tm=GEMM_TM):
    """(M,K)@(Kp,Np)+b with fused activation.

    `wp` / `bp` are pre-padded (N -> multiple of 128) and pre-cast at init so
    the output store is lane-dense and no per-forward pad/cast copies happen.
    bf16 inputs, f32 MXU accumulation; output dtype selectable (bf16 for
    chained conv intermediates, f32 where a reduction/likelihood follows).
    Gridded over M and marked "parallel" (megacore-relevant only once M grows).

    NOTE (v6e/v7x): Np=128 half-fills the 256-lane MXU there; at these sizes
    the GEMMs are dispatch-bound, not MXU-bound, so this is accepted.
    """
    M, K = x.shape
    Kp, Np = wp.shape
    assert K == Kp
    Mp = _round_up(M, 8)
    tm_eff = min(tm, Mp)
    Mp = _round_up(Mp, tm_eff)

    xb = x.astype(jnp.bfloat16)
    if Mp != M:
        xb = jnp.pad(xb, ((0, Mp - M), (0, 0)))

    out = pl.pallas_call(
        functools.partial(_gemm_kernel, act=act),
        out_shape=jax.ShapeDtypeStruct((Mp, Np), out_dtype),
        grid=(Mp // tm_eff,),
        in_specs=[pl.BlockSpec((tm_eff, K), lambda i: (i, 0)),
                  pl.BlockSpec((K, Np), lambda i: (0, 0)),
                  pl.BlockSpec((1, Np), lambda i: (0, 0))],
        out_specs=pl.BlockSpec((tm_eff, Np), lambda i: (i, 0)),
        compiler_params=pltpu.CompilerParams(dimension_semantics=("parallel",)),
    )(xb, wp, bp)
    return out[:M, :n_out]


# -------- fused 3-layer 1x1-conv MLP (entropy parameters stand-in) -------------
def _mlp3_kernel(x_ref, w1_ref, b1_ref, w2_ref, b2_ref, w3_ref, b3_ref, o_ref):
    h = jnp.dot(x_ref[...], w1_ref[...], preferred_element_type=jnp.float32)
    h = h + b1_ref[...]
    h = jnp.where(h >= 0.0, h, 0.01 * h)
    h = jnp.dot(h.astype(jnp.bfloat16), w2_ref[...],
                preferred_element_type=jnp.float32) + b2_ref[...]
    h = jnp.where(h >= 0.0, h, 0.01 * h)
    h = jnp.dot(h.astype(jnp.bfloat16), w3_ref[...],
                preferred_element_type=jnp.float32) + b3_ref[...]
    o_ref[...] = h


def mlp3(x, p, tm=GEMM_TM):
    """Fused leaky->leaky->linear MLP; the (M,48) intermediates never touch HBM.

    Weights are pre-padded at init to multiples of 128; padded columns stay
    exactly zero through leaky_relu (zero bias) and multiply zero weight rows,
    so the math is unchanged."""
    M, K = x.shape
    Mp = _round_up(M, 8)
    tm_eff = min(tm, Mp)
    Mp = _round_up(Mp, tm_eff)
    xb = x.astype(jnp.bfloat16)
    if Mp != M:
        xb = jnp.pad(xb, ((0, Mp - M), (0, 0)))
    N1p = p["ep_w1p"].shape[1]
    N2p = p["ep_w2p"].shape[1]
    N3p = p["ep_w3p"].shape[1]

    def fixed(shape):
        return pl.BlockSpec(shape, lambda i: (0, 0))

    out = pl.pallas_call(
        _mlp3_kernel,
        out_shape=jax.ShapeDtypeStruct((Mp, N3p), jnp.float32),
        grid=(Mp // tm_eff,),
        in_specs=[pl.BlockSpec((tm_eff, K), lambda i: (i, 0)),
                  fixed((K, N1p)), fixed((1, N1p)),
                  fixed((N1p, N2p)), fixed((1, N2p)),
                  fixed((N2p, N3p)), fixed((1, N3p))],
        out_specs=pl.BlockSpec((tm_eff, N3p), lambda i: (i, 0)),
        compiler_params=pltpu.CompilerParams(dimension_semantics=("parallel",)),
    )(xb, p["ep_w1p"], p["ep_b1p"], p["ep_w2p"], p["ep_b2p"],
      p["ep_w3p"], p["ep_b3p"])
    return out[:M, :2 * DIM]


# ----------------------- batched image-MSE reduction ---------------------------
def _img_ssd_kernel(a_ref, b_ref, o_ref):
    d = b_ref[0] - a_ref[...]                     # (rows, 768)
    o_ref[...] = jnp.sum(d * d, axis=0, keepdims=True)[None]


def image_mse_per_replica(input_rows, x_hat_rows, replicas):
    """Per-replica MSE(input, x_hat) in ONE Pallas call.

    Operates directly on the lane-dense (rows, 3*P*P) GEMM layout — MSE is
    layout-invariant as long as both operands share it — so there is no NCHW
    de-patchify, no concatenate and no padding copy of the image tensors.
    """
    Mr, Kr = input_rows.shape                     # (B*h*w, 3*P*P)
    xr = x_hat_rows.reshape(replicas, Mr, Kr)     # contiguous reshape, no copy
    out = pl.pallas_call(
        _img_ssd_kernel,
        out_shape=jax.ShapeDtypeStruct((replicas, 1, Kr), jnp.float32),
        grid=(replicas,),
        in_specs=[pl.BlockSpec((Mr, Kr), lambda p: (0, 0)),
                  pl.BlockSpec((1, Mr, Kr), lambda p: (p, 0, 0))],
        out_specs=pl.BlockSpec((1, 1, Kr), lambda p: (p, 0, 0)),
        compiler_params=pltpu.CompilerParams(dimension_semantics=("parallel",)),
    )(input_rows, xr)
    return out.sum(axis=(1, 2)) / float(Mr * Kr)


# ----------------------- latent-scale jnp helpers (XLA fused) ------------------
def gauss_likelihood(q, means, scales):
    """compressai GaussianConditional._likelihood with clamp(1e-9, 1)."""
    s = jnp.maximum(scales, SCALE_BOUND)
    inv = _INV_SQRT2 / s
    v = jnp.abs(q - means)
    upper = 0.5 * (1.0 + jax.lax.erf((0.5 - v) * inv))
    lower = 0.5 * (1.0 + jax.lax.erf((-0.5 - v) * inv))
    return jnp.clip(upper - lower, 1e-9, 1.0)


def mse(a, b):
    return jnp.mean((a - b) ** 2)


# --------------------------- conv via im2col + GEMM ---------------------------
# TODO(synk): im2col materializes kh*kw shifted copies; in this model all
# explicit convs run at latent resolution (<=4x4 spatial) so the blow-up is a
# few KB.  For image-resolution convs, switch to a tap-accumulating GEMM
# (grid over taps, pl.when-initialized accumulator) to read the input once.
def conv2d(x, wp, bp, cout, kh, kw, stride, padding, act="none",
           out_dtype=jnp.float32):
    """NCHW conv2d == im2col (glue) + Pallas GEMM (pre-padded bf16 weights)."""
    B, Cin, H, W = x.shape
    xp = jnp.pad(x, ((0, 0), (0, 0), (padding, padding), (padding, padding)))
    Ho = (H + 2 * padding - kh) // stride + 1
    Wo = (W + 2 * padding - kw) // stride + 1
    cols = []
    for i in range(kh):
        for j in range(kw):
            cols.append(xp[:, :, i:i + stride * Ho:stride, j:j + stride * Wo:stride])
    p = jnp.stack(cols, axis=0)                      # (kh*kw, B, Cin, Ho, Wo)
    p = p.transpose(1, 3, 4, 2, 0).reshape(B * Ho * Wo, Cin * kh * kw)
    out = gemm_bias_act(p, wp, bp, cout, act, out_dtype)
    return out.reshape(B, Ho, Wo, cout).transpose(0, 3, 1, 2)


def conv_transpose2d(x, wp, bp, cout, kh, kw, stride, padding, output_padding,
                     act="none", out_dtype=jnp.float32):
    """NCHW ConvTranspose2d == zero-insert + pad (glue) + Pallas GEMM conv.

    TODO(synk): sub-pixel (per-phase) GEMMs would avoid the zero-insertion
    MACs; inputs here are <=2x2 spatial so the waste is negligible."""
    B, Cin, H, W = x.shape
    Hd = (H - 1) * stride + 1
    Wd = (W - 1) * stride + 1
    xd = jnp.zeros((B, Cin, Hd, Wd), x.dtype).at[:, :, ::stride, ::stride].set(x)
    pb = kh - 1 - padding
    pa = kh - 1 - padding + output_padding
    xd = jnp.pad(xd, ((0, 0), (0, 0), (pb, pa), (pb, pa)))
    return conv2d(xd, wp, bp, cout, kh, kw, 1, 0, act=act, out_dtype=out_dtype)


# ------------------------------ layout helpers ---------------------------------
def patchify(x):
    """(B, 3, H, W) -> (B*h*w, 3*PATCH*PATCH) rows (ga stand-in layout)."""
    B, C, H, W = x.shape
    h, w = H // PATCH, W // PATCH
    pt = x.reshape(B, C, h, PATCH, w, PATCH).transpose(0, 2, 4, 1, 3, 5)
    return pt.reshape(B * h * w, C * PATCH * PATCH)


def rows_to_latent_nchw(rows, B, h, w, c):
    return rows.reshape(B, h, w, c).transpose(0, 3, 1, 2)


# ------------------------------ sub-module stacks ------------------------------
def ha_forward(p, y):
    # Conv(d, 3d/4, 3, s1, p1) / LReLU / Conv(.., 5, s2, p2) / LReLU / Conv(.., 5, s2, p2)
    x = conv2d(y, p["ha1_wp"], p["ha1_bp"], D34, 3, 3, 1, 1,
               act="leaky_relu", out_dtype=jnp.bfloat16)
    x = conv2d(x, p["ha2_wp"], p["ha2_bp"], D34, 5, 5, 2, 2,
               act="leaky_relu", out_dtype=jnp.bfloat16)
    x = conv2d(x, p["ha3_wp"], p["ha3_bp"], D34, 5, 5, 2, 2,
               act="none", out_dtype=jnp.float32)          # z feeds a likelihood
    return x


def hs_forward(p, z):
    # ConvT(3d/4, d, 5, s2, p2, op1)/ReLU/ConvT(d, 3d/2, ...)/ReLU/ConvT(3d/2, 2d, 3, s1, p1)
    x = conv_transpose2d(z, p["hs1_wp"], p["hs1_bp"], DIM, 5, 5, 2, 2, 1,
                         act="relu", out_dtype=jnp.bfloat16)
    x = conv_transpose2d(x, p["hs2_wp"], p["hs2_bp"], D32, 5, 5, 2, 2, 1,
                         act="relu", out_dtype=jnp.bfloat16)
    x = conv_transpose2d(x, p["hs3_wp"], p["hs3_bp"], 2 * DIM, 3, 3, 1, 1, 0,
                         act="none", out_dtype=jnp.float32)  # hyper params (means/scales)
    return x


def ctx_forward(p, y_hat):
    # TODO(synk): ContextModel_AR is external; stand-in = single type-A masked
    # 5x5 conv (mask baked into the weight at init) producing dim*2 channels.
    return conv2d(y_hat, p["ctx_wp"], p["ctx_bp"], 2 * DIM, 5, 5, 1, 2,
                  act="none", out_dtype=jnp.float32)


def ep_forward(p, x):
    # TODO(synk): GroupEntropyParameters is external; stand-in = 1x1-conv MLP
    # dim*4 -> dim*3 -> dim*3 -> dim*2, fused into ONE Pallas kernel (mlp3).
    B, C, h, w = x.shape
    m = x.transpose(0, 2, 3, 1).reshape(B * h * w, C)
    out = mlp3(m, p)
    return out.reshape(B, h, w, 2 * DIM).transpose(0, 3, 1, 2)


# ------------------------------- parameters -----------------------------------
def _kaiming(key, shape, fan_out):
    return jax.random.normal(key, shape, jnp.float32) * jnp.sqrt(2.0 / fan_out)


def _prep_gemm(w2d, b):
    """Pre-pad (N -> mult of 128) + pre-cast GEMM weights once at init."""
    K, N = w2d.shape
    Np = _round_up(N, LANE)
    wp = jnp.pad(w2d.astype(jnp.bfloat16), ((0, 0), (0, Np - N)))
    bp = jnp.pad(b.reshape(1, N).astype(jnp.float32), ((0, 0), (0, Np - N)))
    return wp, bp


def _prep_conv(w_nchw, b):
    Cout, Cin, kh, kw = w_nchw.shape
    w2d = w_nchw.reshape(Cout, Cin, kh * kw).transpose(1, 2, 0).reshape(
        Cin * kh * kw, Cout)
    return _prep_gemm(w2d, b)


def _prep_convT(w, b):
    # equivalent stride-1 conv weight for the zero-inserted input
    w_eq = jnp.flip(w, axis=(2, 3)).transpose(1, 0, 2, 3)   # (Cout, Cin, kh, kw)
    return _prep_conv(w_eq, b)


def init_params(key):
    ks = jax.random.split(key, 16)
    d, d34, d32 = DIM, D34, D32
    p = {}

    # ga / gs stand-ins: non-overlapping 16x16 patchify + linear.
    # TODO(synk): real AnalysisTransform / SynthesisTransform are external
    # learned networks; these stand-ins keep the same latent layout.
    ga_w = _kaiming(ks[0], (3 * PATCH * PATCH, d), d) * 0.1
    ga_b = jnp.zeros((d,), jnp.float32)
    p["ga_wp"], p["ga_bp"] = _prep_gemm(ga_w, ga_b)
    gs_w = _kaiming(ks[1], (d, 3 * PATCH * PATCH), 3 * PATCH * PATCH) * 0.1
    gs_b = jnp.full((3 * PATCH * PATCH,), 0.5, jnp.float32)
    p["gs_wp"], p["gs_bp"] = _prep_gemm(gs_w, gs_b)

    # ha
    p["ha1_wp"], p["ha1_bp"] = _prep_conv(
        _kaiming(ks[2], (d34, d, 3, 3), d34 * 9), jnp.zeros((d34,), jnp.float32))
    p["ha2_wp"], p["ha2_bp"] = _prep_conv(
        _kaiming(ks[3], (d34, d34, 5, 5), d34 * 25), jnp.zeros((d34,), jnp.float32))
    p["ha3_wp"], p["ha3_bp"] = _prep_conv(
        _kaiming(ks[4], (d34, d34, 5, 5), d34 * 25), jnp.zeros((d34,), jnp.float32))

    # hs (ConvTranspose weights are (Cin, Cout, kh, kw))
    p["hs1_wp"], p["hs1_bp"] = _prep_convT(
        _kaiming(ks[5], (d34, d, 5, 5), d * 25), jnp.zeros((d,), jnp.float32))
    p["hs2_wp"], p["hs2_bp"] = _prep_convT(
        _kaiming(ks[6], (d, d32, 5, 5), d32 * 25), jnp.zeros((d32,), jnp.float32))
    p["hs3_wp"], p["hs3_bp"] = _prep_convT(
        _kaiming(ks[7], (d32, 2 * d, 3, 3), 2 * d * 9), jnp.zeros((2 * d,), jnp.float32))

    # entropy bottleneck stand-in (factorized model -> per-channel Gaussian)
    # TODO(synk): real EntropyBottleneck uses a learned non-parametric CDF.
    p["eb_medians"] = jnp.zeros((d34,), jnp.float32)
    p["eb_scales"] = jnp.ones((d34,), jnp.float32)

    # context model stand-in: type-A masked 5x5 conv d -> 2d (mask baked in)
    w_ctx = _kaiming(ks[8], (2 * d, d, 5, 5), 2 * d * 25)
    mask = jnp.ones((5, 5), jnp.float32)
    mask = mask.at[2, 2:].set(0.0).at[3:, :].set(0.0)
    p["ctx_wp"], p["ctx_bp"] = _prep_conv(w_ctx * mask[None, None, :, :],
                                          jnp.zeros((2 * d,), jnp.float32))

    # entropy parameters stand-in: 1x1 convs 4d -> 3d -> 3d -> 2d (pre-padded
    # so the three matmuls chain on 128-wide lanes inside one kernel)
    w1 = _kaiming(ks[9], (4 * d, 3 * d), 3 * d)
    b1 = jnp.zeros((3 * d,), jnp.float32)
    w2 = _kaiming(ks[10], (3 * d, 3 * d), 3 * d)
    b2 = jnp.zeros((3 * d,), jnp.float32)
    w3 = _kaiming(ks[11], (3 * d, 2 * d), 2 * d)
    b3 = jnp.full((2 * d,), 0.1, jnp.float32)
    n1p, n2p, n3p = (_round_up(n, LANE) for n in (3 * d, 3 * d, 2 * d))
    p["ep_w1p"] = jnp.pad(w1.astype(jnp.bfloat16), ((0, 0), (0, n1p - 3 * d)))
    p["ep_b1p"] = jnp.pad(b1.reshape(1, -1), ((0, 0), (0, n1p - 3 * d)))
    p["ep_w2p"] = jnp.pad(w2.astype(jnp.bfloat16), ((0, n1p - 3 * d), (0, n2p - 3 * d)))
    p["ep_b2p"] = jnp.pad(b2.reshape(1, -1), ((0, 0), (0, n2p - 3 * d)))
    p["ep_w3p"] = jnp.pad(w3.astype(jnp.bfloat16), ((0, n2p - 3 * d), (0, n3p - 2 * d)))
    p["ep_b3p"] = jnp.pad(b3.reshape(1, -1), ((0, 0), (0, n3p - 2 * d)))
    return p


# --------------------------------- forward ------------------------------------
def prog_sic_forward(params, input_image, semDim, key):
    B, C, H, W = input_image.shape
    h, w = H // PATCH, W // PATCH
    d = DIM
    n_rep = 1 + SAMPLE_NUM_TRAIN

    # ---- analysis: patchify once (reused for the image MSEs) + Pallas GEMM ----
    input_rows = patchify(input_image)                         # (B*h*w, 768) f32
    y_rows = gemm_bias_act(input_rows, params["ga_wp"], params["ga_bp"], d)
    y = rows_to_latent_nchw(y_rows, B, h, w, d)                # (B, d, h, w)

    z = ha_forward(params, y)                                  # (B, 3d/4, h/4, w/4)

    # ---- latent-scale quantization / likelihoods: plain jnp (XLA fuses; a
    # pallas_call here would be pure dispatch overhead at 24-2048 elements) ----
    med = params["eb_medians"].reshape(1, D34, 1, 1)
    z_hat = jnp.round(z - med) + med                           # ste_round forward
    z_likelihoods = gauss_likelihood(z_hat, med,
                                     params["eb_scales"].reshape(1, D34, 1, 1))

    hyper_params = hs_forward(params, z_hat)                   # (B, 2d, h, w)
    scales_hyper_hat, means_hyper_hat = jnp.split(hyper_params, 2, axis=1)

    y_hat_syn = jnp.round(y)                                   # ste_round forward
    context_params = ctx_forward(params, y_hat_syn)
    gaussian_params = ep_forward(
        params, jnp.concatenate([hyper_params, context_params], axis=1))
    scales_hat, means_hat = jnp.split(gaussian_params, 2, axis=1)

    # quantized_prob_based_guassian: training=True -> additive uniform noise,
    # training=False -> ste_round(y) (matches the reference module).
    key, k_noise, k_sample = jax.random.split(key, 3)
    noise = jax.random.uniform(k_noise, y.shape, jnp.float32, -0.5, 0.5)
    y_likelihoods = gauss_likelihood(y + noise, means_hat, scales_hat)
    quantized_y_likelihoods = gauss_likelihood(jnp.round(y), means_hat, scales_hat)
    y_split_likelihoods = jnp.split(quantized_y_likelihoods, NUM_SLICES, axis=1)

    scales_hat_samples = scales_hyper_hat[:, semDim:, :, :]
    means_hat_samples = means_hyper_hat[:, semDim:, :, :]
    y_hat_semDim = y_hat_syn[:, :semDim, :, :]
    y_sem_likelihoods = y_likelihoods[:, :semDim, :, :]

    reps = (SAMPLE_NUM_TRAIN, 1, 1, 1)
    y_hat_semDims = jnp.tile(y_hat_semDim, reps)
    means_hat_samples = jnp.tile(means_hat_samples, reps)
    scales_hat_samples = jnp.tile(scales_hat_samples, reps)

    # y_hat_samples = ste_round(means + 2*(2*U-1)), U ~ Uniform[0,1)
    u = jax.random.uniform(k_sample, scales_hat_samples.shape, jnp.float32, -2.0, 2.0)
    y_hat_samples = jnp.round(means_hat_samples + u)

    y_hat_semSamples = jnp.concatenate([y_hat_semDims, y_hat_samples], axis=1)
    y_hat = jnp.concatenate([y_hat_syn, y_hat_semSamples], axis=0)  # (3B, d, h, w)

    # ---- synthesis + re-analysis in row space (de-patchify / re-patchify are
    # exact inverses, so they are skipped: x_hat stays lane-dense) ----
    y_hat_rows = y_hat.transpose(0, 2, 3, 1).reshape(n_rep * B * h * w, d)
    x_hat_rows = gemm_bias_act(y_hat_rows, params["gs_wp"], params["gs_bp"],
                               3 * PATCH * PATCH, act="clamp01")  # clamp fused
    y_dis_rows = gemm_bias_act(x_hat_rows, params["ga_wp"], params["ga_bp"], d)
    y_dis = rows_to_latent_nchw(y_dis_rows, n_rep * B, h, w, d)

    # ---- bpps ----
    denom = -math.log(2.0) * H * W * B
    bpp_z = jnp.sum(jnp.log(z_likelihoods)) / denom
    bpp_y = jnp.sum(jnp.log(y_likelihoods)) / denom
    bpp_ys = jnp.sum(jnp.log(y_sem_likelihoods)) / denom
    bpp_y_splits = jnp.stack([jnp.sum(jnp.log(s)) / denom for s in y_split_likelihoods])
    bpp_y_splits_std = jnp.std(bpp_y_splits, ddof=1)           # torch.std is unbiased
    bpp_y_splits_chunk = bpp_y_splits[semDim // SEM_INTERVAL - 1]

    # ---- image distortions: one Pallas reduction over the 3 replicas (no
    # concatenate / pad copies; operands already share the rows layout) ----
    img_mse = image_mse_per_replica(input_rows, x_hat_rows, n_rep)
    mse_syntactic = img_mse[0]
    Emse_loss = jnp.mean(img_mse[1:])

    # ---- latent distortions: plain jnp (tiny tensors, XLA fuses) ----
    y_dis_syn = y_dis[:B]
    y_dis_sem = [y_dis[B + i * B:B + (i + 1) * B] for i in range(SAMPLE_NUM_TRAIN)]
    y_samp = [y_hat_samples[i * B:(i + 1) * B] for i in range(SAMPLE_NUM_TRAIN)]

    syn_terms = [mse(y_hat_syn, y_dis_syn)]
    syn_terms += [mse(y_hat_semDim, y_dis_sem[i][:, :semDim])
                  for i in range(SAMPLE_NUM_TRAIN)]
    synonym_distance = jnp.mean(jnp.stack(syn_terms))

    if semDim != d:
        samp_terms = [jnp.float32(0.0)]
        samp_terms += [mse(y_samp[i], y_dis_sem[i][:, semDim:])
                       for i in range(SAMPLE_NUM_TRAIN)]
        sample_distance = jnp.mean(jnp.stack(samp_terms))
    else:
        sample_distance = jnp.float32(0.0)

    # TODO(synk): LPIPS / DISTS are pretrained perceptual nets — no Pallas equivalent.
    lpips_syntactic = jnp.float32(0.0)
    dists_syntactic = jnp.float32(0.0)
    Elpips_semantic = jnp.float32(0.0)
    Edists_semantic = jnp.float32(0.0)

    return (mse_syntactic, lpips_syntactic, dists_syntactic, Emse_loss,
            Elpips_semantic, Edists_semantic, synonym_distance, sample_distance,
            bpp_y, bpp_ys, bpp_z, bpp_y_splits_std, bpp_y_splits_chunk)


# ----------------------------------- main --------------------------------------
if __name__ == "__main__":
    key = jax.random.PRNGKey(0)
    k_param, k_img, k_fwd = jax.random.split(key, 3)

    params = init_params(k_param)
    input_image = jax.random.uniform(k_img, (2, 3, 64, 64), jnp.float32)  # NCHW in [0,1)
    semDim = 8  # multiple of semDim_interval, < dim

    fwd = jax.jit(prog_sic_forward, static_argnums=(2,))
    outs = fwd(params, input_image, semDim, k_fwd)
    outs = jax.block_until_ready(outs)

    for o in outs:
        assert o.shape == () and o.dtype == jnp.float32
        assert bool(jnp.isfinite(o))
    print("KERNEL_OK")
</pallas_src>

<mosaic_0001>
module attributes {stable_mosaic.version = 11 : i64} {
  func.func @_gemm_kernel(%arg0: i32, %arg1: memref<32x768xbf16, #tpu.memory_space<vmem>>, %arg2: memref<768x128xbf16, #tpu.memory_space<vmem>>, %arg3: memref<1x128xf32, #tpu.memory_space<vmem>>, %arg4: memref<32x128xf32, #tpu.memory_space<vmem>>) attributes {dimension_semantics = [#tpu.dimension_semantics<parallel>], iteration_bounds = array<i64: 1>, scalar_prefetch = 0 : i64, scratch_operands = 0 : i64, tpu.core_type = #tpu.core_type<tc>, window_params = [{transform_indices = @transform_0, window_bounds = array<i64: 32, 768>}, {pipeline_mode = #tpu.pipeline_mode<synchronous>, transform_indices = @transform_1, window_bounds = array<i64: 768, 128>}, {pipeline_mode = #tpu.pipeline_mode<synchronous>, transform_indices = @transform_2, window_bounds = array<i64: 1, 128>}, {transform_indices = @transform_3, window_bounds = array<i64: 32, 128>}]} {
    %c0 = arith.constant 0 : index
    %c0_0 = arith.constant 0 : index
    %0 = vector.load %arg1[%c0, %c0_0] : memref<32x768xbf16, #tpu.memory_space<vmem>>, vector<32x768xbf16>
    %c0_1 = arith.constant 0 : index
    %c0_2 = arith.constant 0 : index
    %1 = vector.load %arg2[%c0_1, %c0_2] : memref<768x128xbf16, #tpu.memory_space<vmem>>, vector<768x128xbf16>
    %cst = arith.constant dense<0.000000e+00> : vector<32x128xf32>
    %2 = tpu.matmul %0, %1, %cst {dimension_numbers = #tpu.dot_dimension_numbers<[1], [0], [0], [1], [0, 0, 1, 1], [], []>} : vector<32x768xbf16>, vector<768x128xbf16>, vector<32x128xf32> -> vector<32x128xf32>
    %c0_3 = arith.constant 0 : index
    %c0_4 = arith.constant 0 : index
    %3 = vector.load %arg3[%c0_3, %c0_4] : memref<1x128xf32, #tpu.memory_space<vmem>>, vector<1x128xf32>
    %4 = vector.broadcast %3 : vector<1x128xf32> to vector<32x128xf32>
    %5 = arith.addf %2, %4 : vector<32x128xf32>
    %c0_5 = arith.constant 0 : index
    %c0_6 = arith.constant 0 : index
    %6 = vector.load %arg4[%c0_5, %c0_6] : memref<32x128xf32, #tpu.memory_space<vmem>>, vector<32x128xf32>
    tpu.vector_store %arg4[%c0_5, %c0_6], %5 {strides = array<i32>} : memref<32x128xf32, #tpu.memory_space<vmem>>, vector<32x128xf32>,
    return
  }
  func.func @transform_0(%arg0: i32) -> (i32, i32) {
    %c0_i32 = arith.constant 0 : i32
    %c0_i32_0 = arith.constant 0 : i32
    return %arg0, %c0_i32 : i32, i32
  }
  func.func @transform_1(%arg0: i32) -> (i32, i32) {
    %c0_i32 = arith.constant 0 : i32
    %c0_i32_0 = arith.constant 0 : i32
    %c0_i32_1 = arith.constant 0 : i32
    return %c0_i32, %c0_i32_0 : i32, i32
  }
  func.func @transform_2(%arg0: i32) -> (i32, i32) {
    %c0_i32 = arith.constant 0 : i32
    %c0_i32_0 = arith.constant 0 : i32
    %c0_i32_1 = arith.constant 0 : i32
    return %c0_i32, %c0_i32_0 : i32, i32
  }
  func.func @transform_3(%arg0: i32) -> (i32, i32) {
    %c0_i32 = arith.constant 0 : i32
    %c0_i32_0 = arith.constant 0 : i32
    return %arg0, %c0_i32 : i32, i32
  }
}

module attributes {stable_mosaic.version = 11 : i64} {
  func.func @_gemm_kernel(%arg0: i32, %arg1: memref<32x400xbf16, #tpu.memory_space<vmem>>, %arg2: memref<400x128xbf16, #tpu.memory_space<vmem>>, %arg3: memref<1x128xf32, #tpu.memory_space<vmem>>, %arg4: memref<32x128xf32, #tpu.memory_space<vmem>>) attributes {dimension_semantics = [#tpu.dimension_semantics<parallel>], iteration_bounds = array<i64: 1>, scalar_prefetch = 0 : i64, scratch_operands = 0 : i64, tpu.core_type = #tpu.core_type<tc>, window_params = [{transform_indices = @transform_0, window_bounds = array<i64: 32, 400>}, {pipeline_mode = #tpu.pipeline_mode<synchronous>, transform_indices = @transform_1, window_bounds = array<i64: 400, 128>}, {pipeline_mode = #tpu.pipeline_mode<synchronous>, transform_indices = @transform_2, window_bounds = array<i64: 1, 128>}, {transform_indices = @transform_3, window_bounds = array<i64: 32, 128>}]} {
    %c0 = arith.constant 0 : index
    %c0_0 = arith.constant 0 : index
    %0 = vector.load %arg1[%c0, %c0_0] : memref<32x400xbf16, #tpu.memory_space<vmem>>, vector<32x400xbf16>
    %c0_1 = arith.constant 0 : index
    %c0_2 = arith.constant 0 : index
    %1 = vector.load %arg2[%c0_1, %c0_2] : memref<400x128xbf16, #tpu.memory_space<vmem>>, vector<400x128xbf16>
    %cst = arith.constant dense<0.000000e+00> : vector<32x128xf32>
    %2 = tpu.matmul %0, %1, %cst {dimension_numbers = #tpu.dot_dimension_numbers<[1], [0], [0], [1], [0, 0, 1, 1], [], []>} : vector<32x400xbf16>, vector<400x128xbf16>, vector<32x128xf32> -> vector<32x128xf32>
    %c0_3 = arith.constant 0 : index
    %c0_4 = arith.constant 0 : index
    %3 = vector.load %arg3[%c0_3, %c0_4] : memref<1x128xf32, #tpu.memory_space<vmem>>, vector<1x128xf32>
    %4 = vector.broadcast %3 : vector<1x128xf32> to vector<32x128xf32>
    %5 = arith.addf %2, %4 : vector<32x128xf32>
    %c0_5 = arith.constant 0 : index
    %c0_6 = arith.constant 0 : index
    %6 = vector.load %arg4[%c0_5, %c0_6] : memref<32x128xf32, #tpu.memory_space<vmem>>, vector<32x128xf32>
    tpu.vector_store %arg4[%c0_5, %c0_6], %5 {strides = array<i32>} : memref<32x128xf32, #tpu.memory_space<vmem>>, vector<32x128xf32>,
    return
  }
  func.func @transform_0(%arg0: i32) -> (i32, i32) {
    %c0_i32 = arith.constant 0 : i32
    %c0_i32_0 = arith.constant 0 : i32
    return %arg0, %c0_i32 : i32, i32
  }
  func.func @transform_1(%arg0: i32) -> (i32, i32) {
    %c0_i32 = arith.constant 0 : i32
    %c0_i32_0 = arith.constant 0 : i32
    %c0_i32_1 = arith.constant 0 : i32
    return %c0_i32, %c0_i32_0 : i32, i32
  }
  func.func @transform_2(%arg0: i32) -> (i32, i32) {
    %c0_i32 = arith.constant 0 : i32
    %c0_i32_0 = arith.constant 0 : i32
    %c0_i32_1 = arith.constant 0 : i32
    return %c0_i32, %c0_i32_0 : i32, i32
  }
  func.func @transform_3(%arg0: i32) -> (i32, i32) {
    %c0_i32 = arith.constant 0 : i32
    %c0_i32_0 = arith.constant 0 : i32
    return %arg0, %c0_i32 : i32, i32
  }
}

module attributes {stable_mosaic.version = 11 : i64} {
  func.func @_gemm_kernel(%arg0: i32, %arg1: memref<32x144xbf16, #tpu.memory_space<vmem>>, %arg2: memref<144x128xbf16, #tpu.memory_space<vmem>>, %arg3: memref<1x128xf32, #tpu.memory_space<vmem>>, %arg4: memref<32x128xbf16, #tpu.memory_space<vmem>>) attributes {dimension_semantics = [#tpu.dimension_semantics<parallel>], iteration_bounds = array<i64: 1>, scalar_prefetch = 0 : i64, scratch_operands = 0 : i64, tpu.core_type = #tpu.core_type<tc>, window_params = [{transform_indices = @transform_0, window_bounds = array<i64: 32, 144>}, {pipeline_mode = #tpu.pipeline_mode<synchronous>, transform_indices = @transform_1, window_bounds = array<i64: 144, 128>}, {pipeline_mode = #tpu.pipeline_mode<synchronous>, transform_indices = @transform_2, window_bounds = array<i64: 1, 128>}, {transform_indices = @transform_3, window_bounds = array<i64: 32, 128>}]} {
    %c0 = arith.constant 0 : index
    %c0_0 = arith.constant 0 : index
    %0 = vector.load %arg1[%c0, %c0_0] : memref<32x144xbf16, #tpu.memory_space<vmem>>, vector<32x144xbf16>
    %c0_1 = arith.constant 0 : index
    %c0_2 = arith.constant 0 : index
    %1 = vector.load %arg2[%c0_1, %c0_2] : memref<144x128xbf16, #tpu.memory_space<vmem>>, vector<144x128xbf16>
    %cst = arith.constant dense<0.000000e+00> : vector<32x128xf32>
    %2 = tpu.matmul %0, %1, %cst {dimension_numbers = #tpu.dot_dimension_numbers<[1], [0], [0], [1], [0, 0, 1, 1], [], []>} : vector<32x144xbf16>, vector<144x128xbf16>, vector<32x128xf32> -> vector<32x128xf32>
    %c0_3 = arith.constant 0 : index
    %c0_4 = arith.constant 0 : index
    %3 = vector.load %arg3[%c0_3, %c0_4] : memref<1x128xf32, #tpu.memory_space<vmem>>, vector<1x128xf32>
    %4 = vector.broadcast %3 : vector<1x128xf32> to vector<32x128xf32>
    %5 = arith.addf %2, %4 : vector<32x128xf32>
    %cst_5 = arith.constant 0.000000e+00 : f32
    %6 = vector.broadcast %cst_5 : f32 to vector<32x128xf32>
    %7 = arith.cmpf oge, %5, %6 : vector<32x128xf32>
    %cst_6 = arith.constant 0.00999999977 : f32
    %8 = vector.broadcast %cst_6 : f32 to vector<32x128xf32>
    %9 = arith.mulf %8, %5 : vector<32x128xf32>
    %10 = arith.select %7, %5, %9 : vector<32x128xi1>, vector<32x128xf32>
    %11 = arith.truncf %10 : vector<32x128xf32> to vector<32x128xbf16>
    %c0_7 = arith.constant 0 : index
    %c0_8 = arith.constant 0 : index
    %12 = vector.load %arg4[%c0_7, %c0_8] : memref<32x128xbf16, #tpu.memory_space<vmem>>, vector<32x128xbf16>
    tpu.vector_store %arg4[%c0_7, %c0_8], %11 {strides = array<i32>} : memref<32x128xbf16, #tpu.memory_space<vmem>>, vector<32x128xbf16>,
    return
  }
  func.func @transform_0(%arg0: i32) -> (i32, i32) {
    %c0_i32 = arith.constant 0 : i32
    %c0_i32_0 = arith.constant 0 : i32
    return %arg0, %c0_i32 : i32, i32
  }
  func.func @transform_1(%arg0: i32) -> (i32, i32) {
    %c0_i32 = arith.constant 0 : i32
    %c0_i32_0 = arith.constant 0 : i32
    %c0_i32_1 = arith.constant 0 : i32
    return %c0_i32, %c0_i32_0 : i32, i32
  }
  func.func @transform_2(%arg0: i32) -> (i32, i32) {
    %c0_i32 = arith.constant 0 : i32
    %c0_i32_0 = arith.constant 0 : i32
    %c0_i32_1 = arith.constant 0 : i32
    return %c0_i32, %c0_i32_0 : i32, i32
  }
  func.func @transform_3(%arg0: i32) -> (i32, i32) {
    %c0_i32 = arith.constant 0 : i32
    %c0_i32_0 = arith.constant 0 : i32
    return %arg0, %c0_i32 : i32, i32
  }
}

module attributes {stable_mosaic.version = 11 : i64} {
  func.func @_gemm_kernel(%arg0: i32, %arg1: memref<8x300xbf16, #tpu.memory_space<vmem>>, %arg2: memref<300x128xbf16, #tpu.memory_space<vmem>>, %arg3: memref<1x128xf32, #tpu.memory_space<vmem>>, %arg4: memref<8x128xbf16, #tpu.memory_space<vmem>>) attributes {dimension_semantics = [#tpu.dimension_semantics<parallel>], iteration_bounds = array<i64: 1>, scalar_prefetch = 0 : i64, scratch_operands = 0 : i64, tpu.core_type = #tpu.core_type<tc>, window_params = [{transform_indices = @transform_0, window_bounds = array<i64: 8, 300>}, {pipeline_mode = #tpu.pipeline_mode<synchronous>, transform_indices = @transform_1, window_bounds = array<i64: 300, 128>}, {pipeline_mode = #tpu.pipeline_mode<synchronous>, transform_indices = @transform_2, window_bounds = array<i64: 1, 128>}, {transform_indices = @transform_3, window_bounds = array<i64: 8, 128>}]} {
    %c0 = arith.constant 0 : index
    %c0_0 = arith.constant 0 : index
    %0 = vector.load %arg1[%c0, %c0_0] : memref<8x300xbf16, #tpu.memory_space<vmem>>, vector<8x300xbf16>
    %c0_1 = arith.constant 0 : index
    %c0_2 = arith.constant 0 : index
    %1 = vector.load %arg2[%c0_1, %c0_2] : memref<300x128xbf16, #tpu.memory_space<vmem>>, vector<300x128xbf16>
    %cst = arith.constant dense<0.000000e+00> : vector<8x128xf32>
    %2 = tpu.matmul %0, %1, %cst {dimension_numbers = #tpu.dot_dimension_numbers<[1], [0], [0], [1], [0, 0, 1, 1], [], []>} : vector<8x300xbf16>, vector<300x128xbf16>, vector<8x128xf32> -> vector<8x128xf32>
    %c0_3 = arith.constant 0 : index
    %c0_4 = arith.constant 0 : index
    %3 = vector.load %arg3[%c0_3, %c0_4] : memref<1x128xf32, #tpu.memory_space<vmem>>, vector<1x128xf32>
    %4 = vector.broadcast %3 : vector<1x128xf32> to vector<8x128xf32>
    %5 = arith.addf %2, %4 : vector<8x128xf32>
    %cst_5 = arith.constant 0.000000e+00 : f32
    %6 = vector.broadcast %cst_5 : f32 to vector<8x128xf32>
    %7 = arith.cmpf oge, %5, %6 : vector<8x128xf32>
    %cst_6 = arith.constant 0.00999999977 : f32
    %8 = vector.broadcast %cst_6 : f32 to vector<8x128xf32>
    %9 = arith.mulf %8, %5 : vector<8x128xf32>
    %10 = arith.select %7, %5, %9 : vector<8x128xi1>, vector<8x128xf32>
    %11 = arith.truncf %10 : vector<8x128xf32> to vector<8x128xbf16>
    %c0_7 = arith.constant 0 : index
    %c0_8 = arith.constant 0 : index
    %12 = vector.load %arg4[%c0_7, %c0_8] : memref<8x128xbf16, #tpu.memory_space<vmem>>, vector<8x128xbf16>
    tpu.vector_store %arg4[%c0_7, %c0_8], %11 {strides = array<i32>} : memref<8x128xbf16, #tpu.memory_space<vmem>>, vector<8x128xbf16>,
    return
  }
  func.func @transform_0(%arg0: i32) -> (i32, i32) {
    %c0_i32 = arith.constant 0 : i32
    %c0_i32_0 = arith.constant 0 : i32
    return %arg0, %c0_i32 : i32, i32
  }
  func.func @transform_1(%arg0: i32) -> (i32, i32) {
    %c0_i32 = arith.constant 0 : i32
    %c0_i32_0 = arith.constant 0 : i32
    %c0_i32_1 = arith.constant 0 : i32
    return %c0_i32, %c0_i32_0 : i32, i32
  }
  func.func @transform_2(%arg0: i32) -> (i32, i32) {
    %c0_i32 = arith.constant 0 : i32
    %c0_i32_0 = arith.constant 0 : i32
    %c0_i32_1 = arith.constant 0 : i32
    return %c0_i32, %c0_i32_0 : i32, i32
  }
  func.func @transform_3(%arg0: i32) -> (i32, i32) {
    %c0_i32 = arith.constant 0 : i32
    %c0_i32_0 = arith.constant 0 : i32
    return %arg0, %c0_i32 : i32, i32
  }
}

module attributes {stable_mosaic.version = 11 : i64} {
  func.func @_gemm_kernel(%arg0: i32, %arg1: memref<8x300xbf16, #tpu.memory_space<vmem>>, %arg2: memref<300x128xbf16, #tpu.memory_space<vmem>>, %arg3: memref<1x128xf32, #tpu.memory_space<vmem>>, %arg4: memref<8x128xf32, #tpu.memory_space<vmem>>) attributes {dimension_semantics = [#tpu.dimension_semantics<parallel>], iteration_bounds = array<i64: 1>, scalar_prefetch = 0 : i64, scratch_operands = 0 : i64, tpu.core_type = #tpu.core_type<tc>, window_params = [{transform_indices = @transform_0, window_bounds = array<i64: 8, 300>}, {pipeline_mode = #tpu.pipeline_mode<synchronous>, transform_indices = @transform_1, window_bounds = array<i64: 300, 128>}, {pipeline_mode = #tpu.pipeline_mode<synchronous>, transform_indices = @transform_2, window_bounds = array<i64: 1, 128>}, {transform_indices = @transform_3, window_bounds = array<i64: 8, 128>}]} {
    %c0 = arith.constant 0 : index
    %c0_0 = arith.constant 0 : index
    %0 = vector.load %arg1[%c0, %c0_0] : memref<8x300xbf16, #tpu.memory_space<vmem>>, vector<8x300xbf16>
    %c0_1 = arith.constant 0 : index
    %c0_2 = arith.constant 0 : index
    %1 = vector.load %arg2[%c0_1, %c0_2] : memref<300x128xbf16, #tpu.memory_space<vmem>>, vector<300x128xbf16>
    %cst = arith.constant dense<0.000000e+00> : vector<8x128xf32>
    %2 = tpu.matmul %0, %1, %cst {dimension_numbers = #tpu.dot_dimension_numbers<[1], [0], [0], [1], [0, 0, 1, 1], [], []>} : vector<8x300xbf16>, vector<300x128xbf16>, vector<8x128xf32> -> vector<8x128xf32>
    %c0_3 = arith.constant 0 : index
    %c0_4 = arith.constant 0 : index
    %3 = vector.load %arg3[%c0_3, %c0_4] : memref<1x128xf32, #tpu.memory_space<vmem>>, vector<1x128xf32>
    %4 = vector.broadcast %3 : vector<1x128xf32> to vector<8x128xf32>
    %5 = arith.addf %2, %4 : vector<8x128xf32>
    %c0_5 = arith.constant 0 : index
    %c0_6 = arith.constant 0 : index
    %6 = vector.load %arg4[%c0_5, %c0_6] : memref<8x128xf32, #tpu.memory_space<vmem>>, vector<8x128xf32>
    tpu.vector_store %arg4[%c0_5, %c0_6], %5 {strides = array<i32>} : memref<8x128xf32, #tpu.memory_space<vmem>>, vector<8x128xf32>,
    return
  }
  func.func @transform_0(%arg0: i32) -> (i32, i32) {
    %c0_i32 = arith.constant 0 : i32
    %c0_i32_0 = arith.constant 0 : i32
    return %arg0, %c0_i32 : i32, i32
  }
  func.func @transform_1(%arg0: i32) -> (i32, i32) {
    %c0_i32 = arith.constant 0 : i32
    %c0_i32_0 = arith.constant 0 : i32
    %c0_i32_1 = arith.constant 0 : i32
    return %c0_i32, %c0_i32_0 : i32, i32
  }
  func.func @transform_2(%arg0: i32) -> (i32, i32) {
    %c0_i32 = arith.constant 0 : i32
    %c0_i32_0 = arith.constant 0 : i32
    %c0_i32_1 = arith.constant 0 : i32
    return %c0_i32, %c0_i32_0 : i32, i32
  }
  func.func @transform_3(%arg0: i32) -> (i32, i32) {
    %c0_i32 = arith.constant 0 : i32
    %c0_i32_0 = arith.constant 0 : i32
    return %arg0, %c0_i32 : i32, i32
  }
}

module attributes {stable_mosaic.version = 11 : i64} {
  func.func @_gemm_kernel(%arg0: i32, %arg1: memref<8x300xbf16, #tpu.memory_space<vmem>>, %arg2: memref<300x128xbf16, #tpu.memory_space<vmem>>, %arg3: memref<1x128xf32, #tpu.memory_space<vmem>>, %arg4: memref<8x128xbf16, #tpu.memory_space<vmem>>) attributes {dimension_semantics = [#tpu.dimension_semantics<parallel>], iteration_bounds = array<i64: 1>, scalar_prefetch = 0 : i64, scratch_operands = 0 : i64, tpu.core_type = #tpu.core_type<tc>, window_params = [{transform_indices = @transform_0, window_bounds = array<i64: 8, 300>}, {pipeline_mode = #tpu.pipeline_mode<synchronous>, transform_indices = @transform_1, window_bounds = array<i64: 300, 128>}, {pipeline_mode = #tpu.pipeline_mode<synchronous>, transform_indices = @transform_2, window_bounds = array<i64: 1, 128>}, {transform_indices = @transform_3, window_bounds = array<i64: 8, 128>}]} {
    %c0 = arith.constant 0 : index
    %c0_0 = arith.constant 0 : index
    %0 = vector.load %arg1[%c0, %c0_0] : memref<8x300xbf16, #tpu.memory_space<vmem>>, vector<8x300xbf16>
    %c0_1 = arith.constant 0 : index
    %c0_2 = arith.constant 0 : index
    %1 = vector.load %arg2[%c0_1, %c0_2] : memref<300x128xbf16, #tpu.memory_space<vmem>>, vector<300x128xbf16>
    %cst = arith.constant dense<0.000000e+00> : vector<8x128xf32>
    %2 = tpu.matmul %0, %1, %cst {dimension_numbers = #tpu.dot_dimension_numbers<[1], [0], [0], [1], [0, 0, 1, 1], [], []>} : vector<8x300xbf16>, vector<300x128xbf16>, vector<8x128xf32> -> vector<8x128xf32>
    %c0_3 = arith.constant 0 : index
    %c0_4 = arith.constant 0 : index
    %3 = vector.load %arg3[%c0_3, %c0_4] : memref<1x128xf32, #tpu.memory_space<vmem>>, vector<1x128xf32>
    %4 = vector.broadcast %3 : vector<1x128xf32> to vector<8x128xf32>
    %5 = arith.addf %2, %4 : vector<8x128xf32>
    %cst_5 = arith.constant 0.000000e+00 : f32
    %6 = vector.broadcast %cst_5 : f32 to vector<8x128xf32>
    %7 = arith.maximumf %5, %6 : vector<8x128xf32>
    %8 = arith.truncf %7 : vector<8x128xf32> to vector<8x128xbf16>
    %c0_6 = arith.constant 0 : index
    %c0_7 = arith.constant 0 : index
    %9 = vector.load %arg4[%c0_6, %c0_7] : memref<8x128xbf16, #tpu.memory_space<vmem>>, vector<8x128xbf16>
    tpu.vector_store %arg4[%c0_6, %c0_7], %8 {strides = array<i32>} : memref<8x128xbf16, #tpu.memory_space<vmem>>, vector<8x128xbf16>,
    return
  }
  func.func @transform_0(%arg0: i32) -> (i32, i32) {
    %c0_i32 = arith.constant 0 : i32
    %c0_i32_0 = arith.constant 0 : i32
    return %arg0, %c0_i32 : i32, i32
  }
  func.func @transform_1(%arg0: i32) -> (i32, i32) {
    %c0_i32 = arith.constant 0 : i32
    %c0_i32_0 = arith.constant 0 : i32
    %c0_i32_1 = arith.constant 0 : i32
    return %c0_i32, %c0_i32_0 : i32, i32
  }
  func.func @transform_2(%arg0: i32) -> (i32, i32) {
    %c0_i32 = arith.constant 0 : i32
    %c0_i32_0 = arith.constant 0 : i32
    %c0_i32_1 = arith.constant 0 : i32
    return %c0_i32, %c0_i32_0 : i32, i32
  }
  func.func @transform_3(%arg0: i32) -> (i32, i32) {
    %c0_i32 = arith.constant 0 : i32
    %c0_i32_0 = arith.constant 0 : i32
    return %arg0, %c0_i32 : i32, i32
  }
}

module attributes {stable_mosaic.version = 11 : i64} {
  func.func @_gemm_kernel(%arg0: i32, %arg1: memref<32x400xbf16, #tpu.memory_space<vmem>>, %arg2: memref<400x128xbf16, #tpu.memory_space<vmem>>, %arg3: memref<1x128xf32, #tpu.memory_space<vmem>>, %arg4: memref<32x128xbf16, #tpu.memory_space<vmem>>) attributes {dimension_semantics = [#tpu.dimension_semantics<parallel>], iteration_bounds = array<i64: 1>, scalar_prefetch = 0 : i64, scratch_operands = 0 : i64, tpu.core_type = #tpu.core_type<tc>, window_params = [{transform_indices = @transform_0, window_bounds = array<i64: 32, 400>}, {pipeline_mode = #tpu.pipeline_mode<synchronous>, transform_indices = @transform_1, window_bounds = array<i64: 400, 128>}, {pipeline_mode = #tpu.pipeline_mode<synchronous>, transform_indices = @transform_2, window_bounds = array<i64: 1, 128>}, {transform_indices = @transform_3, window_bounds = array<i64: 32, 128>}]} {
    %c0 = arith.constant 0 : index
    %c0_0 = arith.constant 0 : index
    %0 = vector.load %arg1[%c0, %c0_0] : memref<32x400xbf16, #tpu.memory_space<vmem>>, vector<32x400xbf16>
    %c0_1 = arith.constant 0 : index
    %c0_2 = arith.constant 0 : index
    %1 = vector.load %arg2[%c0_1, %c0_2] : memref<400x128xbf16, #tpu.memory_space<vmem>>, vector<400x128xbf16>
    %cst = arith.constant dense<0.000000e+00> : vector<32x128xf32>
    %2 = tpu.matmul %0, %1, %cst {dimension_numbers = #tpu.dot_dimension_numbers<[1], [0], [0], [1], [0, 0, 1, 1], [], []>} : vector<32x400xbf16>, vector<400x128xbf16>, vector<32x128xf32> -> vector<32x128xf32>
    %c0_3 = arith.constant 0 : index
    %c0_4 = arith.constant 0 : index
    %3 = vector.load %arg3[%c0_3, %c0_4] : memref<1x128xf32, #tpu.memory_space<vmem>>, vector<1x128xf32>
    %4 = vector.broadcast %3 : vector<1x128xf32> to vector<32x128xf32>
    %5 = arith.addf %2, %4 : vector<32x128xf32>
    %cst_5 = arith.constant 0.000000e+00 : f32
    %6 = vector.broadcast %cst_5 : f32 to vector<32x128xf32>
    %7 = arith.maximumf %5, %6 : vector<32x128xf32>
    %8 = arith.truncf %7 : vector<32x128xf32> to vector<32x128xbf16>
    %c0_6 = arith.constant 0 : index
    %c0_7 = arith.constant 0 : index
    %9 = vector.load %arg4[%c0_6, %c0_7] : memref<32x128xbf16, #tpu.memory_space<vmem>>, vector<32x128xbf16>
    tpu.vector_store %arg4[%c0_6, %c0_7], %8 {strides = array<i32>} : memref<32x128xbf16, #tpu.memory_space<vmem>>, vector<32x128xbf16>,
    return
  }
  func.func @transform_0(%arg0: i32) -> (i32, i32) {
    %c0_i32 = arith.constant 0 : i32
    %c0_i32_0 = arith.constant 0 : i32
    return %arg0, %c0_i32 : i32, i32
  }
  func.func @transform_1(%arg0: i32) -> (i32, i32) {
    %c0_i32 = arith.constant 0 : i32
    %c0_i32_0 = arith.constant 0 : i32
    %c0_i32_1 = arith.constant 0 : i32
    return %c0_i32, %c0_i32_0 : i32, i32
  }
  func.func @transform_2(%arg0: i32) -> (i32, i32) {
    %c0_i32 = arith.constant 0 : i32
    %c0_i32_0 = arith.constant 0 : i32
    %c0_i32_1 = arith.constant 0 : i32
    return %c0_i32, %c0_i32_0 : i32, i32
  }
  func.func @transform_3(%arg0: i32) -> (i32, i32) {
    %c0_i32 = arith.constant 0 : i32
    %c0_i32_0 = arith.constant 0 : i32
    return %arg0, %c0_i32 : i32, i32
  }
}

module attributes {stable_mosaic.version = 11 : i64} {
  func.func @_gemm_kernel(%arg0: i32, %arg1: memref<32x216xbf16, #tpu.memory_space<vmem>>, %arg2: memref<216x128xbf16, #tpu.memory_space<vmem>>, %arg3: memref<1x128xf32, #tpu.memory_space<vmem>>, %arg4: memref<32x128xf32, #tpu.memory_space<vmem>>) attributes {dimension_semantics = [#tpu.dimension_semantics<parallel>], iteration_bounds = array<i64: 1>, scalar_prefetch = 0 : i64, scratch_operands = 0 : i64, tpu.core_type = #tpu.core_type<tc>, window_params = [{transform_indices = @transform_0, window_bounds = array<i64: 32, 216>}, {pipeline_mode = #tpu.pipeline_mode<synchronous>, transform_indices = @transform_1, window_bounds = array<i64: 216, 128>}, {pipeline_mode = #tpu.pipeline_mode<synchronous>, transform_indices = @transform_2, window_bounds = array<i64: 1, 128>}, {transform_indices = @transform_3, window_bounds = array<i64: 32, 128>}]} {
    %c0 = arith.constant 0 : index
    %c0_0 = arith.constant 0 : index
    %0 = vector.load %arg1[%c0, %c0_0] : memref<32x216xbf16, #tpu.memory_space<vmem>>, vector<32x216xbf16>
    %c0_1 = arith.constant 0 : index
    %c0_2 = arith.constant 0 : index
    %1 = vector.load %arg2[%c0_1, %c0_2] : memref<216x128xbf16, #tpu.memory_space<vmem>>, vector<216x128xbf16>
    %cst = arith.constant dense<0.000000e+00> : vector<32x128xf32>
    %2 = tpu.matmul %0, %1, %cst {dimension_numbers = #tpu.dot_dimension_numbers<[1], [0], [0], [1], [0, 0, 1, 1], [], []>} : vector<32x216xbf16>, vector<216x128xbf16>, vector<32x128xf32> -> vector<32x128xf32>
    %c0_3 = arith.constant 0 : index
    %c0_4 = arith.constant 0 : index
    %3 = vector.load %arg3[%c0_3, %c0_4] : memref<1x128xf32, #tpu.memory_space<vmem>>, vector<1x128xf32>
    %4 = vector.broadcast %3 : vector<1x128xf32> to vector<32x128xf32>
    %5 = arith.addf %2, %4 : vector<32x128xf32>
    %c0_5 = arith.constant 0 : index
    %c0_6 = arith.constant 0 : index
    %6 = vector.load %arg4[%c0_5, %c0_6] : memref<32x128xf32, #tpu.memory_space<vmem>>, vector<32x128xf32>
    tpu.vector_store %arg4[%c0_5, %c0_6], %5 {strides = array<i32>} : memref<32x128xf32, #tpu.memory_space<vmem>>, vector<32x128xf32>,
    return
  }
  func.func @transform_0(%arg0: i32) -> (i32, i32) {
    %c0_i32 = arith.constant 0 : i32
    %c0_i32_0 = arith.constant 0 : i32
    return %arg0, %c0_i32 : i32, i32
  }
  func.func @transform_1(%arg0: i32) -> (i32, i32) {
    %c0_i32 = arith.constant 0 : i32
    %c0_i32_0 = arith.constant 0 : i32
    %c0_i32_1 = arith.constant 0 : i32
    return %c0_i32, %c0_i32_0 : i32, i32
  }
  func.func @transform_2(%arg0: i32) -> (i32, i32) {
    %c0_i32 = arith.constant 0 : i32
    %c0_i32_0 = arith.constant 0 : i32
    %c0_i32_1 = arith.constant 0 : i32
    return %c0_i32, %c0_i32_0 : i32, i32
  }
  func.func @transform_3(%arg0: i32) -> (i32, i32) {
    %c0_i32 = arith.constant 0 : i32
    %c0_i32_0 = arith.constant 0 : i32
    return %arg0, %c0_i32 : i32, i32
  }
}

module attributes {stable_mosaic.version = 11 : i64} {
  func.func @_mlp3_kernel(%arg0: i32, %arg1: memref<32x64xbf16, #tpu.memory_space<vmem>>, %arg2: memref<64x128xbf16, #tpu.memory_space<vmem>>, %arg3: memref<1x128xf32, #tpu.memory_space<vmem>>, %arg4: memref<128x128xbf16, #tpu.memory_space<vmem>>, %arg5: memref<1x128xf32, #tpu.memory_space<vmem>>, %arg6: memref<128x128xbf16, #tpu.memory_space<vmem>>, %arg7: memref<1x128xf32, #tpu.memory_space<vmem>>, %arg8: memref<32x128xf32, #tpu.memory_space<vmem>>) attributes {dimension_semantics = [#tpu.dimension_semantics<parallel>], iteration_bounds = array<i64: 1>, scalar_prefetch = 0 : i64, scratch_operands = 0 : i64, tpu.core_type = #tpu.core_type<tc>, window_params = [{transform_indices = @transform_0, window_bounds = array<i64: 32, 64>}, {pipeline_mode = #tpu.pipeline_mode<synchronous>, transform_indices = @transform_1, window_bounds = array<i64: 64, 128>}, {pipeline_mode = #tpu.pipeline_mode<synchronous>, transform_indices = @transform_2, window_bounds = array<i64: 1, 128>}, {pipeline_mode = #tpu.pipeline_mode<synchronous>, transform_indices = @transform_3, window_bounds = array<i64: 128, 128>}, {pipeline_mode = #tpu.pipeline_mode<synchronous>, transform_indices = @transform_4, window_bounds = array<i64: 1, 128>}, {pipeline_mode = #tpu.pipeline_mode<synchronous>, transform_indices = @transform_5, window_bounds = array<i64: 128, 128>}, {pipeline_mode = #tpu.pipeline_mode<synchronous>, transform_indices = @transform_6, window_bounds = array<i64: 1, 128>}, {transform_indices = @transform_7, window_bounds = array<i64: 32, 128>}]} {
    %c0 = arith.constant 0 : index
    %c0_0 = arith.constant 0 : index
    %0 = vector.load %arg1[%c0, %c0_0] : memref<32x64xbf16, #tpu.memory_space<vmem>>, vector<32x64xbf16>
    %c0_1 = arith.constant 0 : index
    %c0_2 = arith.constant 0 : index
    %1 = vector.load %arg2[%c0_1, %c0_2] : memref<64x128xbf16, #tpu.memory_space<vmem>>, vector<64x128xbf16>
    %cst = arith.constant dense<0.000000e+00> : vector<32x128xf32>
    %2 = tpu.matmul %0, %1, %cst {dimension_numbers = #tpu.dot_dimension_numbers<[1], [0], [0], [1], [0, 0, 1, 1], [], []>} : vector<32x64xbf16>, vector<64x128xbf16>, vector<32x128xf32> -> vector<32x128xf32>
    %c0_3 = arith.constant 0 : index
    %c0_4 = arith.constant 0 : index
    %3 = vector.load %arg3[%c0_3, %c0_4] : memref<1x128xf32, #tpu.memory_space<vmem>>, vector<1x128xf32>
    %4 = vector.broadcast %3 : vector<1x128xf32> to vector<32x128xf32>
    %5 = arith.addf %2, %4 : vector<32x128xf32>
    %cst_5 = arith.constant 0.000000e+00 : f32
    %6 = vector.broadcast %cst_5 : f32 to vector<32x128xf32>
    %7 = arith.cmpf oge, %5, %6 : vector<32x128xf32>
    %cst_6 = arith.constant 0.00999999977 : f32
    %8 = vector.broadcast %cst_6 : f32 to vector<32x128xf32>
    %9 = arith.mulf %8, %5 : vector<32x128xf32>
    %10 = arith.select %7, %5, %9 : vector<32x128xi1>, vector<32x128xf32>
    %11 = arith.truncf %10 : vector<32x128xf32> to vector<32x128xbf16>
    %c0_7 = arith.constant 0 : index
    %c0_8 = arith.constant 0 : index
    %12 = vector.load %arg4[%c0_7, %c0_8] : memref<128x128xbf16, #tpu.memory_space<vmem>>, vector<128x128xbf16>
    %cst_9 = arith.constant dense<0.000000e+00> : vector<32x128xf32>
    %13 = tpu.matmul %11, %12, %cst_9 {dimension_numbers = #tpu.dot_dimension_numbers<[1], [0], [0], [1], [0, 0, 1, 1], [], []>} : vector<32x128xbf16>, vector<128x128xbf16>, vector<32x128xf32> -> vector<32x128xf32>
    %c0_10 = arith.constant 0 : index
    %c0_11 = arith.constant 0 : index
    %14 = vector.load %arg5[%c0_10, %c0_11] : memref<1x128xf32, #tpu.memory_space<vmem>>, vector<1x128xf32>
    %15 = vector.broadcast %14 : vector<1x128xf32> to vector<32x128xf32>
    %16 = arith.addf %13, %15 : vector<32x128xf32>
    %cst_12 = arith.constant 0.000000e+00 : f32
    %17 = vector.broadcast %cst_12 : f32 to vector<32x128xf32>
    %18 = arith.cmpf oge, %16, %17 : vector<32x128xf32>
    %cst_13 = arith.constant 0.00999999977 : f32
    %19 = vector.broadcast %cst_13 : f32 to vector<32x128xf32>
    %20 = arith.mulf %19, %16 : vector<32x128xf32>
    %21 = arith.select %18, %16, %20 : vector<32x128xi1>, vector<32x128xf32>
    %22 = arith.truncf %21 : vector<32x128xf32> to vector<32x128xbf16>
    %c0_14 = arith.constant 0 : index
    %c0_15 = arith.constant 0 : index
    %23 = vector.load %arg6[%c0_14, %c0_15] : memref<128x128xbf16, #tpu.memory_space<vmem>>, vector<128x128xbf16>
    %cst_16 = arith.constant dense<0.000000e+00> : vector<32x128xf32>
    %24 = tpu.matmul %22, %23, %cst_16 {dimension_numbers = #tpu.dot_dimension_numbers<[1], [0], [0], [1], [0, 0, 1, 1], [], []>} : vector<32x128xbf16>, vector<128x128xbf16>, vector<32x128xf32> -> vector<32x128xf32>
    %c0_17 = arith.constant 0 : index
    %c0_18 = arith.constant 0 : index
    %25 = vector.load %arg7[%c0_17, %c0_18] : memref<1x128xf32, #tpu.memory_space<vmem>>, vector<1x128xf32>
    %26 = vector.broadcast %25 : vector<1x128xf32> to vector<32x128xf32>
    %27 = arith.addf %24, %26 : vector<32x128xf32>
    %c0_19 = arith.constant 0 : index
    %c0_20 = arith.constant 0 : index
    %28 = vector.load %arg8[%c0_19, %c0_20] : memref<32x128xf32, #tpu.memory_space<vmem>>, vector<32x128xf32>
    tpu.vector_store %arg8[%c0_19, %c0_20], %27 {strides = array<i32>} : memref<32x128xf32, #tpu.memory_space<vmem>>, vector<32x128xf32>,
    return
  }
  func.func @transform_0(%arg0: i32) -> (i32, i32) {
    %c0_i32 = arith.constant 0 : i32
    %c0_i32_0 = arith.constant 0 : i32
    return %arg0, %c0_i32 : i32, i32
  }
  func.func @transform_1(%arg0: i32) -> (i32, i32) {
    %c0_i32 = arith.constant 0 : i32
    %c0_i32_0 = arith.constant 0 : i32
    %c0_i32_1 = arith.constant 0 : i32
    return %c0_i32, %c0_i32_0 : i32, i32
  }
  func.func @transform_2(%arg0: i32) -> (i32, i32) {
    %c0_i32 = arith.constant 0 : i32
    %c0_i32_0 = arith.constant 0 : i32
    %c0_i32_1 = arith.constant 0 : i32
    return %c0_i32, %c0_i32_0 : i32, i32
  }
  func.func @transform_3(%arg0: i32) -> (i32, i32) {
    %c0_i32 = arith.constant 0 : i32
    %c0_i32_0 = arith.constant 0 : i32
    %c0_i32_1 = arith.constant 0 : i32
    return %c0_i32, %c0_i32_0 : i32, i32
  }
  func.func @transform_4(%arg0: i32) -> (i32, i32) {
    %c0_i32 = arith.constant 0 : i32
    %c0_i32_0 = arith.constant 0 : i32
    %c0_i32_1 = arith.constant 0 : i32
    return %c0_i32, %c0_i32_0 : i32, i32
  }
  func.func @transform_5(%arg0: i32) -> (i32, i32) {
    %c0_i32 = arith.constant 0 : i32
    %c0_i32_0 = arith.constant 0 : i32
    %c0_i32_1 = arith.constant 0 : i32
    return %c0_i32, %c0_i32_0 : i32, i32
  }
  func.func @transform_6(%arg0: i32) -> (i32, i32) {
    %c0_i32 = arith.constant 0 : i32
    %c0_i32_0 = arith.constant 0 : i32
    %c0_i32_1 = arith.constant 0 : i32
    return %c0_i32, %c0_i32_0 : i32, i32
  }
  func.func @transform_7(%arg0: i32) -> (i32, i32) {
    %c0_i32 = arith.constant 0 : i32
    %c0_i32_0 = arith.constant 0 : i32
    return %arg0, %c0_i32 : i32, i32
  }
}

module attributes {stable_mosaic.version = 11 : i64} {
  func.func @_gemm_kernel(%arg0: i32, %arg1: memref<96x16xbf16, #tpu.memory_space<vmem>>, %arg2: memref<16x768xbf16, #tpu.memory_space<vmem>>, %arg3: memref<1x768xf32, #tpu.memory_space<vmem>>, %arg4: memref<96x768xf32, #tpu.memory_space<vmem>>) attributes {dimension_semantics = [#tpu.dimension_semantics<parallel>], iteration_bounds = array<i64: 1>, scalar_prefetch = 0 : i64, scratch_operands = 0 : i64, tpu.core_type = #tpu.core_type<tc>, window_params = [{transform_indices = @transform_0, window_bounds = array<i64: 96, 16>}, {pipeline_mode = #tpu.pipeline_mode<synchronous>, transform_indices = @transform_1, window_bounds = array<i64: 16, 768>}, {pipeline_mode = #tpu.pipeline_mode<synchronous>, transform_indices = @transform_2, window_bounds = array<i64: 1, 768>}, {transform_indices = @transform_3, window_bounds = array<i64: 96, 768>}]} {
    %c0 = arith.constant 0 : index
    %c0_0 = arith.constant 0 : index
    %0 = vector.load %arg1[%c0, %c0_0] : memref<96x16xbf16, #tpu.memory_space<vmem>>, vector<96x16xbf16>
    %c0_1 = arith.constant 0 : index
    %c0_2 = arith.constant 0 : index
    %1 = vector.load %arg2[%c0_1, %c0_2] : memref<16x768xbf16, #tpu.memory_space<vmem>>, vector<16x768xbf16>
    %cst = arith.constant dense<0.000000e+00> : vector<96x768xf32>
    %2 = tpu.matmul %0, %1, %cst {dimension_numbers = #tpu.dot_dimension_numbers<[1], [0], [0], [1], [0, 0, 1, 1], [], []>} : vector<96x16xbf16>, vector<16x768xbf16>, vector<96x768xf32> -> vector<96x768xf32>
    %c0_3 = arith.constant 0 : index
    %c0_4 = arith.constant 0 : index
    %3 = vector.load %arg3[%c0_3, %c0_4] : memref<1x768xf32, #tpu.memory_space<vmem>>, vector<1x768xf32>
    %4 = vector.broadcast %3 : vector<1x768xf32> to vector<96x768xf32>
    %5 = arith.addf %2, %4 : vector<96x768xf32>
    %cst_5 = arith.constant 0.000000e+00 : f32
    %cst_6 = arith.constant 1.000000e+00 : f32
    %6 = vector.broadcast %cst_5 : f32 to vector<96x768xf32>
    %7 = arith.maximumf %6, %5 : vector<96x768xf32>
    %8 = vector.broadcast %cst_6 : f32 to vector<96x768xf32>
    %9 = arith.minimumf %8, %7 : vector<96x768xf32>
    %c0_7 = arith.constant 0 : index
    %c0_8 = arith.constant 0 : index
    %10 = vector.load %arg4[%c0_7, %c0_8] : memref<96x768xf32, #tpu.memory_space<vmem>>, vector<96x768xf32>
    tpu.vector_store %arg4[%c0_7, %c0_8], %9 {strides = array<i32>} : memref<96x768xf32, #tpu.memory_space<vmem>>, vector<96x768xf32>,
    return
  }
  func.func @transform_0(%arg0: i32) -> (i32, i32) {
    %c0_i32 = arith.constant 0 : i32
    %c0_i32_0 = arith.constant 0 : i32
    return %arg0, %c0_i32 : i32, i32
  }
  func.func @transform_1(%arg0: i32) -> (i32, i32) {
    %c0_i32 = arith.constant 0 : i32
    %c0_i32_0 = arith.constant 0 : i32
    %c0_i32_1 = arith.constant 0 : i32
    return %c0_i32, %c0_i32_0 : i32, i32
  }
  func.func @transform_2(%arg0: i32) -> (i32, i32) {
    %c0_i32 = arith.constant 0 : i32
    %c0_i32_0 = arith.constant 0 : i32
    %c0_i32_1 = arith.constant 0 : i32
    return %c0_i32, %c0_i32_0 : i32, i32
  }
  func.func @transform_3(%arg0: i32) -> (i32, i32) {
    %c0_i32 = arith.constant 0 : i32
    %c0_i32_0 = arith.constant 0 : i32
    return %arg0, %c0_i32 : i32, i32
  }
}

module attributes {stable_mosaic.version = 11 : i64} {
  func.func @_gemm_kernel(%arg0: i32, %arg1: memref<96x768xbf16, #tpu.memory_space<vmem>>, %arg2: memref<768x128xbf16, #tpu.memory_space<vmem>>, %arg3: memref<1x128xf32, #tpu.memory_space<vmem>>, %arg4: memref<96x128xf32, #tpu.memory_space<vmem>>) attributes {dimension_semantics = [#tpu.dimension_semantics<parallel>], iteration_bounds = array<i64: 1>, scalar_prefetch = 0 : i64, scratch_operands = 0 : i64, tpu.core_type = #tpu.core_type<tc>, window_params = [{transform_indices = @transform_0, window_bounds = array<i64: 96, 768>}, {pipeline_mode = #tpu.pipeline_mode<synchronous>, transform_indices = @transform_1, window_bounds = array<i64: 768, 128>}, {pipeline_mode = #tpu.pipeline_mode<synchronous>, transform_indices = @transform_2, window_bounds = array<i64: 1, 128>}, {transform_indices = @transform_3, window_bounds = array<i64: 96, 128>}]} {
    %c0 = arith.constant 0 : index
    %c0_0 = arith.constant 0 : index
    %0 = vector.load %arg1[%c0, %c0_0] : memref<96x768xbf16, #tpu.memory_space<vmem>>, vector<96x768xbf16>
    %c0_1 = arith.constant 0 : index
    %c0_2 = arith.constant 0 : index
    %1 = vector.load %arg2[%c0_1, %c0_2] : memref<768x128xbf16, #tpu.memory_space<vmem>>, vector<768x128xbf16>
    %cst = arith.constant dense<0.000000e+00> : vector<96x128xf32>
    %2 = tpu.matmul %0, %1, %cst {dimension_numbers = #tpu.dot_dimension_numbers<[1], [0], [0], [1], [0, 0, 1, 1], [], []>} : vector<96x768xbf16>, vector<768x128xbf16>, vector<96x128xf32> -> vector<96x128xf32>
    %c0_3 = arith.constant 0 : index
    %c0_4 = arith.constant 0 : index
    %3 = vector.load %arg3[%c0_3, %c0_4] : memref<1x128xf32, #tpu.memory_space<vmem>>, vector<1x128xf32>
    %4 = vector.broadcast %3 : vector<1x128xf32> to vector<96x128xf32>
    %5 = arith.addf %2, %4 : vector<96x128xf32>
    %c0_5 = arith.constant 0 : index
    %c0_6 = arith.constant 0 : index
    %6 = vector.load %arg4[%c0_5, %c0_6] : memref<96x128xf32, #tpu.memory_space<vmem>>, vector<96x128xf32>
    tpu.vector_store %arg4[%c0_5, %c0_6], %5 {strides = array<i32>} : memref<96x128xf32, #tpu.memory_space<vmem>>, vector<96x128xf32>,
    return
  }
  func.func @transform_0(%arg0: i32) -> (i32, i32) {
    %c0_i32 = arith.constant 0 : i32
    %c0_i32_0 = arith.constant 0 : i32
    return %arg0, %c0_i32 : i32, i32
  }
  func.func @transform_1(%arg0: i32) -> (i32, i32) {
    %c0_i32 = arith.constant 0 : i32
    %c0_i32_0 = arith.constant 0 : i32
    %c0_i32_1 = arith.constant 0 : i32
    return %c0_i32, %c0_i32_0 : i32, i32
  }
  func.func @transform_2(%arg0: i32) -> (i32, i32) {
    %c0_i32 = arith.constant 0 : i32
    %c0_i32_0 = arith.constant 0 : i32
    %c0_i32_1 = arith.constant 0 : i32
    return %c0_i32, %c0_i32_0 : i32, i32
  }
  func.func @transform_3(%arg0: i32) -> (i32, i32) {
    %c0_i32 = arith.constant 0 : i32
    %c0_i32_0 = arith.constant 0 : i32
    return %arg0, %c0_i32 : i32, i32
  }
}

module attributes {stable_mosaic.version = 11 : i64} {
  func.func @_img_ssd_kernel(%arg0: i32, %arg1: memref<32x768xf32, #tpu.memory_space<vmem>>, %arg2: memref<1x32x768xf32, #tpu.memory_space<vmem>>, %arg3: memref<1x1x768xf32, #tpu.memory_space<vmem>>) attributes {dimension_semantics = [#tpu.dimension_semantics<parallel>], iteration_bounds = array<i64: 3>, scalar_prefetch = 0 : i64, scratch_operands = 0 : i64, tpu.core_type = #tpu.core_type<tc>, window_params = [{pipeline_mode = #tpu.pipeline_mode<synchronous>, transform_indices = @transform_0, window_bounds = array<i64: 32, 768>}, {transform_indices = @transform_1, window_bounds = array<i64: 1, 32, 768>}, {transform_indices = @transform_2, window_bounds = array<i64: 1, 1, 768>}]} {
    %c0 = arith.constant 0 : index
    %c0_0 = arith.constant 0 : index
    %c0_1 = arith.constant 0 : index
    %0 = vector.load %arg2[%c0, %c0_0, %c0_1] : memref<1x32x768xf32, #tpu.memory_space<vmem>>, vector<1x32x768xf32>
    %1 = vector.shape_cast %0 : vector<1x32x768xf32> to vector<32x768xf32>
    %c0_2 = arith.constant 0 : index
    %c0_3 = arith.constant 0 : index
    %2 = vector.load %arg1[%c0_2, %c0_3] : memref<32x768xf32, #tpu.memory_space<vmem>>, vector<32x768xf32>
    %3 = arith.subf %1, %2 : vector<32x768xf32>
    %4 = arith.mulf %3, %3 : vector<32x768xf32>
    %cst = arith.constant dense<0.000000e+00> : vector<768xf32>
    %5 = vector.multi_reduction <add>, %4, %cst [0] : vector<32x768xf32> to vector<768xf32>
    %6 = vector.shape_cast %5 : vector<768xf32> to vector<1x768xf32>
    %7 = vector.shape_cast %6 : vector<1x768xf32> to vector<1x1x768xf32>
    %c0_4 = arith.constant 0 : index
    %c0_5 = arith.constant 0 : index
    %c0_6 = arith.constant 0 : index
    %8 = vector.load %arg3[%c0_4, %c0_5, %c0_6] : memref<1x1x768xf32, #tpu.memory_space<vmem>>, vector<1x1x768xf32>
    tpu.vector_store %arg3[%c0_4, %c0_5, %c0_6], %7 {strides = array<i32>} : memref<1x1x768xf32, #tpu.memory_space<vmem>>, vector<1x1x768xf32>,
    return
  }
  func.func @transform_0(%arg0: i32) -> (i32, i32) {
    %c0_i32 = arith.constant 0 : i32
    %c0_i32_0 = arith.constant 0 : i32
    %c0_i32_1 = arith.constant 0 : i32
    return %c0_i32, %c0_i32_0 : i32, i32
  }
  func.func @transform_1(%arg0: i32) -> (i32, i32, i32) {
    %c0_i32 = arith.constant 0 : i32
    %c0_i32_0 = arith.constant 0 : i32
    %c0_i32_1 = arith.constant 0 : i32
    return %arg0, %c0_i32, %c0_i32_0 : i32, i32, i32
  }
  func.func @transform_2(%arg0: i32) -> (i32, i32, i32) {
    %c0_i32 = arith.constant 0 : i32
    %c0_i32_0 = arith.constant 0 : i32
    %c0_i32_1 = arith.constant 0 : i32
    return %arg0, %c0_i32, %c0_i32_0 : i32, i32, i32
  }
}

</mosaic_0001>

<bundles_post_ra>
// kernel: prog_sic_forward.14
= control target key start
LH: loop header
LB: loop body
LE: loop exit
PB: predicated region body
PF: predicated region fallthrough
CT: control target
= control target key end

     0   :  { %s1075_s1 = inlined_call_operand.vmem [shape: bf16[768,128], index: 1, kind: input, shape index: {}]   ;;  %s1076_s0 = inlined_call_operand.vmem [shape: bf16[32,768], index: 0, kind: input, shape index: {}]   ;;  %s1077_s2 = inlined_call_operand.vmem [shape: f32[1,128], index: 2, kind: input, shape index: {}]   ;;  %s1078_s3 = inlined_call_operand.vmem [shape: f32[32,128], index: 3, kind: output, shape index: {}]  }
   0x1   :  { %v794_v0 = vld [vmem:[%s1075_s1 + $0x40] sm:$0xff]   ;;  %v798_v4 = vld [vmem:[%s1075_s1 + $0x48] sm:$0xff]   ;;  %v802_v8 = vld [vmem:[%s1075_s1 + $0x50] sm:$0xff]  }
   0x2   :  { %v795_v1 = vld [vmem:[%s1075_s1 + $0xc0] sm:$0xff]   ;;  %694 = vmatprep.subr.bf16.mxu0 %v794_v0  ;;  %v799_v5 = vld [vmem:[%s1075_s1 + $0xc8] sm:$0xff]   ;;  %v803_v9 = vld [vmem:[%s1075_s1 + $0xd0] sm:$0xff]  }
   0x3   :  { %v796_v2 = vld [vmem:[%s1075_s1] sm:$0xff]   ;;  %722 = vmatprep.subr.bf16.mxu1 %v795_v1  ;;  %v800_v6 = vld [vmem:[%s1075_s1 + $0x8] sm:$0xff]   ;;  %v804_v10 = vld [vmem:[%s1075_s1 + $0x10] sm:$0xff]  }
   0x4   :  { %v797_v3 = vld [vmem:[%s1075_s1 + $0x80] sm:$0xff]   ;;  %695 = vmatpush3.bf16.msra.mxu0 %v796_v2  ;;  %v801_v7 = vld [vmem:[%s1075_s1 + $0x88] sm:$0xff]   ;;  %v805_v11 = vld [vmem:[%s1075_s1 + $0x90] sm:$0xff]  }
   0x5   :  { %723 = vmatpush3.bf16.msra.mxu1 %v797_v3  ;;  %696 = vmatprep.subr.bf16.mxu0 %v798_v4  ;;  %v806_v12 = vld [vmem:[%s1075_s1 + $0x58] sm:$0xff]   ;;  %v810_v16 = vld [vmem:[%s1075_s1 + $0x60] sm:$0xff]   ;;  %v814_v20 = vld [vmem:[%s1075_s1 + $0x68] sm:$0xff]  }
   0x6   :  { %724 = vmatprep.subr.bf16.mxu1 %v799_v5  ;;  %v807_v13 = vld [vmem:[%s1075_s1 + $0xd8] sm:$0xff]   ;;  %v811_v17 = vld [vmem:[%s1075_s1 + $0xe0] sm:$0xff]   ;;  %v815_v21 = vld [vmem:[%s1075_s1 + $0xe8] sm:$0xff]  }
   0x7   :  { %v808_v14 = vld [vmem:[%s1075_s1 + $0x18] sm:$0xff]   ;;  %v812_v18 = vld [vmem:[%s1075_s1 + $0x20] sm:$0xff]   ;;  %v816_v22 = vld [vmem:[%s1075_s1 + $0x28] sm:$0xff]  }
   0x8   :  { %697 = vmatpush3.bf16.msra.mxu0 %v800_v6  ;;  %v809_v15 = vld [vmem:[%s1075_s1 + $0x98] sm:$0xff]   ;;  %v813_v19 = vld [vmem:[%s1075_s1 + $0xa0] sm:$0xff]   ;;  %v817_v23 = vld [vmem:[%s1075_s1 + $0xa8] sm:$0xff]  }
   0x9   :  { %725 = vmatpush3.bf16.msra.mxu1 %v801_v7  ;;  %698 = vmatprep.subr.bf16.mxu0 %v802_v8  ;;  %v818_v24 = vld [vmem:[%s1075_s1 + $0x70] sm:$0xff]   ;;  %v822_v28 = vld [vmem:[%s1075_s1 + $0x78] sm:$0xff]   ;;  %v829_v34 = vld [vmem:[%s1076_s0 + $0x8] ss:$24 sps:$4 sm:$0xff]  }
   0xa   :  { %726 = vmatprep.subr.bf16.mxu1 %v803_v9  ;;  %v819_v25 = vld [vmem:[%s1075_s1 + $0xf0] sm:$0xff]   ;;  %v823_v29 = vld [vmem:[%s1075_s1 + $0xf8] sm:$0xff]   ;;  %v831_v35 = vld [vmem:[%s1076_s0 + $0xc] ss:$24 sps:$4 sm:$0xff]  }
   0xb   :  { %v820_v26 = vld [vmem:[%s1075_s1 + $0x30] sm:$0xff]   ;;  %v824_v30 = vld [vmem:[%s1075_s1 + $0x38] sm:$0xff]   ;;  %v832_v36 = vld [vmem:[%s1075_s1 + $0x140] sm:$0xff]   ;;  %559 = vmatprep.mubr.bf16.mxu1 %v831_v35 }
   0xc   :  { %699 = vmatpush3.bf16.msra.mxu0 %v804_v10  ;;  %v821_v27 = vld [vmem:[%s1075_s1 + $0xb0] sm:$0xff]   ;;  %v825_v31 = vld [vmem:[%s1075_s1 + $0xb8] sm:$0xff]   ;;  %v833_v37 = vld [vmem:[%s1075_s1 + $0x100] sm:$0xff]  }
   0xd   :  { %727 = vmatpush3.bf16.msra.mxu1 %v805_v11  ;;  %700 = vmatprep.subr.bf16.mxu0 %v806_v12  ;;  %v826_v32 = vld [vmem:[%s1076_s0] ss:$24 sps:$4 sm:$0xff]   ;;  %v828_v33 = vld [vmem:[%s1076_s0 + $0x4] ss:$24 sps:$4 sm:$0xff]   ;;  %v834_v38 = vld [vmem:[%s1075_s1 + $0x148] sm:$0xff]  }
   0xe   :  { %728 = vmatprep.subr.bf16.mxu1 %v807_v13  ;;  %510 = vmatprep.mubr.bf16.mxu0 %v828_v33  ;;  %v835_v39 = vld [vmem:[%s1075_s1 + $0x108] sm:$0xff]   ;;  %v836_v40 = vld [vmem:[%s1075_s1 + $0x150] sm:$0xff]   ;;  %v838_v42 = vld [vmem:[%s1075_s1 + $0x158] sm:$0xff]  }
   0xf   :  { %v837_v41 = vld [vmem:[%s1075_s1 + $0x110] sm:$0xff]   ;;  %v839_v43 = vld [vmem:[%s1075_s1 + $0x118] sm:$0xff]   ;;  %v840_v47 = vld [vmem:[%s1075_s1 + $0x160] sm:$0xff]  }
  0x10   :  { %701 = vmatpush3.bf16.msra.mxu0 %v808_v14  ;;  %v842_v44 = vld [vmem:[%s1076_s0 + $0x34] ss:$24 sps:$4 sm:$0xff]   ;;  %v844_v45 = vld [vmem:[%s1076_s0 + $0x30] ss:$24 sps:$4 sm:$0xff]   ;;  %v841_v49 = vld [vmem:[%s1075_s1 + $0x120] sm:$0xff]  }
  0x11   :  { %729 = vmatpush3.bf16.msra.mxu1 %v809_v15  ;;  %702 = vmatprep.subr.bf16.mxu0 %v810_v16  ;;  %v845_v46 = vld [vmem:[%s1076_s0 + $0x3c] ss:$24 sps:$4 sm:$0xff]   ;;  %v848_v48 = vld [vmem:[%s1076_s0 + $0x38] ss:$24 sps:$4 sm:$0xff]   ;;  %v847_v50 = vld [vmem:[%s1075_s1 + $0x168] sm:$0xff]  }
  0x12   :  { %730 = vmatprep.subr.bf16.mxu1 %v811_v17  ;;  %v849_v51 = vld [vmem:[%s1075_s1 + $0x128] sm:$0xff]   ;;  %v850_v53 = vld [vmem:[%s1075_s1 + $0x170] sm:$0xff]   ;;  %v859_v54 = vld [vmem:[%s1076_s0 + $0x44] ss:$24 sps:$4 sm:$0xff]  }
  0x13   :  { %v856_v52 = vld [vmem:[%s1076_s0 + $0x14] ss:$24 sps:$4 sm:$0xff]   ;;  %v852_v56 = vld [vmem:[%s1075_s1 + $0x178] sm:$0xff]   ;;  %v854_v58 = vld [vmem:[%s1076_s0 + $0x10] ss:$24 sps:$4 sm:$0xff]  }
  0x14   :  { %703 = vmatpush3.bf16.msra.mxu0 %v812_v18  ;;  %v851_v55 = vld [vmem:[%s1075_s1 + $0x130] sm:$0xff]   ;;  %v853_v57 = vld [vmem:[%s1075_s1 + $0x138] sm:$0xff]   ;;  %v633_v62 = vld [vmem:[%s1077_s2] ss:$0 sm:$0xff] }
  0x15   :  { %731 = vmatpush3.bf16.msra.mxu1 %v813_v19  ;;  %704 = vmatprep.subr.bf16.mxu0 %v814_v20  ;;  %v857_v59 = vld [vmem:[%s1076_s0 + $0x40] ss:$24 sps:$4 sm:$0xff]  }
  0x16   :  { %732 = vmatprep.subr.bf16.mxu1 %v815_v21 }
  0x18   :  { %705 = vmatpush3.bf16.msra.mxu0 %v816_v22 }
  0x19   :  { %733 = vmatpush3.bf16.msra.mxu1 %v817_v23  ;;  %706 = vmatprep.subr.bf16.mxu0 %v818_v24 }
  0x1a   :  { %734 = vmatprep.subr.bf16.mxu1 %v819_v25 }
  0x1c   :  { %707 = vmatpush3.bf16.msra.mxu0 %v820_v26 }
  0x1d   :  { %735 = vmatpush3.bf16.msra.mxu1 %v821_v27  ;;  %708 = vmatprep.subr.bf16.mxu0 %v822_v28 }
  0x1e   :  { %736 = vmatprep.subr.bf16.mxu1 %v823_v29 }
  0x20   :  { %709 = vmatpush3.bf16.msra.mxu0 %v824_v30 }
  0x21   :  { %737 = vmatpush3.bf16.msra.mxu1 %v825_v31  ;;  %750 = vmatprep.subr.bf16.mxu0 %v832_v36 }
  0x22   :  { %778 = vmatprep.subr.bf16.mxu1 %v832_v36 }
  0x23   :  { %511 = vmatmul.mubr.bf16.vlgmr.msra.gmra.mrb[0].mxu0 %v826_v32 }
  0x24   :  { %560 = vmatmul.mubr.bf16.vlgmr.msra.gmra.mrb[0].mxu1 %v829_v34  ;;  %751 = vmatpush3.bf16.msra.mxu0 %v833_v37 }
  0x25   :  { %786 = vmatpush3.bf16.msra.mxu1 %v833_v37  ;;  %752 = vmatprep.subr.bf16.mxu0 %v834_v38 }
  0x26   :  { %779 = vmatprep.subr.bf16.mxu1 %v834_v38  ;;  %518 = vmatprep.mubr.bf16.mxu0 %v842_v44 }
  0x27   :  { %567 = vmatprep.mubr.bf16.mxu1 %v845_v46 }
  0x28   :  { %753 = vmatpush3.bf16.msra.mxu0 %v835_v39 }
  0x29   :  { %787 = vmatpush3.bf16.msra.mxu1 %v835_v39  ;;  %754 = vmatprep.subr.bf16.mxu0 %v836_v40 }
  0x2a   :  { %780 = vmatprep.subr.bf16.mxu1 %v836_v40 }
  0x2b   :  { %519 = vmatmul.mubr.bf16.gmra.mrb[4].mxu0 %v844_v45 }
  0x2c   :  { %755 = vmatpush3.bf16.msra.mxu0 %v837_v41  ;;  %568 = vmatmul.mubr.bf16.gmra.mrb[4].mxu1 %v848_v48 }
  0x2d   :  { %788 = vmatpush3.bf16.msra.mxu1 %v837_v41  ;;  %756 = vmatprep.subr.bf16.mxu0 %v838_v42 }
  0x2e   :  { %781 = vmatprep.subr.bf16.mxu1 %v838_v42  ;;  %608 = vmatprep.mubr.bf16.mxu0 %v856_v52 }
  0x2f   :  { %616 = vmatprep.mubr.bf16.mxu1 %v859_v54 }
  0x30   :  { %757 = vmatpush3.bf16.msra.mxu0 %v839_v43 }
  0x31   :  { %789 = vmatpush3.bf16.msra.mxu1 %v839_v43  ;;  %758 = vmatprep.subr.bf16.mxu0 %v840_v47 }
  0x32   :  { %782 = vmatprep.subr.bf16.mxu1 %v840_v47 }
  0x34   :  { %759 = vmatpush3.bf16.msra.mxu0 %v841_v49 }
  0x35   :  { %790 = vmatpush3.bf16.msra.mxu1 %v841_v49  ;;  %760 = vmatprep.subr.bf16.mxu0 %v847_v50 }
  0x36   :  { %783 = vmatprep.subr.bf16.mxu1 %v847_v50 }
  0x38   :  { %761 = vmatpush3.bf16.msra.mxu0 %v849_v51 }
  0x39   :  { %791 = vmatpush3.bf16.msra.mxu1 %v849_v51  ;;  %762 = vmatprep.subr.bf16.mxu0 %v850_v53 }
  0x3a   :  { %784 = vmatprep.subr.bf16.mxu1 %v850_v53 }
  0x3c   :  { %763 = vmatpush3.bf16.msra.mxu0 %v851_v55 }
  0x3d   :  { %792 = vmatpush3.bf16.msra.mxu1 %v851_v55  ;;  %764 = vmatprep.subr.bf16.mxu0 %v852_v56 }
  0x3e   :  { %785 = vmatprep.subr.bf16.mxu1 %v852_v56 }
  0x40   :  { %765 = vmatpush3.bf16.msra.mxu0 %v853_v57 }
  0x41   :  { %793 = vmatpush3.bf16.msra.mxu1 %v853_v57 }
  0x43   :  { %609 = vmatmul.mubr.bf16.vlgmr.msra.gmra.mrb[8].mxu0 %v854_v58 }
  0x44   :  { %617 = vmatmul.mubr.bf16.vlgmr.msra.gmra.mrb[8].mxu1 %v857_v59 }
  0xf6   :  { %v710_v60 = vpop.f32.mrb[0].mxu0 }
  0xf7   :  { %v738_v61 = vpop.f32.mrb[0].mxu1  ;;  %v711_v63 = vpop.f32.mrb[1].mxu0 }
  0xf8   :  { %v712_v0 = vadd.f32 %v711_v63, %v710_v60  ;;  %v739_v1 = vpop.f32.mrb[1].mxu1  ;;  %v713_v2 = vpop.f32.mrb[2].mxu0 }
  0xf9   :  { %v740_v3 = vadd.f32 %v739_v1, %v738_v61  ;;  %v741_v4 = vpop.f32.mrb[2].mxu1  ;;  %v714_v5 = vpop.f32.mrb[3].mxu0 }
  0xfa   :  { %v513_v6 = vadd.f32 %v712_v0, %v633_v62  ;;  %v715_v7 = vadd.f32 %v714_v5, %v713_v2  ;;  %v742_v8 = vpop.f32.mrb[3].mxu1 }
  0xfb   :  { %v743_v9 = vadd.f32 %v742_v8, %v741_v4 }
  0xfc   :  { %v562_v10 = vadd.f32 %v740_v3, %v513_v6  ;;  %v516_v11 = vadd.f32 %v715_v7, %v633_v62 }
  0xfe   :  { %v565_v12 = vadd.f32 %v743_v9, %v516_v11  ;;  %v716_v13 = vpop.f32.mrb[4].mxu0 }
  0xff   :  { %v717_v14 = vpop.f32.mrb[5].mxu0  ;;  %v744_v15 = vpop.f32.mrb[4].mxu1 }
 0x100   :  { %v718_v16 = vadd.f32 %v717_v14, %v716_v13  ;;  %v719_v17 = vpop.f32.mrb[6].mxu0  ;;  %v745_v18 = vpop.f32.mrb[5].mxu1 }
 0x101   :  { %v720_v19 = vpop.f32.mrb[7].mxu0  ;;  %v746_v20 = vadd.f32 %v745_v18, %v744_v15  ;;  %v747_v21 = vpop.f32.mrb[6].mxu1 }
 0x102   :  { %v521_v22 = vadd.f32 %v718_v16, %v633_v62  ;;  %v721_v23 = vadd.f32 %v720_v19, %v719_v17  ;;  %v748_v24 = vpop.f32.mrb[7].mxu1 }
 0x103   :  { %v749_v25 = vadd.f32 %v748_v24, %v747_v21 }
 0x104   :  { %v524_v26 = vadd.f32 %v721_v23, %v633_v62  ;;  %v570_v27 = vadd.f32 %v746_v20, %v521_v22 }
 0x106   :  { %v573_v28 = vadd.f32 %v749_v25, %v524_v26 }
 0x116   :  { %v766_v29 = vpop.f32.mrb[8].mxu0 }
 0x117   :  { %v772_v30 = vpop.f32.mrb[8].mxu1  ;;  %v767_v31 = vpop.f32.mrb[9].mxu0 }
 0x118   :  { %v768_v32 = vadd.f32 %v767_v31, %v766_v29  ;;  %v773_v33 = vpop.f32.mrb[9].mxu1  ;;  %v769_v34 = vpop.f32.mrb[10].mxu0 }
 0x119   :  { %v774_v35 = vadd.f32 %v773_v33, %v772_v30  ;;  %v775_v36 = vpop.f32.mrb[10].mxu1  ;;  %v770_v37 = vpop.f32.mrb[11].mxu0 }
 0x11a   :  { %v611_v38 = vadd.f32 %v768_v32, %v562_v10  ;;  %v771_v39 = vadd.f32 %v770_v37, %v769_v34  ;;  %v776_v40 = vpop.f32.mrb[11].mxu1 }
 0x11b   :  { %v619_v41 = vadd.f32 %v774_v35, %v570_v27  ;;  %v777_v42 = vadd.f32 %v776_v40, %v775_v36 }
 0x11c   :  { %625 = vst [vmem:[%s1078_s3] sm:$0xff] %v611_v38  ;;  %v614_v43 = vadd.f32 %v771_v39, %v565_v12 }
 0x11d   :  { %627 = vst [vmem:[%s1078_s3 + $0x10] sm:$0xff] %v619_v41  ;;  %v622_v44 = vadd.f32 %v777_v42, %v573_v28 }
 0x11e   :  { %626 = vst [vmem:[%s1078_s3 + $0x8] sm:$0xff] %v614_v43 }
 0x11f   :  { %628 = vst [vmem:[%s1078_s3 + $0x18] sm:$0xff] %v622_v44 }

// kernel: prog_sic_forward.24
= control target key start
LH: loop header
LB: loop body
LE: loop exit
PB: predicated region body
PF: predicated region fallthrough
CT: control target
= control target key end

     0   :  { %v483_v0 = vmov 0   ;;  %vm268_vm0 = vcmask 130048   ;;  %s629_s1 = inlined_call_operand.vmem [shape: bf16[400,128], index: 1, kind: input, shape index: {}]   ;;  %s630_s0 = inlined_call_operand.vmem [shape: bf16[32,400], index: 0, kind: input, shape index: {}]   ;;  %s631_s2 = inlined_call_operand.vmem [shape: f32[1,128], index: 2, kind: input, shape index: {}]   ;;  %s632_s3 = inlined_call_operand.vmem [shape: f32[32,128], index: 3, kind: output, shape index: {}]  }
   0x1   :  { %324 = vmatprep.subr.bf16.mxu1 %v483_v0  ;;  %v446_v1 = vld [vmem:[%s629_s1 + $0x40] sm:$0xff]   ;;  %v449_v4 = vld [vmem:[%s629_s1 + $0x48] sm:$0xff]   ;;  %v452_v7 = vld [vmem:[%s629_s1 + $0x50] sm:$0xff]  }
   0x2   :  { %v447_v2 = vld [vmem:[%s629_s1 + $0x80] sm:$0xff]   ;;  %417 = vmatprep.subr.bf16.mxu0 %v446_v1  ;;  %v450_v5 = vld [vmem:[%s629_s1 + $0x88] sm:$0xff]   ;;  %v453_v8 = vld [vmem:[%s629_s1 + $0x90] sm:$0xff]  }
   0x3   :  { %v448_v3 = vld [vmem:[%s629_s1] sm:$0xff]   ;;  %325 = vmatpush1.bf16.msra.mxu1 %v447_v2  ;;  %v451_v6 = vld [vmem:[%s629_s1 + $0x8] sm:$0xff]   ;;  %v454_v9 = vld [vmem:[%s629_s1 + $0x10] sm:$0xff]  }
   0x4   :  { %418 = vmatpush3.bf16.msra.mxu0 %v448_v3  ;;  %326 = vmatprep.subr.bf16.mxu1 %v483_v0  ;;  %v455_v10 = vld [vmem:[%s629_s1 + $0x58] sm:$0xff]   ;;  %v458_v13 = vld [vmem:[%s629_s1 + $0x60] sm:$0xff]   ;;  %v461_v16 = vld [vmem:[%s629_s1 + $0x68] sm:$0xff]  }
   0x5   :  { %419 = vmatprep.subr.bf16.mxu0 %v449_v4  ;;  %v456_v11 = vld [vmem:[%s629_s1 + $0x98] sm:$0xff]   ;;  %v459_v14 = vld [vmem:[%s629_s1 + $0xa0] sm:$0xff]   ;;  %v462_v17 = vld [vmem:[%s629_s1 + $0xa8] sm:$0xff]  }
   0x6   :  { %v457_v12 = vld [vmem:[%s629_s1 + $0x18] sm:$0xff]   ;;  %v460_v15 = vld [vmem:[%s629_s1 + $0x20] sm:$0xff]   ;;  %v463_v18 = vld [vmem:[%s629_s1 + $0x28] sm:$0xff]  }
   0x7   :  { %327 = vmatpush1.bf16.msra.mxu1 %v450_v5  ;;  %v464_v19 = vld [vmem:[%s629_s1 + $0x70] sm:$0xff]   ;;  %v467_v22 = vld [vmem:[%s629_s1 + $0x78] sm:$0xff]   ;;  %v473_v28 = vld [vmem:[%s629_s1 + $0xc0] sm:$0xff]  }
   0x8   :  { %420 = vmatpush3.bf16.msra.mxu0 %v451_v6  ;;  %328 = vmatprep.subr.bf16.mxu1 %v483_v0  ;;  %v465_v20 = vld [vmem:[%s629_s1 + $0xb0] sm:$0xff]   ;;  %v468_v24 = vld [vmem:[%s629_s1 + $0xb8] sm:$0xff]   ;;  %v381_v36 = vld [vmem:[%s631_s2] ss:$0 sm:$0xff] }
   0x9   :  { %421 = vmatprep.subr.bf16.mxu0 %v452_v7  ;;  %v466_v21 = vld [vmem:[%s629_s1 + $0x30] sm:$0xff]   ;;  %v476_v25 = vld [vmem:[%s630_s0 + $0xc] ss:$16 sps:$4 sm:$0xff]   ;;  %v474_v30 = vld [vmem:[%s630_s0 + $0x8] ss:$16 sps:$4 sm:$0xff]  }
   0xa   :  { %v472_v23 = vld [vmem:[%s630_s0 + $0x4] ss:$16 sps:$4 sm:$0xff]   ;;  %v469_v26 = vld [vmem:[%s629_s1 + $0x38] sm:$0xff]   ;;  %415 = vmatprep.mubr.msk.bf16.mxu1 %vm268_vm0, %v476_v25  ;;  %v470_v27 = vld [vmem:[%s630_s0] ss:$16 sps:$4 sm:$0xff]  }
   0xb   :  { %329 = vmatpush1.bf16.msra.mxu1 %v453_v8  ;;  %307 = vmatprep.mubr.bf16.mxu0 %v472_v23  ;;  %v477_v29 = vld [vmem:[%s630_s0 + $0x24] ss:$16 sps:$4 sm:$0xff]   ;;  %v480_v31 = vld [vmem:[%s630_s0 + $0x2c] ss:$16 sps:$4 sm:$0xff]   ;;  %v479_v32 = vld [vmem:[%s630_s0 + $0x20] ss:$16 sps:$4 sm:$0xff]  }
   0xc   :  { %422 = vmatpush3.bf16.msra.mxu0 %v454_v9  ;;  %330 = vmatprep.subr.bf16.mxu1 %v483_v0  ;;  %v482_v33 = vld [vmem:[%s630_s0 + $0x28] ss:$16 sps:$4 sm:$0xff]  }
   0xd   :  { %423 = vmatprep.subr.bf16.mxu0 %v455_v10 }
   0xf   :  { %331 = vmatpush1.bf16.msra.mxu1 %v456_v11 }
  0x10   :  { %424 = vmatpush3.bf16.msra.mxu0 %v457_v12  ;;  %332 = vmatprep.subr.bf16.mxu1 %v483_v0 }
  0x11   :  { %425 = vmatprep.subr.bf16.mxu0 %v458_v13 }
  0x13   :  { %333 = vmatpush1.bf16.msra.mxu1 %v459_v14 }
  0x14   :  { %426 = vmatpush3.bf16.msra.mxu0 %v460_v15  ;;  %334 = vmatprep.subr.bf16.mxu1 %v483_v0 }
  0x15   :  { %427 = vmatprep.subr.bf16.mxu0 %v461_v16 }
  0x17   :  { %335 = vmatpush1.bf16.msra.mxu1 %v462_v17 }
  0x18   :  { %428 = vmatpush3.bf16.msra.mxu0 %v463_v18  ;;  %336 = vmatprep.subr.bf16.mxu1 %v483_v0 }
  0x19   :  { %429 = vmatprep.subr.bf16.mxu0 %v464_v19 }
  0x1b   :  { %337 = vmatpush1.bf16.msra.mxu1 %v465_v20 }
  0x1c   :  { %430 = vmatpush3.bf16.msra.mxu0 %v466_v21  ;;  %338 = vmatprep.subr.bf16.mxu1 %v483_v0 }
  0x1d   :  { %431 = vmatprep.subr.bf16.mxu0 %v467_v22 }
  0x1f   :  { %339 = vmatpush1.bf16.msra.mxu1 %v468_v24 }
  0x20   :  { %432 = vmatpush3.bf16.msra.mxu0 %v469_v26  ;;  %340 = vmatprep.subr.bf16.mxu1 %v483_v0 }
  0x23   :  { %308 = vmatmul.mubr.bf16.vlgmr.msra.gmra.mrb[0].mxu0 %v470_v27  ;;  %341 = vmatpush1.bf16.msra.mxu1 %v473_v28 }
  0x24   :  { %315 = vmatprep.mubr.bf16.mxu0 %v477_v29 }
  0x26   :  { %357 = vmatmul.mubr.bf16.vlgmr.msra.gmra.mrb[0].mxu1 %v474_v30 }
  0x27   :  { %416 = vmatprep.mubr.msk.bf16.mxu1 %vm268_vm0, %v480_v31 }
  0x2b   :  { %316 = vmatmul.mubr.bf16.gmra.mrb[4].mxu0 %v479_v32 }
  0x2e   :  { %365 = vmatmul.mubr.bf16.gmra.mrb[4].mxu1 %v482_v33 }
  0xf6   :  { %v433_v34 = vpop.f32.mrb[0].mxu0 }
  0xf7   :  { %v434_v35 = vpop.f32.mrb[1].mxu0 }
  0xf8   :  { %v435_v37 = vadd.f32 %v434_v35, %v433_v34  ;;  %v436_v38 = vpop.f32.mrb[2].mxu0 }
  0xf9   :  { %v437_v39 = vpop.f32.mrb[3].mxu0  ;;  %v358_v40 = vpop.f32.mrb[0].mxu1 }
  0xfa   :  { %v438_v41 = vadd.f32 %v437_v39, %v436_v38  ;;  %v310_v42 = vadd.f32 %v435_v37, %v381_v36  ;;  %v360_v43 = vpop.f32.mrb[1].mxu1 }
  0xfb   :  { %v361_v44 = vpop.f32.mrb[2].mxu1 }
  0xfc   :  { %v359_v45 = vadd.f32 %v358_v40, %v310_v42  ;;  %v313_v46 = vadd.f32 %v438_v41, %v381_v36  ;;  %v363_v47 = vpop.f32.mrb[3].mxu1 }
  0xfe   :  { %373 = vst [vmem:[%s632_s3] sm:$0xff] %v359_v45  ;;  %v362_v48 = vadd.f32 %v361_v44, %v313_v46  ;;  %v439_v49 = vpop.f32.mrb[4].mxu0 }
  0xff   :  { %v440_v50 = vpop.f32.mrb[5].mxu0 }
 0x100   :  { %374 = vst [vmem:[%s632_s3 + $0x8] sm:$0xff] %v362_v48  ;;  %v441_v51 = vadd.f32 %v440_v50, %v439_v49  ;;  %v442_v52 = vpop.f32.mrb[6].mxu0 }
 0x101   :  { %v443_v53 = vpop.f32.mrb[7].mxu0  ;;  %v366_v54 = vpop.f32.mrb[4].mxu1 }
 0x102   :  { %v444_v55 = vadd.f32 %v443_v53, %v442_v52  ;;  %v318_v56 = vadd.f32 %v441_v51, %v381_v36  ;;  %v368_v57 = vpop.f32.mrb[5].mxu1 }
 0x103   :  { %v369_v58 = vpop.f32.mrb[6].mxu1 }
 0x104   :  { %v367_v59 = vadd.f32 %v366_v54, %v318_v56  ;;  %v321_v60 = vadd.f32 %v444_v55, %v381_v36  ;;  %v371_v61 = vpop.f32.mrb[7].mxu1 }
 0x106   :  { %375 = vst [vmem:[%s632_s3 + $0x10] sm:$0xff] %v367_v59  ;;  %v370_v62 = vadd.f32 %v369_v58, %v321_v60 }
 0x108   :  { %376 = vst [vmem:[%s632_s3 + $0x18] sm:$0xff] %v370_v62 }

// kernel: prog_sic_forward.15
= control target key start
LH: loop header
LB: loop body
LE: loop exit
PB: predicated region body
PF: predicated region fallthrough
CT: control target
= control target key end

     0   :  { %v277_v0 = vmov 0   ;;  %vm116_vm0 = vcmask 130048   ;;  %s346_s1 = inlined_call_operand.vmem [shape: bf16[144,128], index: 1, kind: input, shape index: {}]   ;;  %s347_s0 = inlined_call_operand.vmem [shape: bf16[32,144], index: 0, kind: input, shape index: {}]   ;;  %s348_s2 = inlined_call_operand.vmem [shape: f32[1,128], index: 2, kind: input, shape index: {}]   ;;  %s349_s3 = inlined_call_operand.vmem [shape: bf16[32,128], index: 3, kind: output, shape index: {}]  }
   0x1   :  { %123 = vmatprep.subr.bf16.mxu0 %v277_v0  ;;  %243 = vmatprep.subr.bf16.mxu1 %v277_v0  ;;  %v262_v1 = vld [vmem:[%s346_s1] sm:$0xff]   ;;  %v263_v2 = vld [vmem:[%s346_s1 + $0x8] sm:$0xff]   ;;  %v264_v3 = vld [vmem:[%s346_s1 + $0x10] sm:$0xff]  }
   0x2   :  { %124 = vmatpush1.bf16.msra.mxu0 %v262_v1  ;;  %252 = vmatpush1.bf16.msra.mxu1 %v262_v1  ;;  %v265_v4 = vld [vmem:[%s346_s1 + $0x18] sm:$0xff]   ;;  %v273_v5 = vld [vmem:[%s347_s0 + $0x4] ss:$8 sps:$4 sm:$0xff]   ;;  %v268_v9 = vld [vmem:[%s346_s1 + $0x30] sm:$0xff]  }
   0x3   :  { %125 = vmatprep.subr.bf16.mxu0 %v277_v0  ;;  %244 = vmatprep.subr.bf16.mxu1 %v277_v0  ;;  %v276_v6 = vld [vmem:[%s347_s0 + $0x14] ss:$8 sps:$4 sm:$0xff]   ;;  %v266_v7 = vld [vmem:[%s346_s1 + $0x20] sm:$0xff]   ;;  %v267_v8 = vld [vmem:[%s346_s1 + $0x28] sm:$0xff]  }
   0x4   :  { %222 = vmatprep.mubr.msk.bf16.mxu0 %vm116_vm0, %v273_v5  ;;  %223 = vmatprep.mubr.msk.bf16.mxu1 %vm116_vm0, %v276_v6  ;;  %v269_v10 = vld [vmem:[%s346_s1 + $0x38] sm:$0xff]   ;;  %v270_v11 = vld [vmem:[%s346_s1 + $0x40] sm:$0xff]  }
   0x5   :  { %v271_v12 = vld [vmem:[%s347_s0] ss:$8 sps:$4 sm:$0xff]   ;;  %v274_v13 = vld [vmem:[%s347_s0 + $0x10] ss:$8 sps:$4 sm:$0xff]  }
   0x6   :  { %126 = vmatpush1.bf16.msra.mxu0 %v263_v2  ;;  %253 = vmatpush1.bf16.msra.mxu1 %v263_v2  ;;  %v208_v14 = vld [vmem:[%s348_s2] ss:$0 sm:$0xff] }
   0x7   :  { %127 = vmatprep.subr.bf16.mxu0 %v277_v0  ;;  %245 = vmatprep.subr.bf16.mxu1 %v277_v0 }
   0xa   :  { %128 = vmatpush1.bf16.msra.mxu0 %v264_v3  ;;  %254 = vmatpush1.bf16.msra.mxu1 %v264_v3 }
   0xb   :  { %129 = vmatprep.subr.bf16.mxu0 %v277_v0  ;;  %246 = vmatprep.subr.bf16.mxu1 %v277_v0 }
   0xe   :  { %130 = vmatpush1.bf16.msra.mxu0 %v265_v4  ;;  %255 = vmatpush1.bf16.msra.mxu1 %v265_v4 }
   0xf   :  { %131 = vmatprep.subr.bf16.mxu0 %v277_v0  ;;  %247 = vmatprep.subr.bf16.mxu1 %v277_v0 }
  0x12   :  { %132 = vmatpush1.bf16.msra.mxu0 %v266_v7  ;;  %256 = vmatpush1.bf16.msra.mxu1 %v266_v7 }
  0x13   :  { %133 = vmatprep.subr.bf16.mxu0 %v277_v0  ;;  %248 = vmatprep.subr.bf16.mxu1 %v277_v0 }
  0x16   :  { %134 = vmatpush1.bf16.msra.mxu0 %v267_v8  ;;  %257 = vmatpush1.bf16.msra.mxu1 %v267_v8 }
  0x17   :  { %135 = vmatprep.subr.bf16.mxu0 %v277_v0  ;;  %249 = vmatprep.subr.bf16.mxu1 %v277_v0 }
  0x1a   :  { %136 = vmatpush1.bf16.msra.mxu0 %v268_v9  ;;  %258 = vmatpush1.bf16.msra.mxu1 %v268_v9 }
  0x1b   :  { %137 = vmatprep.subr.bf16.mxu0 %v277_v0  ;;  %250 = vmatprep.subr.bf16.mxu1 %v277_v0 }
  0x1e   :  { %138 = vmatpush1.bf16.msra.mxu0 %v269_v10  ;;  %259 = vmatpush1.bf16.msra.mxu1 %v269_v10 }
  0x1f   :  { %139 = vmatprep.subr.bf16.mxu0 %v277_v0  ;;  %251 = vmatprep.subr.bf16.mxu1 %v277_v0 }
  0x22   :  { %140 = vmatpush1.bf16.msra.mxu0 %v270_v11  ;;  %260 = vmatpush1.bf16.msra.mxu1 %v270_v11 }
  0x25   :  { %156 = vmatmul.mubr.bf16.vlgmr.msra.gmra.mrb[0].mxu0 %v271_v12  ;;  %164 = vmatmul.mubr.bf16.vlgmr.msra.gmra.mrb[0].mxu1 %v274_v13 }
  0xf8   :  { %v157_v15 = vpop.f32.mrb[0].mxu0  ;;  %v165_v16 = vpop.f32.mrb[0].mxu1 }
  0xf9   :  { %v158_v17 = vadd.f32 %v208_v14, %v157_v15  ;;  %v166_v18 = vadd.f32 %v208_v14, %v165_v16  ;;  %v159_v19 = vpop.f32.mrb[1].mxu0  ;;  %v167_v20 = vpop.f32.mrb[1].mxu1 }
  0xfa   :  { %v160_v21 = vpop.f32.mrb[2].mxu0  ;;  %v168_v22 = vpop.f32.mrb[2].mxu1 }
  0xfb   :  { %v176_v23 = vmul.f32 0.01, %v158_v17  ;;  %v178_v24 = vmul.f32 0.01, %v166_v18  ;;  %v161_v25 = vadd.f32 %v208_v14, %v160_v21  ;;  %v169_v26 = vadd.f32 %v208_v14, %v168_v22  ;;  %v162_v27 = vpop.f32.mrb[3].mxu0  ;;  %v170_v28 = vpop.f32.mrb[3].mxu1 }
  0xfc   :  { %vm172_vm1 = vcmp.ge.f32.partialorder %v158_v17, 0.0  ;;  %vm174_vm2 = vcmp.ge.f32.partialorder %v166_v18, 0.0 }
  0xfd   :  { %vm173_vm3 = vcmp.ge.f32.partialorder %v161_v25, 0.0  ;;  %v177_v29 = vmul.f32 0.01, %v161_v25  ;;  %vm175_vm4 = vcmp.ge.f32.partialorder %v169_v26, 0.0  ;;  %v179_v30 = vmul.f32 0.01, %v169_v26 }
  0xfe   :  { %v180_v31 = vsel %vm172_vm1, %v158_v17, %v176_v23  ;;  %v182_v32 = vsel %vm174_vm2, %v166_v18, %v178_v24 }
  0xff   :  { %v181_v33 = vsel %vm173_vm3, %v161_v25, %v177_v29  ;;  %v183_v34 = vsel %vm175_vm4, %v169_v26, %v179_v30 }
 0x100   :  { %v235_v35 = vpack.c.bf16 %v181_v33, %v180_v31  ;;  %v240_v36 = vpack.c.bf16 %v183_v34, %v182_v32 }
 0x102   :  { %236 = vst [vmem:[%s349_s3] sm:$0xff] %v235_v35   ;;  %242 = vst [vmem:[%s349_s3 + $0x8] sm:$0xff] %v240_v36  }

// kernel: prog_sic_forward.16
= control target key start
LH: loop header
LB: loop body
LE: loop exit
PB: predicated region body
PF: predicated region fallthrough
CT: control target
= control target key end

     0   :  { %v366_v1 = vmov 0.0   ;;  %vm367_vm0 = vmmov 0   ;;  %vm189_vm1 = vcmask 1045504   ;;  %vm185_vm2 = vcmask 359424   ;;  %s457_s1 = inlined_call_operand.vmem [shape: bf16[300,128], index: 1, kind: input, shape index: {}]   ;;  %s458_s0 = inlined_call_operand.vmem [shape: bf16[8,300], index: 0, kind: input, shape index: {}]   ;;  %s459_s2 = inlined_call_operand.vmem [shape: f32[1,128], index: 2, kind: input, shape index: {}]   ;;  %s460_s3 = inlined_call_operand.vmem [shape: bf16[8,128], index: 3, kind: output, shape index: {}]  }
   0x1   :  { %v344_v0 = vld [vmem:[%s457_s1 + $0x40] sm:$0xff]   ;;  %332 = vmatprep.subr.bf16.mxu1 %v366_v1  ;;  %338 = vmatprep.mubr.msk.bf16.mxu1 %vm367_vm0, %v366_v1  ;;  %v346_v3 = vld [vmem:[%s457_s1 + $0x48] sm:$0xff]   ;;  %v348_v5 = vld [vmem:[%s457_s1 + $0x50] sm:$0xff]  }
   0x2   :  { %v345_v2 = vld [vmem:[%s457_s1] sm:$0xff]   ;;  %306 = vmatprep.subr.bf16.mxu0 %v344_v0  ;;  %v347_v4 = vld [vmem:[%s457_s1 + $0x8] sm:$0xff]   ;;  %v349_v6 = vld [vmem:[%s457_s1 + $0x10] sm:$0xff]  }
   0x3   :  { %307 = vmatpush3.bf16.msra.mxu0 %v345_v2  ;;  %v350_v7 = vld [vmem:[%s457_s1 + $0x58] sm:$0xff]   ;;  %v352_v9 = vld [vmem:[%s457_s1 + $0x60] sm:$0xff]   ;;  %v359_v12 = vld [vmem:[%s457_s1 + $0x88] sm:$0xff]  }
   0x4   :  { %308 = vmatprep.subr.bf16.mxu0 %v346_v3  ;;  %v351_v8 = vld [vmem:[%s457_s1 + $0x18] sm:$0xff]   ;;  %v356_v10 = vld [vmem:[%s457_s1 + $0x80] sm:$0xff]   ;;  %v354_v13 = vld [vmem:[%s457_s1 + $0x68] sm:$0xff]  }
   0x5   :  { %v353_v11 = vld [vmem:[%s457_s1 + $0x20] sm:$0xff]   ;;  %333 = vmatpush3.bf16.msra.mxu1 %v356_v10  ;;  %v355_v14 = vld [vmem:[%s457_s1 + $0x28] sm:$0xff]   ;;  %v365_v17 = vld [vmem:[%s457_s1 + $0x90] sm:$0x3f]  }
   0x6   :  { %334 = vmatprep.subr.bf16.mxu1 %v366_v1  ;;  %v15_v15 = vld [vmem:[%s458_s0] sm:$0xff]  ;;  %v357_v18 = vld [vmem:[%s457_s1 + $0x70] sm:$0xff]   ;;  %v364_v19 = vld [vmem:[%s458_s0 + $0x8] ss:$0 sps:$4 sm:$0xff]   ;;  %v191_v20 = vsel %vm189_vm1, %v365_v17, 0 }
   0x7   :  { %309 = vmatpush3.bf16.msra.mxu0 %v347_v4  ;;  %v284_v16 = vcombine.high %v15_v15, %v15_v15  ;;  %v358_v21 = vld [vmem:[%s457_s1 + $0x30] sm:$0xff]   ;;  %v360_v22 = vld [vmem:[%s457_s1 + $0x78] sm:$0xff]   ;;  %v283_v24 = vcombine.low %v15_v15, %v15_v15  ;;  %v282_v31 = vld [vmem:[%s459_s2] ss:$0 sm:$0xff] }
   0x8   :  { %310 = vmatprep.subr.bf16.mxu0 %v348_v5  ;;  %v361_v23 = vld [vmem:[%s457_s1 + $0x38] sm:$0xff]  }
   0x9   :  { %335 = vmatpush3.bf16.msra.mxu1 %v359_v12  ;;  %225 = vmatprep.mubr.bf16.mxu0 %v284_v16 }
   0xa   :  { %336 = vmatprep.subr.bf16.mxu1 %v366_v1 }
   0xb   :  { %311 = vmatpush3.bf16.msra.mxu0 %v349_v6 }
   0xc   :  { %312 = vmatprep.subr.bf16.mxu0 %v350_v7 }
   0xd   :  { %337 = vmatpush3.bf16.msra.mxu1 %v191_v20 }
   0xf   :  { %313 = vmatpush3.bf16.msra.mxu0 %v351_v8 }
  0x10   :  { %314 = vmatprep.subr.bf16.mxu0 %v352_v9  ;;  %339 = vmatmul.mubr.msk.bf16.vlgmr.msra.gmra.mrb[0].mxu1 %vm185_vm2, %v364_v19 }
  0x13   :  { %315 = vmatpush3.bf16.msra.mxu0 %v353_v11 }
  0x14   :  { %316 = vmatprep.subr.bf16.mxu0 %v354_v13 }
  0x17   :  { %317 = vmatpush3.bf16.msra.mxu0 %v355_v14 }
  0x18   :  { %318 = vmatprep.subr.bf16.mxu0 %v357_v18 }
  0x1b   :  { %319 = vmatpush3.bf16.msra.mxu0 %v358_v21 }
  0x1c   :  { %320 = vmatprep.subr.bf16.mxu0 %v360_v22 }
  0x1f   :  { %321 = vmatpush3.bf16.msra.mxu0 %v361_v23 }
  0x22   :  { %226 = vmatmul.mubr.bf16.vlgmr.msra.gmra.mrb[0].mxu0 %v283_v24 }
  0xe3   :  { %v267_v25 = vpop.f32.mrb[0].mxu1 }
  0xe4   :  { %v340_v26 = vpop.f32.mrb[1].mxu1 }
  0xe5   :  { %v270_v27 = vpop.f32.mrb[2].mxu1 }
  0xe6   :  { %v341_v28 = vpop.f32.mrb[3].mxu1 }
  0xf5   :  { %v322_v29 = vpop.f32.mrb[0].mxu0 }
  0xf6   :  { %v323_v30 = vpop.f32.mrb[1].mxu0 }
  0xf7   :  { %v324_v32 = vadd.f32 %v323_v30, %v322_v29  ;;  %v325_v33 = vpop.f32.mrb[2].mxu0 }
  0xf8   :  { %v326_v34 = vpop.f32.mrb[3].mxu0 }
  0xf9   :  { %v228_v35 = vadd.f32 %v324_v32, %v282_v31 }
  0xfb   :  { %v268_v36 = vadd.f32 %v267_v25, %v228_v35 }
  0xfd   :  { %vm273_vm3 = vcmp.ge.f32.partialorder %v268_v36, 0.0  ;;  %v274_v37 = vmul.f32 0.01, %v268_v36 }
  0xff   :  { %v275_v38 = vsel %vm273_vm3, %v268_v36, %v274_v37 }
 0x100   :  { %v276_v39 = vpack.c.bf16 %v275_v38, %v275_v38 }
 0x102   :  { %277 = vst [vmem:[%s460_s3] sm:$0xf] %v276_v39 }

// kernel: prog_sic_forward.17
= control target key start
LH: loop header
LB: loop body
LE: loop exit
PB: predicated region body
PF: predicated region fallthrough
CT: control target
= control target key end

     0   :  { %v362_v1 = vmov 0.0   ;;  %vm363_vm0 = vmmov 0   ;;  %vm189_vm1 = vcmask 1045504   ;;  %vm185_vm2 = vcmask 359424   ;;  %s453_s1 = inlined_call_operand.vmem [shape: bf16[300,128], index: 1, kind: input, shape index: {}]   ;;  %s454_s0 = inlined_call_operand.vmem [shape: bf16[8,300], index: 0, kind: input, shape index: {}]   ;;  %s455_s2 = inlined_call_operand.vmem [shape: f32[1,128], index: 2, kind: input, shape index: {}]   ;;  %s456_s3 = inlined_call_operand.vmem [shape: f32[8,128], index: 3, kind: output, shape index: {}]  }
   0x1   :  { %v340_v0 = vld [vmem:[%s453_s1 + $0x40] sm:$0xff]   ;;  %328 = vmatprep.subr.bf16.mxu1 %v362_v1  ;;  %334 = vmatprep.mubr.msk.bf16.mxu1 %vm363_vm0, %v362_v1  ;;  %v342_v3 = vld [vmem:[%s453_s1 + $0x48] sm:$0xff]   ;;  %v344_v5 = vld [vmem:[%s453_s1 + $0x50] sm:$0xff]  }
   0x2   :  { %v341_v2 = vld [vmem:[%s453_s1] sm:$0xff]   ;;  %302 = vmatprep.subr.bf16.mxu0 %v340_v0  ;;  %v343_v4 = vld [vmem:[%s453_s1 + $0x8] sm:$0xff]   ;;  %v345_v6 = vld [vmem:[%s453_s1 + $0x10] sm:$0xff]  }
   0x3   :  { %303 = vmatpush3.bf16.msra.mxu0 %v341_v2  ;;  %v346_v7 = vld [vmem:[%s453_s1 + $0x58] sm:$0xff]   ;;  %v348_v9 = vld [vmem:[%s453_s1 + $0x60] sm:$0xff]   ;;  %v355_v12 = vld [vmem:[%s453_s1 + $0x88] sm:$0xff]  }
   0x4   :  { %304 = vmatprep.subr.bf16.mxu0 %v342_v3  ;;  %v347_v8 = vld [vmem:[%s453_s1 + $0x18] sm:$0xff]   ;;  %v352_v10 = vld [vmem:[%s453_s1 + $0x80] sm:$0xff]   ;;  %v350_v13 = vld [vmem:[%s453_s1 + $0x68] sm:$0xff]  }
   0x5   :  { %v349_v11 = vld [vmem:[%s453_s1 + $0x20] sm:$0xff]   ;;  %329 = vmatpush3.bf16.msra.mxu1 %v352_v10  ;;  %v351_v14 = vld [vmem:[%s453_s1 + $0x28] sm:$0xff]   ;;  %v361_v17 = vld [vmem:[%s453_s1 + $0x90] sm:$0x3f]  }
   0x6   :  { %330 = vmatprep.subr.bf16.mxu1 %v362_v1  ;;  %v15_v15 = vld [vmem:[%s454_s0] sm:$0xff]  ;;  %v353_v18 = vld [vmem:[%s453_s1 + $0x70] sm:$0xff]   ;;  %v360_v19 = vld [vmem:[%s454_s0 + $0x8] ss:$0 sps:$4 sm:$0xff]   ;;  %v191_v20 = vsel %vm189_vm1, %v361_v17, 0 }
   0x7   :  { %305 = vmatpush3.bf16.msra.mxu0 %v343_v4  ;;  %v280_v16 = vcombine.high %v15_v15, %v15_v15  ;;  %v354_v21 = vld [vmem:[%s453_s1 + $0x30] sm:$0xff]   ;;  %v356_v22 = vld [vmem:[%s453_s1 + $0x78] sm:$0xff]   ;;  %v279_v24 = vcombine.low %v15_v15, %v15_v15  ;;  %v278_v31 = vld [vmem:[%s455_s2] ss:$0 sm:$0xff] }
   0x8   :  { %306 = vmatprep.subr.bf16.mxu0 %v344_v5  ;;  %v357_v23 = vld [vmem:[%s453_s1 + $0x38] sm:$0xff]  }
   0x9   :  { %331 = vmatpush3.bf16.msra.mxu1 %v355_v12  ;;  %225 = vmatprep.mubr.bf16.mxu0 %v280_v16 }
   0xa   :  { %332 = vmatprep.subr.bf16.mxu1 %v362_v1 }
   0xb   :  { %307 = vmatpush3.bf16.msra.mxu0 %v345_v6 }
   0xc   :  { %308 = vmatprep.subr.bf16.mxu0 %v346_v7 }
   0xd   :  { %333 = vmatpush3.bf16.msra.mxu1 %v191_v20 }
   0xf   :  { %309 = vmatpush3.bf16.msra.mxu0 %v347_v8 }
  0x10   :  { %310 = vmatprep.subr.bf16.mxu0 %v348_v9  ;;  %335 = vmatmul.mubr.msk.bf16.vlgmr.msra.gmra.mrb[0].mxu1 %vm185_vm2, %v360_v19 }
  0x13   :  { %311 = vmatpush3.bf16.msra.mxu0 %v349_v11 }
  0x14   :  { %312 = vmatprep.subr.bf16.mxu0 %v350_v13 }
  0x17   :  { %313 = vmatpush3.bf16.msra.mxu0 %v351_v14 }
  0x18   :  { %314 = vmatprep.subr.bf16.mxu0 %v353_v18 }
  0x1b   :  { %315 = vmatpush3.bf16.msra.mxu0 %v354_v21 }
  0x1c   :  { %316 = vmatprep.subr.bf16.mxu0 %v356_v22 }
  0x1f   :  { %317 = vmatpush3.bf16.msra.mxu0 %v357_v23 }
  0x22   :  { %226 = vmatmul.mubr.bf16.vlgmr.msra.gmra.mrb[0].mxu0 %v279_v24 }
  0xe3   :  { %v267_v25 = vpop.f32.mrb[0].mxu1 }
  0xe4   :  { %v336_v26 = vpop.f32.mrb[1].mxu1 }
  0xe5   :  { %v270_v27 = vpop.f32.mrb[2].mxu1 }
  0xe6   :  { %v337_v28 = vpop.f32.mrb[3].mxu1 }
  0xf5   :  { %v318_v29 = vpop.f32.mrb[0].mxu0 }
  0xf6   :  { %v319_v30 = vpop.f32.mrb[1].mxu0 }
  0xf7   :  { %v320_v32 = vadd.f32 %v319_v30, %v318_v29  ;;  %v321_v33 = vpop.f32.mrb[2].mxu0 }
  0xf8   :  { %v322_v34 = vpop.f32.mrb[3].mxu0 }
  0xf9   :  { %v228_v35 = vadd.f32 %v320_v32, %v278_v31 }
  0xfb   :  { %v268_v36 = vadd.f32 %v267_v25, %v228_v35 }
  0xfd   :  { %273 = vst [vmem:[%s456_s3] sm:$0xff] %v268_v36 }

// kernel: prog_sic_forward.18
= control target key start
LH: loop header
LB: loop body
LE: loop exit
PB: predicated region body
PF: predicated region fallthrough
CT: control target
= control target key end

     0   :  { %v364_v1 = vmov 0.0   ;;  %vm365_vm0 = vmmov 0   ;;  %vm189_vm1 = vcmask 1045504   ;;  %vm185_vm2 = vcmask 359424   ;;  %s455_s1 = inlined_call_operand.vmem [shape: bf16[300,128], index: 1, kind: input, shape index: {}]   ;;  %s456_s0 = inlined_call_operand.vmem [shape: bf16[8,300], index: 0, kind: input, shape index: {}]   ;;  %s457_s2 = inlined_call_operand.vmem [shape: f32[1,128], index: 2, kind: input, shape index: {}]   ;;  %s458_s3 = inlined_call_operand.vmem [shape: bf16[8,128], index: 3, kind: output, shape index: {}]  }
   0x1   :  { %v342_v0 = vld [vmem:[%s455_s1 + $0x40] sm:$0xff]   ;;  %330 = vmatprep.subr.bf16.mxu1 %v364_v1  ;;  %336 = vmatprep.mubr.msk.bf16.mxu1 %vm365_vm0, %v364_v1  ;;  %v344_v3 = vld [vmem:[%s455_s1 + $0x48] sm:$0xff]   ;;  %v346_v5 = vld [vmem:[%s455_s1 + $0x50] sm:$0xff]  }
   0x2   :  { %v343_v2 = vld [vmem:[%s455_s1] sm:$0xff]   ;;  %304 = vmatprep.subr.bf16.mxu0 %v342_v0  ;;  %v345_v4 = vld [vmem:[%s455_s1 + $0x8] sm:$0xff]   ;;  %v347_v6 = vld [vmem:[%s455_s1 + $0x10] sm:$0xff]  }
   0x3   :  { %305 = vmatpush3.bf16.msra.mxu0 %v343_v2  ;;  %v348_v7 = vld [vmem:[%s455_s1 + $0x58] sm:$0xff]   ;;  %v350_v9 = vld [vmem:[%s455_s1 + $0x60] sm:$0xff]   ;;  %v357_v12 = vld [vmem:[%s455_s1 + $0x88] sm:$0xff]  }
   0x4   :  { %306 = vmatprep.subr.bf16.mxu0 %v344_v3  ;;  %v349_v8 = vld [vmem:[%s455_s1 + $0x18] sm:$0xff]   ;;  %v354_v10 = vld [vmem:[%s455_s1 + $0x80] sm:$0xff]   ;;  %v352_v13 = vld [vmem:[%s455_s1 + $0x68] sm:$0xff]  }
   0x5   :  { %v351_v11 = vld [vmem:[%s455_s1 + $0x20] sm:$0xff]   ;;  %331 = vmatpush3.bf16.msra.mxu1 %v354_v10  ;;  %v353_v14 = vld [vmem:[%s455_s1 + $0x28] sm:$0xff]   ;;  %v363_v17 = vld [vmem:[%s455_s1 + $0x90] sm:$0x3f]  }
   0x6   :  { %332 = vmatprep.subr.bf16.mxu1 %v364_v1  ;;  %v15_v15 = vld [vmem:[%s456_s0] sm:$0xff]  ;;  %v355_v18 = vld [vmem:[%s455_s1 + $0x70] sm:$0xff]   ;;  %v362_v19 = vld [vmem:[%s456_s0 + $0x8] ss:$0 sps:$4 sm:$0xff]   ;;  %v191_v20 = vsel %vm189_vm1, %v363_v17, 0 }
   0x7   :  { %307 = vmatpush3.bf16.msra.mxu0 %v345_v4  ;;  %v282_v16 = vcombine.high %v15_v15, %v15_v15  ;;  %v356_v21 = vld [vmem:[%s455_s1 + $0x30] sm:$0xff]   ;;  %v358_v22 = vld [vmem:[%s455_s1 + $0x78] sm:$0xff]   ;;  %v281_v24 = vcombine.low %v15_v15, %v15_v15  ;;  %v280_v31 = vld [vmem:[%s457_s2] ss:$0 sm:$0xff] }
   0x8   :  { %308 = vmatprep.subr.bf16.mxu0 %v346_v5  ;;  %v359_v23 = vld [vmem:[%s455_s1 + $0x38] sm:$0xff]  }
   0x9   :  { %333 = vmatpush3.bf16.msra.mxu1 %v357_v12  ;;  %225 = vmatprep.mubr.bf16.mxu0 %v282_v16 }
   0xa   :  { %334 = vmatprep.subr.bf16.mxu1 %v364_v1 }
   0xb   :  { %309 = vmatpush3.bf16.msra.mxu0 %v347_v6 }
   0xc   :  { %310 = vmatprep.subr.bf16.mxu0 %v348_v7 }
   0xd   :  { %335 = vmatpush3.bf16.msra.mxu1 %v191_v20 }
   0xf   :  { %311 = vmatpush3.bf16.msra.mxu0 %v349_v8 }
  0x10   :  { %312 = vmatprep.subr.bf16.mxu0 %v350_v9  ;;  %337 = vmatmul.mubr.msk.bf16.vlgmr.msra.gmra.mrb[0].mxu1 %vm185_vm2, %v362_v19 }
  0x13   :  { %313 = vmatpush3.bf16.msra.mxu0 %v351_v11 }
  0x14   :  { %314 = vmatprep.subr.bf16.mxu0 %v352_v13 }
  0x17   :  { %315 = vmatpush3.bf16.msra.mxu0 %v353_v14 }
  0x18   :  { %316 = vmatprep.subr.bf16.mxu0 %v355_v18 }
  0x1b   :  { %317 = vmatpush3.bf16.msra.mxu0 %v356_v21 }
  0x1c   :  { %318 = vmatprep.subr.bf16.mxu0 %v358_v22 }
  0x1f   :  { %319 = vmatpush3.bf16.msra.mxu0 %v359_v23 }
  0x22   :  { %226 = vmatmul.mubr.bf16.vlgmr.msra.gmra.mrb[0].mxu0 %v281_v24 }
  0xe3   :  { %v267_v25 = vpop.f32.mrb[0].mxu1 }
  0xe4   :  { %v338_v26 = vpop.f32.mrb[1].mxu1 }
  0xe5   :  { %v270_v27 = vpop.f32.mrb[2].mxu1 }
  0xe6   :  { %v339_v28 = vpop.f32.mrb[3].mxu1 }
  0xf5   :  { %v320_v29 = vpop.f32.mrb[0].mxu0 }
  0xf6   :  { %v321_v30 = vpop.f32.mrb[1].mxu0 }
  0xf7   :  { %v322_v32 = vadd.f32 %v321_v30, %v320_v29  ;;  %v323_v33 = vpop.f32.mrb[2].mxu0 }
  0xf8   :  { %v324_v34 = vpop.f32.mrb[3].mxu0 }
  0xf9   :  { %v228_v35 = vadd.f32 %v322_v32, %v280_v31 }
  0xfb   :  { %v268_v36 = vadd.f32 %v267_v25, %v228_v35 }
  0xfd   :  { %v273_v37 = vmax.f32 %v268_v36, 0.0 }
  0xff   :  { %v274_v38 = vpack.c.bf16 %v273_v37, %v273_v37 }
 0x101   :  { %275 = vst [vmem:[%s458_s3] sm:$0xf] %v274_v38 }

// kernel: prog_sic_forward.19
= control target key start
LH: loop header
LB: loop body
LE: loop exit
PB: predicated region body
PF: predicated region fallthrough
CT: control target
= control target key end

     0   :  { %v522_v0 = vmov 0   ;;  %vm268_vm0 = vcmask 130048   ;;  %s662_s1 = inlined_call_operand.vmem [shape: bf16[400,128], index: 1, kind: input, shape index: {}]   ;;  %s663_s0 = inlined_call_operand.vmem [shape: bf16[32,400], index: 0, kind: input, shape index: {}]   ;;  %s664_s2 = inlined_call_operand.vmem [shape: f32[1,128], index: 2, kind: input, shape index: {}]   ;;  %s665_s3 = inlined_call_operand.vmem [shape: bf16[32,128], index: 3, kind: output, shape index: {}]  }
   0x1   :  { %324 = vmatprep.subr.bf16.mxu1 %v522_v0  ;;  %v485_v1 = vld [vmem:[%s662_s1 + $0x40] sm:$0xff]   ;;  %v488_v4 = vld [vmem:[%s662_s1 + $0x48] sm:$0xff]   ;;  %v491_v7 = vld [vmem:[%s662_s1 + $0x50] sm:$0xff]  }
   0x2   :  { %v486_v2 = vld [vmem:[%s662_s1 + $0x80] sm:$0xff]   ;;  %456 = vmatprep.subr.bf16.mxu0 %v485_v1  ;;  %v489_v5 = vld [vmem:[%s662_s1 + $0x88] sm:$0xff]   ;;  %v492_v8 = vld [vmem:[%s662_s1 + $0x90] sm:$0xff]  }
   0x3   :  { %v487_v3 = vld [vmem:[%s662_s1] sm:$0xff]   ;;  %325 = vmatpush1.bf16.msra.mxu1 %v486_v2  ;;  %v490_v6 = vld [vmem:[%s662_s1 + $0x8] sm:$0xff]   ;;  %v493_v9 = vld [vmem:[%s662_s1 + $0x10] sm:$0xff]  }
   0x4   :  { %457 = vmatpush3.bf16.msra.mxu0 %v487_v3  ;;  %326 = vmatprep.subr.bf16.mxu1 %v522_v0  ;;  %v494_v10 = vld [vmem:[%s662_s1 + $0x58] sm:$0xff]   ;;  %v497_v13 = vld [vmem:[%s662_s1 + $0x60] sm:$0xff]   ;;  %v500_v16 = vld [vmem:[%s662_s1 + $0x68] sm:$0xff]  }
   0x5   :  { %458 = vmatprep.subr.bf16.mxu0 %v488_v4  ;;  %v495_v11 = vld [vmem:[%s662_s1 + $0x98] sm:$0xff]   ;;  %v498_v14 = vld [vmem:[%s662_s1 + $0xa0] sm:$0xff]   ;;  %v501_v17 = vld [vmem:[%s662_s1 + $0xa8] sm:$0xff]  }
   0x6   :  { %v496_v12 = vld [vmem:[%s662_s1 + $0x18] sm:$0xff]   ;;  %v499_v15 = vld [vmem:[%s662_s1 + $0x20] sm:$0xff]   ;;  %v502_v18 = vld [vmem:[%s662_s1 + $0x28] sm:$0xff]  }
   0x7   :  { %327 = vmatpush1.bf16.msra.mxu1 %v489_v5  ;;  %v503_v19 = vld [vmem:[%s662_s1 + $0x70] sm:$0xff]   ;;  %v506_v22 = vld [vmem:[%s662_s1 + $0x78] sm:$0xff]   ;;  %v512_v28 = vld [vmem:[%s662_s1 + $0xc0] sm:$0xff]  }
   0x8   :  { %459 = vmatpush3.bf16.msra.mxu0 %v490_v6  ;;  %328 = vmatprep.subr.bf16.mxu1 %v522_v0  ;;  %v504_v20 = vld [vmem:[%s662_s1 + $0xb0] sm:$0xff]   ;;  %v507_v24 = vld [vmem:[%s662_s1 + $0xb8] sm:$0xff]   ;;  %v401_v36 = vld [vmem:[%s664_s2] ss:$0 sm:$0xff] }
   0x9   :  { %460 = vmatprep.subr.bf16.mxu0 %v491_v7  ;;  %v505_v21 = vld [vmem:[%s662_s1 + $0x30] sm:$0xff]   ;;  %v515_v25 = vld [vmem:[%s663_s0 + $0xc] ss:$16 sps:$4 sm:$0xff]   ;;  %v513_v30 = vld [vmem:[%s663_s0 + $0x8] ss:$16 sps:$4 sm:$0xff]  }
   0xa   :  { %v511_v23 = vld [vmem:[%s663_s0 + $0x4] ss:$16 sps:$4 sm:$0xff]   ;;  %v508_v26 = vld [vmem:[%s662_s1 + $0x38] sm:$0xff]   ;;  %435 = vmatprep.mubr.msk.bf16.mxu1 %vm268_vm0, %v515_v25  ;;  %v509_v27 = vld [vmem:[%s663_s0] ss:$16 sps:$4 sm:$0xff]  }
   0xb   :  { %329 = vmatpush1.bf16.msra.mxu1 %v492_v8  ;;  %307 = vmatprep.mubr.bf16.mxu0 %v511_v23  ;;  %v516_v29 = vld [vmem:[%s663_s0 + $0x24] ss:$16 sps:$4 sm:$0xff]   ;;  %v519_v31 = vld [vmem:[%s663_s0 + $0x2c] ss:$16 sps:$4 sm:$0xff]   ;;  %v518_v32 = vld [vmem:[%s663_s0 + $0x20] ss:$16 sps:$4 sm:$0xff]  }
   0xc   :  { %461 = vmatpush3.bf16.msra.mxu0 %v493_v9  ;;  %330 = vmatprep.subr.bf16.mxu1 %v522_v0  ;;  %v521_v33 = vld [vmem:[%s663_s0 + $0x28] ss:$16 sps:$4 sm:$0xff]  }
   0xd   :  { %462 = vmatprep.subr.bf16.mxu0 %v494_v10 }
   0xf   :  { %331 = vmatpush1.bf16.msra.mxu1 %v495_v11 }
  0x10   :  { %463 = vmatpush3.bf16.msra.mxu0 %v496_v12  ;;  %332 = vmatprep.subr.bf16.mxu1 %v522_v0 }
  0x11   :  { %464 = vmatprep.subr.bf16.mxu0 %v497_v13 }
  0x13   :  { %333 = vmatpush1.bf16.msra.mxu1 %v498_v14 }
  0x14   :  { %465 = vmatpush3.bf16.msra.mxu0 %v499_v15  ;;  %334 = vmatprep.subr.bf16.mxu1 %v522_v0 }
  0x15   :  { %466 = vmatprep.subr.bf16.mxu0 %v500_v16 }
  0x17   :  { %335 = vmatpush1.bf16.msra.mxu1 %v501_v17 }
  0x18   :  { %467 = vmatpush3.bf16.msra.mxu0 %v502_v18  ;;  %336 = vmatprep.subr.bf16.mxu1 %v522_v0 }
  0x19   :  { %468 = vmatprep.subr.bf16.mxu0 %v503_v19 }
  0x1b   :  { %337 = vmatpush1.bf16.msra.mxu1 %v504_v20 }
  0x1c   :  { %469 = vmatpush3.bf16.msra.mxu0 %v505_v21  ;;  %338 = vmatprep.subr.bf16.mxu1 %v522_v0 }
  0x1d   :  { %470 = vmatprep.subr.bf16.mxu0 %v506_v22 }
  0x1f   :  { %339 = vmatpush1.bf16.msra.mxu1 %v507_v24 }
  0x20   :  { %471 = vmatpush3.bf16.msra.mxu0 %v508_v26  ;;  %340 = vmatprep.subr.bf16.mxu1 %v522_v0 }
  0x23   :  { %308 = vmatmul.mubr.bf16.vlgmr.msra.gmra.mrb[0].mxu0 %v509_v27  ;;  %341 = vmatpush1.bf16.msra.mxu1 %v512_v28 }
  0x24   :  { %315 = vmatprep.mubr.bf16.mxu0 %v516_v29 }
  0x26   :  { %357 = vmatmul.mubr.bf16.vlgmr.msra.gmra.mrb[0].mxu1 %v513_v30 }
  0x27   :  { %436 = vmatprep.mubr.msk.bf16.mxu1 %vm268_vm0, %v519_v31 }
  0x2b   :  { %316 = vmatmul.mubr.bf16.gmra.mrb[4].mxu0 %v518_v32 }
  0x2e   :  { %365 = vmatmul.mubr.bf16.gmra.mrb[4].mxu1 %v521_v33 }
  0xf6   :  { %v472_v34 = vpop.f32.mrb[0].mxu0 }
  0xf7   :  { %v473_v35 = vpop.f32.mrb[1].mxu0 }
  0xf8   :  { %v474_v37 = vadd.f32 %v473_v35, %v472_v34  ;;  %v475_v38 = vpop.f32.mrb[2].mxu0 }
  0xf9   :  { %v476_v39 = vpop.f32.mrb[3].mxu0  ;;  %v358_v40 = vpop.f32.mrb[0].mxu1 }
  0xfa   :  { %v477_v41 = vadd.f32 %v476_v39, %v475_v38  ;;  %v310_v42 = vadd.f32 %v474_v37, %v401_v36  ;;  %v360_v43 = vpop.f32.mrb[1].mxu1 }
  0xfb   :  { %v361_v44 = vpop.f32.mrb[2].mxu1 }
  0xfc   :  { %v359_v45 = vadd.f32 %v358_v40, %v310_v42  ;;  %v313_v46 = vadd.f32 %v477_v41, %v401_v36  ;;  %v363_v47 = vpop.f32.mrb[3].mxu1 }
  0xfe   :  { %v362_v48 = vadd.f32 %v361_v44, %v313_v46  ;;  %v478_v49 = vpop.f32.mrb[4].mxu0  ;;  %v373_v51 = vmax.f32 %v359_v45, 0.0 }
  0xff   :  { %v479_v50 = vpop.f32.mrb[5].mxu0 }
 0x100   :  { %v374_v52 = vmax.f32 %v362_v48, 0.0  ;;  %v480_v53 = vadd.f32 %v479_v50, %v478_v49  ;;  %v481_v54 = vpop.f32.mrb[6].mxu0 }
 0x101   :  { %v482_v55 = vpop.f32.mrb[7].mxu0  ;;  %v366_v56 = vpop.f32.mrb[4].mxu1 }
 0x102   :  { %v448_v57 = vpack.c.bf16 %v374_v52, %v373_v51  ;;  %v483_v58 = vadd.f32 %v482_v55, %v481_v54  ;;  %v318_v59 = vadd.f32 %v480_v53, %v401_v36  ;;  %v368_v60 = vpop.f32.mrb[5].mxu1 }
 0x103   :  { %v369_v61 = vpop.f32.mrb[6].mxu1 }
 0x104   :  { %449 = vst [vmem:[%s665_s3] sm:$0xff] %v448_v57   ;;  %v367_v62 = vadd.f32 %v366_v56, %v318_v59  ;;  %v321_v63 = vadd.f32 %v483_v58, %v401_v36  ;;  %v371_v0 = vpop.f32.mrb[7].mxu1 }
 0x106   :  { %v370_v1 = vadd.f32 %v369_v61, %v321_v63  ;;  %v375_v2 = vmax.f32 %v367_v62, 0.0 }
 0x108   :  { %v376_v3 = vmax.f32 %v370_v1, 0.0 }
 0x10a   :  { %v453_v4 = vpack.c.bf16 %v376_v3, %v375_v2 }
 0x10c   :  { %455 = vst [vmem:[%s665_s3 + $0x8] sm:$0xff] %v453_v4  }

// kernel: prog_sic_forward.20
= control target key start
LH: loop header
LB: loop body
LE: loop exit
PB: predicated region body
PF: predicated region fallthrough
CT: control target
= control target key end

     0   :  { %v290_v0 = vmov 0   ;;  %vm152_vm0 = vcmask 719872   ;;  %vm159_vm1 = vcmask 1043456   ;;  %s408_s1 = inlined_call_operand.vmem [shape: bf16[216,128], index: 1, kind: input, shape index: {}]   ;;  %s409_s0 = inlined_call_operand.vmem [shape: bf16[32,216], index: 0, kind: input, shape index: {}]   ;;  %s410_s2 = inlined_call_operand.vmem [shape: f32[1,128], index: 2, kind: input, shape index: {}]   ;;  %s411_s3 = inlined_call_operand.vmem [shape: f32[32,128], index: 3, kind: output, shape index: {}]  }
   0x1   :  { %163 = vmatprep.subr.bf16.mxu0 %v290_v0  ;;  %241 = vmatprep.subr.bf16.mxu1 %v290_v0  ;;  %v270_v1 = vld [vmem:[%s408_s1] sm:$0xff]   ;;  %v271_v2 = vld [vmem:[%s408_s1 + $0x8] sm:$0xff]   ;;  %v272_v3 = vld [vmem:[%s408_s1 + $0x10] sm:$0xff]  }
   0x2   :  { %164 = vmatpush1.bf16.msra.mxu0 %v270_v1  ;;  %255 = vmatpush1.bf16.msra.mxu1 %v270_v1  ;;  %v273_v4 = vld [vmem:[%s408_s1 + $0x18] sm:$0xff]   ;;  %v274_v5 = vld [vmem:[%s408_s1 + $0x20] sm:$0xff]   ;;  %v275_v8 = vld [vmem:[%s408_s1 + $0x28] sm:$0xff]  }
   0x3   :  { %165 = vmatprep.subr.bf16.mxu0 %v290_v0  ;;  %242 = vmatprep.subr.bf16.mxu1 %v290_v0  ;;  %v286_v6 = vld [vmem:[%s409_s0 + $0x4] ss:$8 sps:$4 sm:$0xff]   ;;  %v289_v7 = vld [vmem:[%s409_s0 + $0x14] ss:$8 sps:$4 sm:$0xff]   ;;  %v283_v16 = vld [vmem:[%s408_s1 + $0x68] ss:$0 sps:$4 sm:$0xff]  }
   0x4   :  { %239 = vmatprep.mubr.msk.bf16.mxu0 %vm152_vm0, %v286_v6  ;;  %240 = vmatprep.mubr.msk.bf16.mxu1 %vm152_vm0, %v289_v7  ;;  %v276_v9 = vld [vmem:[%s408_s1 + $0x30] sm:$0xff]   ;;  %v277_v10 = vld [vmem:[%s408_s1 + $0x38] sm:$0xff]   ;;  %v278_v11 = vld [vmem:[%s408_s1 + $0x40] sm:$0xff]   ;;  %v161_v17 = vsel %vm159_vm1, %v283_v16, 0 }
   0x5   :  { %v279_v12 = vld [vmem:[%s408_s1 + $0x48] sm:$0xff]   ;;  %v280_v13 = vld [vmem:[%s408_s1 + $0x50] sm:$0xff]   ;;  %v281_v14 = vld [vmem:[%s408_s1 + $0x58] sm:$0xff]  }
   0x6   :  { %166 = vmatpush1.bf16.msra.mxu0 %v271_v2  ;;  %256 = vmatpush1.bf16.msra.mxu1 %v271_v2  ;;  %v282_v15 = vld [vmem:[%s408_s1 + $0x60] sm:$0xff]   ;;  %v287_v19 = vld [vmem:[%s409_s0 + $0x10] ss:$8 sps:$4 sm:$0xff]  }
   0x7   :  { %167 = vmatprep.subr.bf16.mxu0 %v290_v0  ;;  %243 = vmatprep.subr.bf16.mxu1 %v290_v0  ;;  %v284_v18 = vld [vmem:[%s409_s0] ss:$8 sps:$4 sm:$0xff]  }
   0x8   :  { %v220_v20 = vld [vmem:[%s410_s2] ss:$0 sm:$0xff] }
   0xa   :  { %168 = vmatpush1.bf16.msra.mxu0 %v272_v3  ;;  %257 = vmatpush1.bf16.msra.mxu1 %v272_v3 }
   0xb   :  { %169 = vmatprep.subr.bf16.mxu0 %v290_v0  ;;  %244 = vmatprep.subr.bf16.mxu1 %v290_v0 }
   0xe   :  { %170 = vmatpush1.bf16.msra.mxu0 %v273_v4  ;;  %258 = vmatpush1.bf16.msra.mxu1 %v273_v4 }
   0xf   :  { %171 = vmatprep.subr.bf16.mxu0 %v290_v0  ;;  %245 = vmatprep.subr.bf16.mxu1 %v290_v0 }
  0x12   :  { %172 = vmatpush1.bf16.msra.mxu0 %v274_v5  ;;  %259 = vmatpush1.bf16.msra.mxu1 %v274_v5 }
  0x13   :  { %173 = vmatprep.subr.bf16.mxu0 %v290_v0  ;;  %246 = vmatprep.subr.bf16.mxu1 %v290_v0 }
  0x16   :  { %174 = vmatpush1.bf16.msra.mxu0 %v275_v8  ;;  %260 = vmatpush1.bf16.msra.mxu1 %v275_v8 }
  0x17   :  { %175 = vmatprep.subr.bf16.mxu0 %v290_v0  ;;  %247 = vmatprep.subr.bf16.mxu1 %v290_v0 }
  0x1a   :  { %176 = vmatpush1.bf16.msra.mxu0 %v276_v9  ;;  %261 = vmatpush1.bf16.msra.mxu1 %v276_v9 }
  0x1b   :  { %177 = vmatprep.subr.bf16.mxu0 %v290_v0  ;;  %248 = vmatprep.subr.bf16.mxu1 %v290_v0 }
  0x1e   :  { %178 = vmatpush1.bf16.msra.mxu0 %v277_v10  ;;  %262 = vmatpush1.bf16.msra.mxu1 %v277_v10 }
  0x1f   :  { %179 = vmatprep.subr.bf16.mxu0 %v290_v0  ;;  %249 = vmatprep.subr.bf16.mxu1 %v290_v0 }
  0x22   :  { %180 = vmatpush1.bf16.msra.mxu0 %v278_v11  ;;  %263 = vmatpush1.bf16.msra.mxu1 %v278_v11 }
  0x23   :  { %181 = vmatprep.subr.bf16.mxu0 %v290_v0  ;;  %250 = vmatprep.subr.bf16.mxu1 %v290_v0 }
  0x26   :  { %182 = vmatpush1.bf16.msra.mxu0 %v279_v12  ;;  %264 = vmatpush1.bf16.msra.mxu1 %v279_v12 }
  0x27   :  { %183 = vmatprep.subr.bf16.mxu0 %v290_v0  ;;  %251 = vmatprep.subr.bf16.mxu1 %v290_v0 }
  0x2a   :  { %184 = vmatpush1.bf16.msra.mxu0 %v280_v13  ;;  %265 = vmatpush1.bf16.msra.mxu1 %v280_v13 }
  0x2b   :  { %185 = vmatprep.subr.bf16.mxu0 %v290_v0  ;;  %252 = vmatprep.subr.bf16.mxu1 %v290_v0 }
  0x2e   :  { %186 = vmatpush1.bf16.msra.mxu0 %v281_v14  ;;  %266 = vmatpush1.bf16.msra.mxu1 %v281_v14 }
  0x2f   :  { %187 = vmatprep.subr.bf16.mxu0 %v290_v0  ;;  %253 = vmatprep.subr.bf16.mxu1 %v290_v0 }
  0x32   :  { %188 = vmatpush1.bf16.msra.mxu0 %v282_v15  ;;  %267 = vmatpush1.bf16.msra.mxu1 %v282_v15 }
  0x33   :  { %189 = vmatprep.subr.bf16.mxu0 %v290_v0  ;;  %254 = vmatprep.subr.bf16.mxu1 %v290_v0 }
  0x36   :  { %190 = vmatpush1.bf16.msra.mxu0 %v161_v17  ;;  %268 = vmatpush1.bf16.msra.mxu1 %v161_v17 }
  0x39   :  { %196 = vmatmul.mubr.bf16.vlgmr.msra.gmra.mrb[0].mxu0 %v284_v18  ;;  %204 = vmatmul.mubr.bf16.vlgmr.msra.gmra.mrb[0].mxu1 %v287_v19 }
 0x10c   :  { %v197_v21 = vpop.f32.mrb[0].mxu0  ;;  %v205_v22 = vpop.f32.mrb[0].mxu1 }
 0x10d   :  { %v198_v23 = vadd.f32 %v220_v20, %v197_v21  ;;  %v206_v24 = vadd.f32 %v220_v20, %v205_v22  ;;  %v199_v25 = vpop.f32.mrb[1].mxu0  ;;  %v207_v26 = vpop.f32.mrb[1].mxu1 }
 0x10e   :  { %v200_v27 = vpop.f32.mrb[2].mxu0  ;;  %v208_v28 = vpop.f32.mrb[2].mxu1 }
 0x10f   :  { %212 = vst [vmem:[%s411_s3] sm:$0xff] %v198_v23  ;;  %214 = vst [vmem:[%s411_s3 + $0x10] sm:$0xff] %v206_v24  ;;  %v201_v29 = vadd.f32 %v220_v20, %v200_v27  ;;  %v209_v30 = vadd.f32 %v220_v20, %v208_v28  ;;  %v202_v31 = vpop.f32.mrb[3].mxu0  ;;  %v210_v32 = vpop.f32.mrb[3].mxu1 }
 0x111   :  { %213 = vst [vmem:[%s411_s3 + $0x8] sm:$0xff] %v201_v29  ;;  %215 = vst [vmem:[%s411_s3 + $0x18] sm:$0xff] %v209_v30 }

// kernel: prog_sic_forward.25
= control target key start
LH: loop header
LB: loop body
LE: loop exit
PB: predicated region body
PF: predicated region fallthrough
CT: control target
= control target key end

     0   :  { %vm80_vm0 = vcmask 523264   ;;  %s668_s1 = inlined_call_operand.vmem [shape: bf16[64,128], index: 1, kind: input, shape index: {}]   ;;  %s669_s0 = inlined_call_operand.vmem [shape: bf16[32,64], index: 0, kind: input, shape index: {}]   ;;  %s670_s3 = inlined_call_operand.vmem [shape: bf16[128,128], index: 3, kind: input, shape index: {}]   ;;  %s671_s5 = inlined_call_operand.vmem [shape: bf16[128,128], index: 5, kind: input, shape index: {}]   ;;  %s672_s2 = inlined_call_operand.vmem [shape: f32[1,128], index: 2, kind: input, shape index: {}]   ;;  %s673_s4 = inlined_call_operand.vmem [shape: f32[1,128], index: 4, kind: input, shape index: {}]   ;;  %s674_s6 = inlined_call_operand.vmem [shape: f32[1,128], index: 6, kind: input, shape index: {}]   ;;  %s675_s7 = inlined_call_operand.vmem [shape: f32[32,128], index: 7, kind: output, shape index: {}]  }
   0x1   :  { %v517_v0 = vld [vmem:[%s668_s1] sm:$0xff]   ;;  %v518_v1 = vld [vmem:[%s668_s1 + $0x8] sm:$0xff]   ;;  %v519_v2 = vld [vmem:[%s668_s1 + $0x10] sm:$0xff]  }
   0x2   :  { %465 = vmatprep.subr.bf16.mxu0 %v517_v0  ;;  %v521_v3 = vld [vmem:[%s669_s0] sm:$0xff]   ;;  %v524_v5 = vld [vmem:[%s670_s3 + $0x8] sm:$0xff]   ;;  %v520_v6 = vld [vmem:[%s668_s1 + $0x18] sm:$0xff]  }
   0x3   :  { %466 = vmatpush3.bf16.msra.mxu0 %v517_v0  ;;  %473 = vmatprep.mubr.msk.bf16.mxu0 %vm80_vm0, %v521_v3  ;;  %v523_v4 = vld [vmem:[%s670_s3] sm:$0xff]   ;;  %v525_v7 = vld [vmem:[%s670_s3 + $0x10] sm:$0xff]   ;;  %v522_v8 = vld [vmem:[%s669_s0 + $0x8] sm:$0xff]  }
   0x4   :  { %467 = vmatprep.subr.bf16.mxu0 %v518_v1  ;;  %477 = vmatprep.subr.bf16.mxu1 %v523_v4  ;;  %v526_v9 = vld [vmem:[%s670_s3 + $0x18] sm:$0xff]   ;;  %v527_v10 = vld [vmem:[%s670_s3 + $0x20] sm:$0xff]   ;;  %v528_v11 = vld [vmem:[%s670_s3 + $0x28] sm:$0xff]  }
   0x5   :  { %478 = vmatpush3.bf16.msra.mxu1 %v523_v4  ;;  %v529_v12 = vld [vmem:[%s670_s3 + $0x30] sm:$0xff]   ;;  %v530_v13 = vld [vmem:[%s670_s3 + $0x38] sm:$0xff]   ;;  %v531_v14 = vld [vmem:[%s671_s5] sm:$0xff]  }
   0x6   :  { %479 = vmatprep.subr.bf16.mxu1 %v524_v5  ;;  %v532_v15 = vld [vmem:[%s671_s5 + $0x8] sm:$0xff]   ;;  %v533_v16 = vld [vmem:[%s671_s5 + $0x10] sm:$0xff]   ;;  %v534_v17 = vld [vmem:[%s671_s5 + $0x18] sm:$0xff]  }
   0x7   :  { %468 = vmatpush3.bf16.msra.mxu0 %v518_v1  ;;  %v535_v18 = vld [vmem:[%s671_s5 + $0x20] sm:$0xff]   ;;  %v536_v38 = vld [vmem:[%s671_s5 + $0x28] sm:$0xff]   ;;  %v537_v39 = vld [vmem:[%s671_s5 + $0x30] sm:$0xff]  }
   0x8   :  { %469 = vmatprep.subr.bf16.mxu0 %v519_v2  ;;  %v412_v19 = vld [vmem:[%s672_s2] ss:$0 sm:$0xff]  ;;  %v538_v40 = vld [vmem:[%s671_s5 + $0x38] sm:$0xff]  }
   0x9   :  { %480 = vmatpush3.bf16.msra.mxu1 %v524_v5  ;;  %v421_v41 = vld [vmem:[%s673_s4] ss:$0 sm:$0xff] }
   0xa   :  { %481 = vmatprep.subr.bf16.mxu1 %v525_v7  ;;  %v430_v60 = vld [vmem:[%s674_s6] ss:$0 sm:$0xff] }
   0xb   :  { %470 = vmatpush3.bf16.msra.mxu0 %v519_v2 }
   0xc   :  { %471 = vmatprep.subr.bf16.mxu0 %v520_v6 }
   0xd   :  { %482 = vmatpush3.bf16.msra.mxu1 %v525_v7 }
   0xe   :  { %483 = vmatprep.subr.bf16.mxu1 %v526_v9 }
   0xf   :  { %472 = vmatpush3.bf16.msra.mxu0 %v520_v6 }
  0x10   :  { %497 = vmatprep.subr.bf16.mxu0 %v531_v14 }
  0x11   :  { %484 = vmatpush3.bf16.msra.mxu1 %v526_v9 }
  0x12   :  { %474 = vmatmul.mubr.msk.bf16.vlgmr.msra.gmra.mrb[0].mxu0 %vm80_vm0, %v522_v8  ;;  %485 = vmatprep.subr.bf16.mxu1 %v527_v10 }
  0x13   :  { %498 = vmatpush3.bf16.msra.mxu0 %v531_v14 }
  0x14   :  { %499 = vmatprep.subr.bf16.mxu0 %v532_v15 }
  0x15   :  { %486 = vmatpush3.bf16.msra.mxu1 %v527_v10 }
  0x16   :  { %487 = vmatprep.subr.bf16.mxu1 %v528_v11 }
  0x17   :  { %500 = vmatpush3.bf16.msra.mxu0 %v532_v15 }
  0x18   :  { %501 = vmatprep.subr.bf16.mxu0 %v533_v16 }
  0x19   :  { %488 = vmatpush3.bf16.msra.mxu1 %v528_v11 }
  0x1a   :  { %489 = vmatprep.subr.bf16.mxu1 %v529_v12 }
  0x1b   :  { %502 = vmatpush3.bf16.msra.mxu0 %v533_v16 }
  0x1c   :  { %503 = vmatprep.subr.bf16.mxu0 %v534_v17 }
  0x1d   :  { %490 = vmatpush3.bf16.msra.mxu1 %v529_v12 }
  0x1e   :  { %491 = vmatprep.subr.bf16.mxu1 %v530_v13 }
  0x1f   :  { %504 = vmatpush3.bf16.msra.mxu0 %v534_v17 }
  0x20   :  { %505 = vmatprep.subr.bf16.mxu0 %v535_v18 }
  0x21   :  { %492 = vmatpush3.bf16.msra.mxu1 %v530_v13 }
  0x23   :  { %506 = vmatpush3.bf16.msra.mxu0 %v535_v18 }
  0x24   :  { %507 = vmatprep.subr.bf16.mxu0 %v536_v38 }
  0x27   :  { %508 = vmatpush3.bf16.msra.mxu0 %v536_v38 }
  0x28   :  { %509 = vmatprep.subr.bf16.mxu0 %v537_v39 }
  0x2b   :  { %510 = vmatpush3.bf16.msra.mxu0 %v537_v39 }
  0x2c   :  { %511 = vmatprep.subr.bf16.mxu0 %v538_v40 }
  0x2f   :  { %512 = vmatpush3.bf16.msra.mxu0 %v538_v40 }
  0xe5   :  { %v475_v20 = vpop.f32.mrb[0].mxu0 }
  0xe6   :  { %v130_v21 = vadd.f32 %v475_v20, %v412_v19  ;;  %v121_v22 = vpop.f32.mrb[1].mxu0 }
  0xe7   :  { %v122_v23 = vadd.f32 %v412_v19, %v121_v22  ;;  %v476_v24 = vpop.f32.mrb[2].mxu0 }
  0xe8   :  { %v142_v25 = vmul.f32 0.01, %v130_v21  ;;  %v133_v26 = vadd.f32 %v476_v24, %v412_v19  ;;  %v124_v27 = vpop.f32.mrb[3].mxu0  ;;  %vm138_vm1 = vcmp.ge.f32.partialorder %v130_v21, 0.0 }
  0xe9   :  { %v140_v28 = vmul.f32 0.01, %v122_v23  ;;  %v125_v29 = vadd.f32 %v412_v19, %v124_v27  ;;  %vm136_vm3 = vcmp.ge.f32.partialorder %v122_v23, 0.0 }
  0xea   :  { %vm139_vm2 = vcmp.ge.f32.partialorder %v133_v26, 0.0  ;;  %v143_v30 = vmul.f32 0.01, %v133_v26  ;;  %v146_v32 = vsel %vm138_vm1, %v130_v21, %v142_v25 }
  0xeb   :  { %v141_v31 = vmul.f32 0.01, %v125_v29  ;;  %vm137_vm4 = vcmp.ge.f32.partialorder %v125_v29, 0.0  ;;  %v144_v34 = vsel %vm136_vm3, %v122_v23, %v140_v28 }
  0xec   :  { %v147_v33 = vsel %vm139_vm2, %v133_v26, %v143_v30 }
  0xed   :  { %v145_v35 = vsel %vm137_vm4, %v125_v29, %v141_v31  ;;  %v149_v36 = vpack.c.bf16 %v147_v33, %v146_v32 }
  0xee   :  { %v148_v37 = vpack.c.bf16 %v145_v35, %v144_v34 }
  0xf0   :  { %493 = vmatprep.mubr.bf16.mxu1 %v148_v37 }
  0xf1   :  { %494 = vmatmul.mubr.bf16.vlgmr.msra.gmra.mrb[0].mxu1 %v149_v36 }
 0x1c4   :  { %v495_v42 = vpop.f32.mrb[0].mxu1 }
 0x1c5   :  { %v264_v43 = vadd.f32 %v495_v42, %v421_v41  ;;  %v255_v44 = vpop.f32.mrb[1].mxu1 }
 0x1c6   :  { %v256_v45 = vadd.f32 %v421_v41, %v255_v44  ;;  %v496_v46 = vpop.f32.mrb[2].mxu1 }
 0x1c7   :  { %v276_v47 = vmul.f32 0.01, %v264_v43  ;;  %v267_v48 = vadd.f32 %v496_v46, %v421_v41  ;;  %v258_v49 = vpop.f32.mrb[3].mxu1  ;;  %vm272_vm5 = vcmp.ge.f32.partialorder %v264_v43, 0.0 }
 0x1c8   :  { %v274_v50 = vmul.f32 0.01, %v256_v45  ;;  %v259_v51 = vadd.f32 %v421_v41, %v258_v49  ;;  %vm270_vm6 = vcmp.ge.f32.partialorder %v256_v45, 0.0 }
 0x1c9   :  { %vm273_vm7 = vcmp.ge.f32.partialorder %v267_v48, 0.0  ;;  %v277_v52 = vmul.f32 0.01, %v267_v48  ;;  %v280_v54 = vsel %vm272_vm5, %v264_v43, %v276_v47 }
 0x1ca   :  { %vm271_vm8 = vcmp.ge.f32.partialorder %v259_v51, 0.0  ;;  %v275_v53 = vmul.f32 0.01, %v259_v51  ;;  %v278_v57 = vsel %vm270_vm6, %v256_v45, %v274_v50 }
 0x1cb   :  { %v281_v55 = vsel %vm273_vm7, %v267_v48, %v277_v52 }
 0x1cc   :  { %v283_v56 = vpack.c.bf16 %v281_v55, %v280_v54  ;;  %v279_v58 = vsel %vm271_vm8, %v259_v51, %v275_v53 }
 0x1cd   :  { %v282_v59 = vpack.c.bf16 %v279_v58, %v278_v57 }
 0x1cf   :  { %513 = vmatprep.mubr.bf16.mxu0 %v282_v59 }
 0x1d0   :  { %514 = vmatmul.mubr.bf16.vlgmr.msra.gmra.mrb[4].mxu0 %v283_v56 }
 0x2a3   :  { %v515_v61 = vpop.f32.mrb[4].mxu0 }
 0x2a4   :  { %v398_v62 = vadd.f32 %v515_v61, %v430_v60  ;;  %v389_v63 = vpop.f32.mrb[5].mxu0 }
 0x2a5   :  { %v390_v0 = vadd.f32 %v430_v60, %v389_v63  ;;  %v516_v1 = vpop.f32.mrb[6].mxu0 }
 0x2a6   :  { %406 = vst [vmem:[%s675_s7 + $0x10] sm:$0xff] %v398_v62  ;;  %v401_v2 = vadd.f32 %v516_v1, %v430_v60  ;;  %v392_v3 = vpop.f32.mrb[7].mxu0 }
 0x2a7   :  { %404 = vst [vmem:[%s675_s7] sm:$0xff] %v390_v0  ;;  %v393_v4 = vadd.f32 %v430_v60, %v392_v3 }
 0x2a8   :  { %407 = vst [vmem:[%s675_s7 + $0x18] sm:$0xff] %v401_v2 }
 0x2a9   :  { %405 = vst [vmem:[%s675_s7 + $0x8] sm:$0xff] %v393_v4 }

// kernel: prog_sic_forward.21
= control target key start
LH: loop header
LB: loop body
LE: loop exit
PB: predicated region body
PF: predicated region fallthrough
CT: control target
= control target key end

     0   :  { %v691_v1 = vmov 0   ;;  %vm125_vm0 = vcmask 130048   ;;  %v35_v13 = vlaneseq  ;;  %s1085_s1 = inlined_call_operand.vmem [shape: bf16[16,768], index: 1, kind: input, shape index: {}]   ;;  %s1086_s0 = inlined_call_operand.vmem [shape: bf16[96,16], index: 0, kind: input, shape index: {}]   ;;  %s1087_s2 = inlined_call_operand.vmem [shape: f32[1,768], index: 2, kind: input, shape index: {}]   ;;  %s1088_s3 = inlined_call_operand.vmem [shape: f32[96,768], index: 3, kind: output, shape index: {}]  }
   0x1   :  { %v676_v0 = vld [vmem:[%s1085_s1 + $0x4] ss:$24 sps:$4 sm:$0xff]   ;;  %176 = vmatprep.mubr.bf16.mxu0 %v691_v1  ;;  %206 = vmatprep.mubr.bf16.mxu1 %v691_v1  ;;  %v678_v2 = vld [vmem:[%s1085_s1] ss:$24 sps:$4 sm:$0xff]   ;;  %v684_v7 = vld [vmem:[%s1085_s1 + $0x10] ss:$24 sps:$4 sm:$0xff]  }
   0x2   :  { %144 = vmatprep.subr.bf16.mxu0 %v676_v0  ;;  %673 = vmatprep.subr.bf16.mxu1 %v676_v0  ;;  %v679_v3 = vld [vmem:[%s1086_s0] sm:$0xff]   ;;  %v680_v4 = vld [vmem:[%s1086_s0 + $0x18] sm:$0xff]   ;;  %v686_v8 = vld [vmem:[%s1085_s1 + $0x14] ss:$24 sps:$4 sm:$0xff]   ;;  %v766_v14 = vshrl.u32 %v35_v13, 7 }
   0x3   :  { %145 = vmatpush1.bf16.msra.mxu0 %v678_v2  ;;  %674 = vmatpush1.bf16.msra.mxu1 %v678_v2  ;;  %v681_v5 = vld [vmem:[%s1085_s1 + $0x8] ss:$24 sps:$4 sm:$0xff]   ;;  %v683_v6 = vld [vmem:[%s1085_s1 + $0xc] ss:$24 sps:$4 sm:$0xff]   ;;  %v689_v11 = vld [vmem:[%s1086_s0 + $0x10] sm:$0xff]  }
   0x4   :  { %237 = vmatprep.subr.bf16.mxu1 %v683_v6  ;;  %330 = vmatprep.subr.bf16.mxu0 %v686_v8  ;;  %v687_v9 = vld [vmem:[%s1086_s0 + $0x8] sm:$0xff]   ;;  %v688_v10 = vld [vmem:[%s1086_s0 + $0x20] sm:$0xff]   ;;  %v37_v15 = vsub.s32 0, %v766_v14  ;;  %v41_v17 = vsub.s32 1, %v766_v14  ;;  %v45_v58 = vsub.s32 2, %v766_v14  ;;  %v53_v59 = vsub.s32 4, %v766_v14 }
   0x5   :  { %v690_v12 = vld [vmem:[%s1086_s0 + $0x28] sm:$0xff]   ;;  %v772_v16 = vld [vmem:[%s1087_s2] sm:$0x3f]  ;;  %v49_v0 = vsub.s32 3, %v766_v14 }
   0x6   :  { %655 = vmatmul.mubr.msk.bf16.vlgmr.msra.gmra.mrb[0].mxu0 %vm125_vm0, %v679_v3  ;;  %658 = vmatmul.mubr.msk.bf16.vlgmr.msra.gmra.mrb[0].mxu1 %vm125_vm0, %v680_v4  ;;  %v776_v18 = vrot.slane %v772_v16, %v37_v15  ;;  %v779_v19 = vrot.slane %v772_v16, %v41_v17 }
   0x7   :  { %238 = vmatpush1.bf16.msra.mxu1 %v681_v5  ;;  %331 = vmatpush1.bf16.msra.mxu0 %v684_v7 }
   0x8   :  { %186 = vmatprep.mubr.bf16.mxu0 %v691_v1  ;;  %216 = vmatprep.mubr.bf16.mxu1 %v691_v1 }
   0xe   :  { %656 = vmatmul.mubr.msk.bf16.gmra.mrb[4].mxu0 %vm125_vm0, %v687_v9  ;;  %659 = vmatmul.mubr.msk.bf16.gmra.mrb[4].mxu1 %vm125_vm0, %v688_v10 }
   0xf   :  { %196 = vmatprep.mubr.bf16.mxu0 %v691_v1  ;;  %226 = vmatprep.mubr.bf16.mxu1 %v691_v1 }
  0x16   :  { %657 = vmatmul.mubr.msk.bf16.gmra.mrb[8].mxu0 %vm125_vm0, %v689_v11  ;;  %660 = vmatmul.mubr.msk.bf16.gmra.mrb[8].mxu1 %vm125_vm0, %v690_v12 }
  0x17   :  { %269 = vmatprep.mubr.bf16.mxu1 %v691_v1  ;;  %362 = vmatprep.mubr.bf16.mxu0 %v691_v1 }
  0x1e   :  { %661 = vmatmul.mubr.msk.bf16.vlgmr.msra.gmra.mrb[12].mxu1 %vm125_vm0, %v679_v3  ;;  %667 = vmatmul.mubr.msk.bf16.vlgmr.msra.gmra.mrb[12].mxu0 %vm125_vm0, %v679_v3 }
  0x1f   :  { %279 = vmatprep.mubr.bf16.mxu1 %v691_v1  ;;  %372 = vmatprep.mubr.bf16.mxu0 %v691_v1 }
  0x26   :  { %662 = vmatmul.mubr.msk.bf16.gmra.mrb[16].mxu1 %vm125_vm0, %v687_v9  ;;  %668 = vmatmul.mubr.msk.bf16.gmra.mrb[16].mxu0 %vm125_vm0, %v687_v9 }
  0x27   :  { %289 = vmatprep.mubr.bf16.mxu1 %v691_v1  ;;  %382 = vmatprep.mubr.bf16.mxu0 %v691_v1 }
  0x2e   :  { %663 = vmatmul.mubr.msk.bf16.gmra.mrb[20].mxu1 %vm125_vm0, %v689_v11  ;;  %669 = vmatmul.mubr.msk.bf16.gmra.mrb[20].mxu0 %vm125_vm0, %v689_v11 }
  0x2f   :  { %299 = vmatprep.mubr.bf16.mxu1 %v691_v1  ;;  %392 = vmatprep.mubr.bf16.mxu0 %v691_v1 }
  0x36   :  { %664 = vmatmul.mubr.msk.bf16.gmra.mrb[24].mxu1 %vm125_vm0, %v680_v4  ;;  %670 = vmatmul.mubr.msk.bf16.gmra.mrb[24].mxu0 %vm125_vm0, %v680_v4 }
  0x37   :  { %309 = vmatprep.mubr.bf16.mxu1 %v691_v1  ;;  %402 = vmatprep.mubr.bf16.mxu0 %v691_v1 }
  0x3e   :  { %665 = vmatmul.mubr.msk.bf16.gmra.mrb[28].mxu1 %vm125_vm0, %v688_v10  ;;  %671 = vmatmul.mubr.msk.bf16.gmra.mrb[28].mxu0 %vm125_vm0, %v688_v10 }
  0x3f   :  { %319 = vmatprep.mubr.bf16.mxu1 %v691_v1  ;;  %412 = vmatprep.mubr.bf16.mxu0 %v691_v1  ;;  %v57_v1 = vsub.s32 5, %v766_v14 }
  0x46   :  { %666 = vmatmul.mubr.msk.bf16.gmra.mrb[32].mxu1 %vm125_vm0, %v690_v12  ;;  %672 = vmatmul.mubr.msk.bf16.gmra.mrb[32].mxu0 %vm125_vm0, %v690_v12 }
  0xd9   :  { %v178_v20 = vpop.f32.mrb[0].mxu0  ;;  %v208_v21 = vpop.f32.mrb[0].mxu1 }
  0xda   :  { %v179_v22 = vadd.f32 %v178_v20, %v776_v18  ;;  %v209_v23 = vadd.f32 %v208_v21, %v776_v18  ;;  %v180_v24 = vpop.f32.mrb[1].mxu0  ;;  %v210_v25 = vpop.f32.mrb[1].mxu1 }
  0xdb   :  { %v181_v26 = vadd.f32 %v180_v24, %v779_v19  ;;  %v211_v27 = vadd.f32 %v210_v25, %v779_v19  ;;  %v182_v28 = vpop.f32.mrb[2].mxu0  ;;  %v212_v29 = vpop.f32.mrb[2].mxu1 }
  0xdc   :  { %v423_v30 = vmax.f32 %v179_v22, 0.0  ;;  %v459_v31 = vmax.f32 %v209_v23, 0.0  ;;  %v183_v32 = vadd.f32 %v182_v28, %v776_v18  ;;  %v213_v33 = vadd.f32 %v212_v29, %v776_v18  ;;  %v184_v34 = vpop.f32.mrb[3].mxu0  ;;  %v214_v35 = vpop.f32.mrb[3].mxu1 }
  0xdd   :  { %v424_v36 = vmax.f32 %v181_v26, 0.0  ;;  %v460_v37 = vmax.f32 %v211_v27, 0.0  ;;  %v185_v38 = vadd.f32 %v184_v34, %v779_v19  ;;  %v215_v39 = vadd.f32 %v214_v35, %v779_v19 }
  0xde   :  { %v495_v40 = vmin.f32 %v423_v30, 1.0  ;;  %v531_v41 = vmin.f32 %v459_v31, 1.0  ;;  %v429_v42 = vmax.f32 %v183_v32, 0.0  ;;  %v465_v43 = vmax.f32 %v213_v33, 0.0 }
  0xdf   :  { %v496_v44 = vmin.f32 %v424_v36, 1.0  ;;  %v532_v45 = vmin.f32 %v460_v37, 1.0  ;;  %v430_v46 = vmax.f32 %v185_v38, 0.0  ;;  %v466_v47 = vmax.f32 %v215_v39, 0.0 }
  0xe0   :  { %567 = vst [vmem:[%s1088_s3] sm:$0xff] %v495_v40  ;;  %603 = vst [vmem:[%s1088_s3 + $0x120] sm:$0xff] %v531_v41  ;;  %v501_v48 = vmin.f32 %v429_v42, 1.0  ;;  %v537_v49 = vmin.f32 %v465_v43, 1.0  ;;  %v846_v33 = vrot.slane %v772_v16, %v45_v58  ;;  %v849_v34 = vrot.slane %v772_v16, %v53_v59 }
  0xe1   :  { %568 = vst [vmem:[%s1088_s3 + $0x8] sm:$0xff] %v496_v44  ;;  %604 = vst [vmem:[%s1088_s3 + $0x128] sm:$0xff] %v532_v45  ;;  %v502_v50 = vmin.f32 %v430_v46, 1.0  ;;  %v538_v51 = vmin.f32 %v466_v47, 1.0  ;;  %v188_v52 = vpop.f32.mrb[4].mxu0  ;;  %v218_v53 = vpop.f32.mrb[4].mxu1  ;;  %v860_v39 = vrot.slane %v772_v16, %v49_v0  ;;  %v863_v40 = vrot.slane %v772_v16, %v57_v1 }
  0xe2   :  { %573 = vst [vmem:[%s1088_s3 + $0x30] sm:$0xff] %v501_v48  ;;  %609 = vst [vmem:[%s1088_s3 + $0x150] sm:$0xff] %v537_v49  ;;  %v189_v54 = vadd.f32 %v188_v52, %v776_v18  ;;  %v219_v55 = vadd.f32 %v218_v53, %v776_v18  ;;  %v190_v56 = vpop.f32.mrb[5].mxu0  ;;  %v220_v57 = vpop.f32.mrb[5].mxu1 }
  0xe3   :  { %574 = vst [vmem:[%s1088_s3 + $0x38] sm:$0xff] %v502_v50  ;;  %610 = vst [vmem:[%s1088_s3 + $0x158] sm:$0xff] %v538_v51  ;;  %v191_v60 = vadd.f32 %v190_v56, %v779_v19  ;;  %v221_v61 = vadd.f32 %v220_v57, %v779_v19  ;;  %v192_v62 = vpop.f32.mrb[6].mxu0  ;;  %v222_v63 = vpop.f32.mrb[6].mxu1 }
  0xe4   :  { %v435_v2 = vmax.f32 %v189_v54, 0.0  ;;  %v471_v3 = vmax.f32 %v219_v55, 0.0  ;;  %v193_v4 = vadd.f32 %v192_v62, %v776_v18  ;;  %v223_v5 = vadd.f32 %v222_v63, %v776_v18  ;;  %v194_v6 = vpop.f32.mrb[7].mxu0  ;;  %v224_v7 = vpop.f32.mrb[7].mxu1 }
  0xe5   :  { %v436_v8 = vmax.f32 %v191_v60, 0.0  ;;  %v472_v9 = vmax.f32 %v221_v61, 0.0  ;;  %v195_v10 = vadd.f32 %v194_v6, %v779_v19  ;;  %v225_v11 = vadd.f32 %v224_v7, %v779_v19 }
  0xe6   :  { %v507_v12 = vmin.f32 %v435_v2, 1.0  ;;  %v543_v13 = vmin.f32 %v471_v3, 1.0  ;;  %v441_v15 = vmax.f32 %v193_v4, 0.0  ;;  %v477_v17 = vmax.f32 %v223_v5, 0.0 }
  0xe7   :  { %v508_v20 = vmin.f32 %v436_v8, 1.0  ;;  %v544_v14 = vmin.f32 %v472_v9, 1.0  ;;  %v442_v21 = vmax.f32 %v195_v10, 0.0  ;;  %v478_v22 = vmax.f32 %v225_v11, 0.0 }
  0xe8   :  { %579 = vst [vmem:[%s1088_s3 + $0x60] sm:$0xff] %v507_v12  ;;  %615 = vst [vmem:[%s1088_s3 + $0x180] sm:$0xff] %v543_v13  ;;  %v513_v23 = vmin.f32 %v441_v15, 1.0  ;;  %v549_v24 = vmin.f32 %v477_v17, 1.0 }
  0xe9   :  { %580 = vst [vmem:[%s1088_s3 + $0x68] sm:$0xff] %v508_v20  ;;  %616 = vst [vmem:[%s1088_s3 + $0x188] sm:$0xff] %v544_v14  ;;  %v514_v25 = vmin.f32 %v442_v21, 1.0  ;;  %v550_v26 = vmin.f32 %v478_v22, 1.0  ;;  %v198_v27 = vpop.f32.mrb[8].mxu0  ;;  %v228_v28 = vpop.f32.mrb[8].mxu1 }
  0xea   :  { %585 = vst [vmem:[%s1088_s3 + $0x90] sm:$0xff] %v513_v23  ;;  %621 = vst [vmem:[%s1088_s3 + $0x1b0] sm:$0xff] %v549_v24  ;;  %v199_v29 = vadd.f32 %v198_v27, %v776_v18  ;;  %v229_v30 = vadd.f32 %v228_v28, %v776_v18  ;;  %v200_v31 = vpop.f32.mrb[9].mxu0  ;;  %v230_v32 = vpop.f32.mrb[9].mxu1 }
  0xeb   :  { %586 = vst [vmem:[%s1088_s3 + $0x98] sm:$0xff] %v514_v25  ;;  %622 = vst [vmem:[%s1088_s3 + $0x1b8] sm:$0xff] %v550_v26  ;;  %v201_v35 = vadd.f32 %v200_v31, %v779_v19  ;;  %v231_v36 = vadd.f32 %v230_v32, %v779_v19  ;;  %v202_v37 = vpop.f32.mrb[10].mxu0  ;;  %v232_v38 = vpop.f32.mrb[10].mxu1 }
  0xec   :  { %v447_v41 = vmax.f32 %v199_v29, 0.0  ;;  %v483_v42 = vmax.f32 %v229_v30, 0.0  ;;  %v203_v43 = vadd.f32 %v202_v37, %v776_v18  ;;  %v233_v44 = vadd.f32 %v232_v38, %v776_v18  ;;  %v204_v45 = vpop.f32.mrb[11].mxu0  ;;  %v234_v46 = vpop.f32.mrb[11].mxu1 }
  0xed   :  { %v448_v47 = vmax.f32 %v201_v35, 0.0  ;;  %v484_v48 = vmax.f32 %v231_v36, 0.0  ;;  %v205_v49 = vadd.f32 %v204_v45, %v779_v19  ;;  %v235_v50 = vadd.f32 %v234_v46, %v779_v19 }
  0xee   :  { %v519_v51 = vmin.f32 %v447_v41, 1.0  ;;  %v555_v52 = vmin.f32 %v483_v42, 1.0  ;;  %v453_v53 = vmax.f32 %v203_v43, 0.0  ;;  %v489_v54 = vmax.f32 %v233_v44, 0.0 }
  0xef   :  { %v520_v16 = vmin.f32 %v448_v47, 1.0  ;;  %v556_v55 = vmin.f32 %v484_v48, 1.0  ;;  %v454_v56 = vmax.f32 %v205_v49, 0.0  ;;  %v490_v57 = vmax.f32 %v235_v50, 0.0 }
  0xf0   :  { %591 = vst [vmem:[%s1088_s3 + $0xc0] sm:$0xff] %v519_v51  ;;  %627 = vst [vmem:[%s1088_s3 + $0x1e0] sm:$0xff] %v555_v52  ;;  %v525_v18 = vmin.f32 %v453_v53, 1.0  ;;  %v561_v58 = vmin.f32 %v489_v54, 1.0 }
  0xf1   :  { %592 = vst [vmem:[%s1088_s3 + $0xc8] sm:$0xff] %v520_v16  ;;  %628 = vst [vmem:[%s1088_s3 + $0x1e8] sm:$0xff] %v556_v55  ;;  %v526_v19 = vmin.f32 %v454_v56, 1.0  ;;  %v562_v59 = vmin.f32 %v490_v57, 1.0  ;;  %v271_v60 = vpop.f32.mrb[12].mxu1  ;;  %v364_v61 = vpop.f32.mrb[12].mxu0 }
  0xf2   :  { %597 = vst [vmem:[%s1088_s3 + $0xf0] sm:$0xff] %v525_v18  ;;  %633 = vst [vmem:[%s1088_s3 + $0x210] sm:$0xff] %v561_v58  ;;  %v272_v62 = vadd.f32 %v271_v60, %v846_v33  ;;  %v365_v63 = vadd.f32 %v364_v61, %v849_v34  ;;  %v273_v0 = vpop.f32.mrb[13].mxu1  ;;  %v366_v1 = vpop.f32.mrb[13].mxu0 }
  0xf3   :  { %598 = vst [vmem:[%s1088_s3 + $0xf8] sm:$0xff] %v526_v19  ;;  %634 = vst [vmem:[%s1088_s3 + $0x218] sm:$0xff] %v562_v59  ;;  %v274_v2 = vadd.f32 %v273_v0, %v860_v39  ;;  %v367_v3 = vadd.f32 %v366_v1, %v863_v40  ;;  %v275_v4 = vpop.f32.mrb[14].mxu1  ;;  %v368_v5 = vpop.f32.mrb[14].mxu0 }
  0xf4   :  { %v425_v6 = vmax.f32 %v272_v62, 0.0  ;;  %v427_v7 = vmax.f32 %v365_v63, 0.0  ;;  %v276_v8 = vadd.f32 %v275_v4, %v846_v33  ;;  %v369_v9 = vadd.f32 %v368_v5, %v849_v34  ;;  %v277_v10 = vpop.f32.mrb[15].mxu1  ;;  %v370_v11 = vpop.f32.mrb[15].mxu0 }
  0xf5   :  { %v426_v12 = vmax.f32 %v274_v2, 0.0  ;;  %v428_v13 = vmax.f32 %v367_v3, 0.0  ;;  %v278_v15 = vadd.f32 %v277_v10, %v860_v39  ;;  %v371_v17 = vadd.f32 %v370_v11, %v863_v40 }
  0xf6   :  { %v497_v20 = vmin.f32 %v425_v6, 1.0  ;;  %v499_v14 = vmin.f32 %v427_v7, 1.0  ;;  %v431_v21 = vmax.f32 %v276_v8, 0.0  ;;  %v433_v22 = vmax.f32 %v369_v9, 0.0 }
  0xf7   :  { %v498_v23 = vmin.f32 %v426_v12, 1.0  ;;  %v500_v24 = vmin.f32 %v428_v13, 1.0  ;;  %v432_v25 = vmax.f32 %v278_v15, 0.0  ;;  %v434_v26 = vmax.f32 %v371_v17, 0.0 }
  0xf8   :  { %569 = vst [vmem:[%s1088_s3 + $0x10] sm:$0xff] %v497_v20  ;;  %571 = vst [vmem:[%s1088_s3 + $0x20] sm:$0xff] %v499_v14  ;;  %v503_v27 = vmin.f32 %v431_v21, 1.0  ;;  %v505_v28 = vmin.f32 %v433_v22, 1.0 }
  0xf9   :  { %570 = vst [vmem:[%s1088_s3 + $0x18] sm:$0xff] %v498_v23  ;;  %572 = vst [vmem:[%s1088_s3 + $0x28] sm:$0xff] %v500_v24  ;;  %v504_v29 = vmin.f32 %v432_v25, 1.0  ;;  %v506_v30 = vmin.f32 %v434_v26, 1.0  ;;  %v281_v31 = vpop.f32.mrb[16].mxu1  ;;  %v374_v32 = vpop.f32.mrb[16].mxu0 }
  0xfa   :  { %575 = vst [vmem:[%s1088_s3 + $0x40] sm:$0xff] %v503_v27  ;;  %577 = vst [vmem:[%s1088_s3 + $0x50] sm:$0xff] %v505_v28  ;;  %v282_v35 = vadd.f32 %v281_v31, %v846_v33  ;;  %v375_v36 = vadd.f32 %v374_v32, %v849_v34  ;;  %v283_v37 = vpop.f32.mrb[17].mxu1  ;;  %v376_v38 = vpop.f32.mrb[17].mxu0 }
  0xfb   :  { %576 = vst [vmem:[%s1088_s3 + $0x48] sm:$0xff] %v504_v29  ;;  %578 = vst [vmem:[%s1088_s3 + $0x58] sm:$0xff] %v506_v30  ;;  %v284_v41 = vadd.f32 %v283_v37, %v860_v39  ;;  %v377_v42 = vadd.f32 %v376_v38, %v863_v40  ;;  %v285_v43 = vpop.f32.mrb[18].mxu1  ;;  %v378_v44 = vpop.f32.mrb[18].mxu0 }
  0xfc   :  { %v437_v45 = vmax.f32 %v282_v35, 0.0  ;;  %v439_v46 = vmax.f32 %v375_v36, 0.0  ;;  %v286_v47 = vadd.f32 %v285_v43, %v846_v33  ;;  %v379_v48 = vadd.f32 %v378_v44, %v849_v34  ;;  %v287_v49 = vpop.f32.mrb[19].mxu1  ;;  %v380_v50 = vpop.f32.mrb[19].mxu0 }
  0xfd   :  { %v438_v51 = vmax.f32 %v284_v41, 0.0  ;;  %v440_v52 = vmax.f32 %v377_v42, 0.0  ;;  %v288_v53 = vadd.f32 %v287_v49, %v860_v39  ;;  %v381_v54 = vadd.f32 %v380_v50, %v863_v40 }
  0xfe   :  { %v509_v16 = vmin.f32 %v437_v45, 1.0  ;;  %v511_v55 = vmin.f32 %v439_v46, 1.0  ;;  %v443_v56 = vmax.f32 %v286_v47, 0.0  ;;  %v445_v57 = vmax.f32 %v379_v48, 0.0 }
  0xff   :  { %v510_v18 = vmin.f32 %v438_v51, 1.0  ;;  %v512_v58 = vmin.f32 %v440_v52, 1.0  ;;  %v444_v19 = vmax.f32 %v288_v53, 0.0  ;;  %v446_v59 = vmax.f32 %v381_v54, 0.0 }
 0x100   :  { %581 = vst [vmem:[%s1088_s3 + $0x70] sm:$0xff] %v509_v16  ;;  %583 = vst [vmem:[%s1088_s3 + $0x80] sm:$0xff] %v511_v55  ;;  %v515_v60 = vmin.f32 %v443_v56, 1.0  ;;  %v517_v61 = vmin.f32 %v445_v57, 1.0 }
 0x101   :  { %582 = vst [vmem:[%s1088_s3 + $0x78] sm:$0xff] %v510_v18  ;;  %584 = vst [vmem:[%s1088_s3 + $0x88] sm:$0xff] %v512_v58  ;;  %v516_v62 = vmin.f32 %v444_v19, 1.0  ;;  %v518_v63 = vmin.f32 %v446_v59, 1.0  ;;  %v291_v0 = vpop.f32.mrb[20].mxu1  ;;  %v384_v1 = vpop.f32.mrb[20].mxu0 }
 0x102   :  { %587 = vst [vmem:[%s1088_s3 + $0xa0] sm:$0xff] %v515_v60  ;;  %589 = vst [vmem:[%s1088_s3 + $0xb0] sm:$0xff] %v517_v61  ;;  %v292_v2 = vadd.f32 %v291_v0, %v846_v33  ;;  %v385_v3 = vadd.f32 %v384_v1, %v849_v34  ;;  %v293_v4 = vpop.f32.mrb[21].mxu1  ;;  %v386_v5 = vpop.f32.mrb[21].mxu0 }
 0x103   :  { %588 = vst [vmem:[%s1088_s3 + $0xa8] sm:$0xff] %v516_v62  ;;  %590 = vst [vmem:[%s1088_s3 + $0xb8] sm:$0xff] %v518_v63  ;;  %v294_v6 = vadd.f32 %v293_v4, %v860_v39  ;;  %v387_v7 = vadd.f32 %v386_v5, %v863_v40  ;;  %v295_v8 = vpop.f32.mrb[22].mxu1  ;;  %v388_v9 = vpop.f32.mrb[22].mxu0 }
 0x104   :  { %v449_v10 = vmax.f32 %v292_v2, 0.0  ;;  %v451_v11 = vmax.f32 %v385_v3, 0.0  ;;  %v296_v12 = vadd.f32 %v295_v8, %v846_v33  ;;  %v389_v13 = vadd.f32 %v388_v9, %v849_v34  ;;  %v297_v15 = vpop.f32.mrb[23].mxu1  ;;  %v390_v17 = vpop.f32.mrb[23].mxu0 }
 0x105   :  { %v450_v20 = vmax.f32 %v294_v6, 0.0  ;;  %v452_v14 = vmax.f32 %v387_v7, 0.0  ;;  %v298_v21 = vadd.f32 %v297_v15, %v860_v39  ;;  %v391_v22 = vadd.f32 %v390_v17, %v863_v40 }
 0x106   :  { %v521_v23 = vmin.f32 %v449_v10, 1.0  ;;  %v523_v24 = vmin.f32 %v451_v11, 1.0  ;;  %v455_v25 = vmax.f32 %v296_v12, 0.0  ;;  %v457_v26 = vmax.f32 %v389_v13, 0.0 }
 0x107   :  { %v522_v27 = vmin.f32 %v450_v20, 1.0  ;;  %v524_v28 = vmin.f32 %v452_v14, 1.0  ;;  %v456_v29 = vmax.f32 %v298_v21, 0.0  ;;  %v458_v30 = vmax.f32 %v391_v22, 0.0 }
 0x108   :  { %593 = vst [vmem:[%s1088_s3 + $0xd0] sm:$0xff] %v521_v23  ;;  %595 = vst [vmem:[%s1088_s3 + $0xe0] sm:$0xff] %v523_v24  ;;  %v527_v31 = vmin.f32 %v455_v25, 1.0  ;;  %v529_v32 = vmin.f32 %v457_v26, 1.0 }
 0x109   :  { %594 = vst [vmem:[%s1088_s3 + $0xd8] sm:$0xff] %v522_v27  ;;  %596 = vst [vmem:[%s1088_s3 + $0xe8] sm:$0xff] %v524_v28  ;;  %v528_v35 = vmin.f32 %v456_v29, 1.0  ;;  %v530_v36 = vmin.f32 %v458_v30, 1.0  ;;  %v301_v37 = vpop.f32.mrb[24].mxu1  ;;  %v394_v38 = vpop.f32.mrb[24].mxu0 }
 0x10a   :  { %599 = vst [vmem:[%s1088_s3 + $0x100] sm:$0xff] %v527_v31  ;;  %601 = vst [vmem:[%s1088_s3 + $0x110] sm:$0xff] %v529_v32  ;;  %v302_v41 = vadd.f32 %v301_v37, %v846_v33  ;;  %v395_v42 = vadd.f32 %v394_v38, %v849_v34  ;;  %v303_v43 = vpop.f32.mrb[25].mxu1  ;;  %v396_v44 = vpop.f32.mrb[25].mxu0 }
 0x10b   :  { %600 = vst [vmem:[%s1088_s3 + $0x108] sm:$0xff] %v528_v35  ;;  %602 = vst [vmem:[%s1088_s3 + $0x118] sm:$0xff] %v530_v36  ;;  %v304_v45 = vadd.f32 %v303_v43, %v860_v39  ;;  %v397_v46 = vadd.f32 %v396_v44, %v863_v40  ;;  %v305_v47 = vpop.f32.mrb[26].mxu1  ;;  %v398_v48 = vpop.f32.mrb[26].mxu0 }
 0x10c   :  { %v461_v49 = vmax.f32 %v302_v41, 0.0  ;;  %v463_v50 = vmax.f32 %v395_v42, 0.0  ;;  %v306_v51 = vadd.f32 %v305_v47, %v846_v33  ;;  %v399_v52 = vadd.f32 %v398_v48, %v849_v34  ;;  %v307_v53 = vpop.f32.mrb[27].mxu1  ;;  %v400_v54 = vpop.f32.mrb[27].mxu0 }
 0x10d   :  { %v462_v16 = vmax.f32 %v304_v45, 0.0  ;;  %v464_v55 = vmax.f32 %v397_v46, 0.0  ;;  %v308_v56 = vadd.f32 %v307_v53, %v860_v39  ;;  %v401_v57 = vadd.f32 %v400_v54, %v863_v40 }
 0x10e   :  { %v533_v18 = vmin.f32 %v461_v49, 1.0  ;;  %v535_v58 = vmin.f32 %v463_v50, 1.0  ;;  %v467_v19 = vmax.f32 %v306_v51, 0.0  ;;  %v469_v59 = vmax.f32 %v399_v52, 0.0 }
 0x10f   :  { %v534_v60 = vmin.f32 %v462_v16, 1.0  ;;  %v536_v61 = vmin.f32 %v464_v55, 1.0  ;;  %v468_v62 = vmax.f32 %v308_v56, 0.0  ;;  %v470_v63 = vmax.f32 %v401_v57, 0.0 }
 0x110   :  { %605 = vst [vmem:[%s1088_s3 + $0x130] sm:$0xff] %v533_v18  ;;  %607 = vst [vmem:[%s1088_s3 + $0x140] sm:$0xff] %v535_v58  ;;  %v539_v0 = vmin.f32 %v467_v19, 1.0  ;;  %v541_v1 = vmin.f32 %v469_v59, 1.0 }
 0x111   :  { %606 = vst [vmem:[%s1088_s3 + $0x138] sm:$0xff] %v534_v60  ;;  %608 = vst [vmem:[%s1088_s3 + $0x148] sm:$0xff] %v536_v61  ;;  %v540_v2 = vmin.f32 %v468_v62, 1.0  ;;  %v542_v3 = vmin.f32 %v470_v63, 1.0  ;;  %v311_v4 = vpop.f32.mrb[28].mxu1  ;;  %v404_v5 = vpop.f32.mrb[28].mxu0 }
 0x112   :  { %611 = vst [vmem:[%s1088_s3 + $0x160] sm:$0xff] %v539_v0  ;;  %613 = vst [vmem:[%s1088_s3 + $0x170] sm:$0xff] %v541_v1  ;;  %v312_v6 = vadd.f32 %v311_v4, %v846_v33  ;;  %v405_v7 = vadd.f32 %v404_v5, %v849_v34  ;;  %v313_v8 = vpop.f32.mrb[29].mxu1  ;;  %v406_v9 = vpop.f32.mrb[29].mxu0 }
 0x113   :  { %612 = vst [vmem:[%s1088_s3 + $0x168] sm:$0xff] %v540_v2  ;;  %614 = vst [vmem:[%s1088_s3 + $0x178] sm:$0xff] %v542_v3  ;;  %v314_v10 = vadd.f32 %v313_v8, %v860_v39  ;;  %v407_v11 = vadd.f32 %v406_v9, %v863_v40  ;;  %v315_v12 = vpop.f32.mrb[30].mxu1  ;;  %v408_v13 = vpop.f32.mrb[30].mxu0 }
 0x114   :  { %v473_v15 = vmax.f32 %v312_v6, 0.0  ;;  %v475_v17 = vmax.f32 %v405_v7, 0.0  ;;  %v316_v20 = vadd.f32 %v315_v12, %v846_v33  ;;  %v409_v14 = vadd.f32 %v408_v13, %v849_v34  ;;  %v317_v21 = vpop.f32.mrb[31].mxu1  ;;  %v410_v22 = vpop.f32.mrb[31].mxu0 }
 0x115   :  { %v474_v23 = vmax.f32 %v314_v10, 0.0  ;;  %v476_v24 = vmax.f32 %v407_v11, 0.0  ;;  %v318_v25 = vadd.f32 %v317_v21, %v860_v39  ;;  %v411_v26 = vadd.f32 %v410_v22, %v863_v40 }
 0x116   :  { %v545_v27 = vmin.f32 %v473_v15, 1.0  ;;  %v547_v28 = vmin.f32 %v475_v17, 1.0  ;;  %v479_v29 = vmax.f32 %v316_v20, 0.0  ;;  %v481_v30 = vmax.f32 %v409_v14, 0.0 }
 0x117   :  { %v546_v31 = vmin.f32 %v474_v23, 1.0  ;;  %v548_v32 = vmin.f32 %v476_v24, 1.0  ;;  %v480_v35 = vmax.f32 %v318_v25, 0.0  ;;  %v482_v36 = vmax.f32 %v411_v26, 0.0 }
 0x118   :  { %617 = vst [vmem:[%s1088_s3 + $0x190] sm:$0xff] %v545_v27  ;;  %619 = vst [vmem:[%s1088_s3 + $0x1a0] sm:$0xff] %v547_v28  ;;  %v551_v37 = vmin.f32 %v479_v29, 1.0  ;;  %v553_v38 = vmin.f32 %v481_v30, 1.0 }
 0x119   :  { %618 = vst [vmem:[%s1088_s3 + $0x198] sm:$0xff] %v546_v31  ;;  %620 = vst [vmem:[%s1088_s3 + $0x1a8] sm:$0xff] %v548_v32  ;;  %v552_v41 = vmin.f32 %v480_v35, 1.0  ;;  %v554_v42 = vmin.f32 %v482_v36, 1.0  ;;  %v321_v43 = vpop.f32.mrb[32].mxu1  ;;  %v414_v44 = vpop.f32.mrb[32].mxu0 }
 0x11a   :  { %623 = vst [vmem:[%s1088_s3 + $0x1c0] sm:$0xff] %v551_v37  ;;  %625 = vst [vmem:[%s1088_s3 + $0x1d0] sm:$0xff] %v553_v38  ;;  %v322_v45 = vadd.f32 %v321_v43, %v846_v33  ;;  %v415_v46 = vadd.f32 %v414_v44, %v849_v34  ;;  %v323_v47 = vpop.f32.mrb[33].mxu1  ;;  %v416_v48 = vpop.f32.mrb[33].mxu0 }
 0x11b   :  { %624 = vst [vmem:[%s1088_s3 + $0x1c8] sm:$0xff] %v552_v41  ;;  %626 = vst [vmem:[%s1088_s3 + $0x1d8] sm:$0xff] %v554_v42  ;;  %v324_v49 = vadd.f32 %v323_v47, %v860_v39  ;;  %v417_v50 = vadd.f32 %v416_v48, %v863_v40  ;;  %v325_v51 = vpop.f32.mrb[34].mxu1  ;;  %v418_v52 = vpop.f32.mrb[34].mxu0 }
 0x11c   :  { %v485_v53 = vmax.f32 %v322_v45, 0.0  ;;  %v487_v54 = vmax.f32 %v415_v46, 0.0  ;;  %v326_v16 = vadd.f32 %v325_v51, %v846_v33  ;;  %v419_v55 = vadd.f32 %v418_v52, %v849_v34  ;;  %v327_v56 = vpop.f32.mrb[35].mxu1  ;;  %v420_v57 = vpop.f32.mrb[35].mxu0 }
 0x11d   :  { %v486_v18 = vmax.f32 %v324_v49, 0.0  ;;  %v488_v58 = vmax.f32 %v417_v50, 0.0  ;;  %v328_v19 = vadd.f32 %v327_v56, %v860_v39  ;;  %v421_v59 = vadd.f32 %v420_v57, %v863_v40 }
 0x11e   :  { %v557_v60 = vmin.f32 %v485_v53, 1.0  ;;  %v559_v61 = vmin.f32 %v487_v54, 1.0  ;;  %v491_v62 = vmax.f32 %v326_v16, 0.0  ;;  %v493_v63 = vmax.f32 %v419_v55, 0.0 }
 0x11f   :  { %v558_v0 = vmin.f32 %v486_v18, 1.0  ;;  %v560_v1 = vmin.f32 %v488_v58, 1.0  ;;  %v492_v2 = vmax.f32 %v328_v19, 0.0  ;;  %v494_v3 = vmax.f32 %v421_v59, 0.0 }
 0x120   :  { %629 = vst [vmem:[%s1088_s3 + $0x1f0] sm:$0xff] %v557_v60  ;;  %631 = vst [vmem:[%s1088_s3 + $0x200] sm:$0xff] %v559_v61  ;;  %v563_v33 = vmin.f32 %v491_v62, 1.0  ;;  %v565_v34 = vmin.f32 %v493_v63, 1.0 }
 0x121   :  { %630 = vst [vmem:[%s1088_s3 + $0x1f8] sm:$0xff] %v558_v0  ;;  %632 = vst [vmem:[%s1088_s3 + $0x208] sm:$0xff] %v560_v1  ;;  %v564_v39 = vmin.f32 %v492_v2, 1.0  ;;  %v566_v40 = vmin.f32 %v494_v3, 1.0 }
 0x122   :  { %635 = vst [vmem:[%s1088_s3 + $0x220] sm:$0xff] %v563_v33  ;;  %637 = vst [vmem:[%s1088_s3 + $0x230] sm:$0xff] %v565_v34 }
 0x123   :  { %636 = vst [vmem:[%s1088_s3 + $0x228] sm:$0xff] %v564_v39  ;;  %638 = vst [vmem:[%s1088_s3 + $0x238] sm:$0xff] %v566_v40 }

// kernel: prog_sic_forward.23
= control target key start
LH: loop header
LB: loop body
LE: loop exit
PB: predicated region body
PF: predicated region fallthrough
CT: control target
= control target key end

     0   :  { %s1583_s1 = inlined_call_operand.vmem [shape: bf16[768,128], index: 1, kind: input, shape index: {}]   ;;  %s1584_s0 = inlined_call_operand.vmem [shape: bf16[96,768], index: 0, kind: input, shape index: {}]   ;;  %s1585_s2 = inlined_call_operand.vmem [shape: f32[1,128], index: 2, kind: input, shape index: {}]   ;;  %s1586_s3 = inlined_call_operand.vmem [shape: f32[96,128], index: 3, kind: output, shape index: {}]  }
   0x1   :  { %v1138_v0 = vld [vmem:[%s1583_s1 + $0x40] sm:$0xff]   ;;  %v1142_v4 = vld [vmem:[%s1583_s1 + $0x48] sm:$0xff]   ;;  %v1146_v8 = vld [vmem:[%s1583_s1 + $0x50] sm:$0xff]  }
   0x2   :  { %v1139_v1 = vld [vmem:[%s1583_s1 + $0xc0] sm:$0xff]   ;;  %966 = vmatprep.subr.bf16.mxu0 %v1138_v0  ;;  %v1143_v5 = vld [vmem:[%s1583_s1 + $0xc8] sm:$0xff]   ;;  %v1147_v9 = vld [vmem:[%s1583_s1 + $0xd0] sm:$0xff]  }
   0x3   :  { %v1140_v2 = vld [vmem:[%s1583_s1] sm:$0xff]   ;;  %1018 = vmatprep.subr.bf16.mxu1 %v1139_v1  ;;  %v1144_v6 = vld [vmem:[%s1583_s1 + $0x8] sm:$0xff]   ;;  %v1148_v10 = vld [vmem:[%s1583_s1 + $0x10] sm:$0xff]  }
   0x4   :  { %v1141_v3 = vld [vmem:[%s1583_s1 + $0x80] sm:$0xff]   ;;  %967 = vmatpush3.bf16.msra.mxu0 %v1140_v2  ;;  %v1145_v7 = vld [vmem:[%s1583_s1 + $0x88] sm:$0xff]   ;;  %v1149_v11 = vld [vmem:[%s1583_s1 + $0x90] sm:$0xff]  }
   0x5   :  { %1019 = vmatpush3.bf16.msra.mxu1 %v1141_v3  ;;  %968 = vmatprep.subr.bf16.mxu0 %v1142_v4  ;;  %v1150_v12 = vld [vmem:[%s1583_s1 + $0x58] sm:$0xff]   ;;  %v1154_v16 = vld [vmem:[%s1583_s1 + $0x60] sm:$0xff]   ;;  %v1158_v20 = vld [vmem:[%s1583_s1 + $0x68] sm:$0xff]  }
   0x6   :  { %1020 = vmatprep.subr.bf16.mxu1 %v1143_v5  ;;  %v1151_v13 = vld [vmem:[%s1583_s1 + $0xd8] sm:$0xff]   ;;  %v1155_v17 = vld [vmem:[%s1583_s1 + $0xe0] sm:$0xff]   ;;  %v1159_v21 = vld [vmem:[%s1583_s1 + $0xe8] sm:$0xff]  }
   0x7   :  { %v1152_v14 = vld [vmem:[%s1583_s1 + $0x18] sm:$0xff]   ;;  %v1156_v18 = vld [vmem:[%s1583_s1 + $0x20] sm:$0xff]   ;;  %v1160_v22 = vld [vmem:[%s1583_s1 + $0x28] sm:$0xff]  }
   0x8   :  { %969 = vmatpush3.bf16.msra.mxu0 %v1144_v6  ;;  %v1153_v15 = vld [vmem:[%s1583_s1 + $0x98] sm:$0xff]   ;;  %v1157_v19 = vld [vmem:[%s1583_s1 + $0xa0] sm:$0xff]   ;;  %v1161_v23 = vld [vmem:[%s1583_s1 + $0xa8] sm:$0xff]  }
   0x9   :  { %1021 = vmatpush3.bf16.msra.mxu1 %v1145_v7  ;;  %970 = vmatprep.subr.bf16.mxu0 %v1146_v8  ;;  %v1162_v24 = vld [vmem:[%s1583_s1 + $0x70] sm:$0xff]   ;;  %v1166_v28 = vld [vmem:[%s1583_s1 + $0x78] sm:$0xff]   ;;  %v1173_v34 = vld [vmem:[%s1584_s0 + $0x8] ss:$24 sps:$4 sm:$0xff]  }
   0xa   :  { %1022 = vmatprep.subr.bf16.mxu1 %v1147_v9  ;;  %v1163_v25 = vld [vmem:[%s1583_s1 + $0xf0] sm:$0xff]   ;;  %v1167_v29 = vld [vmem:[%s1583_s1 + $0xf8] sm:$0xff]   ;;  %v1175_v35 = vld [vmem:[%s1584_s0 + $0xc] ss:$24 sps:$4 sm:$0xff]  }
   0xb   :  { %v1164_v26 = vld [vmem:[%s1583_s1 + $0x30] sm:$0xff]   ;;  %v1168_v30 = vld [vmem:[%s1583_s1 + $0x38] sm:$0xff]   ;;  %v1176_v36 = vld [vmem:[%s1583_s1 + $0x140] sm:$0xff]   ;;  %735 = vmatprep.mubr.bf16.mxu1 %v1175_v35 }
   0xc   :  { %971 = vmatpush3.bf16.msra.mxu0 %v1148_v10  ;;  %v1165_v27 = vld [vmem:[%s1583_s1 + $0xb0] sm:$0xff]   ;;  %v1169_v31 = vld [vmem:[%s1583_s1 + $0xb8] sm:$0xff]   ;;  %v1177_v37 = vld [vmem:[%s1583_s1 + $0x100] sm:$0xff]  }
   0xd   :  { %1023 = vmatpush3.bf16.msra.mxu1 %v1149_v11  ;;  %972 = vmatprep.subr.bf16.mxu0 %v1150_v12  ;;  %v1170_v32 = vld [vmem:[%s1584_s0] ss:$24 sps:$4 sm:$0xff]   ;;  %v1172_v33 = vld [vmem:[%s1584_s0 + $0x4] ss:$24 sps:$4 sm:$0xff]   ;;  %v1178_v38 = vld [vmem:[%s1583_s1 + $0x148] sm:$0xff]  }
   0xe   :  { %1024 = vmatprep.subr.bf16.mxu1 %v1151_v13  ;;  %654 = vmatprep.mubr.bf16.mxu0 %v1172_v33  ;;  %v1179_v39 = vld [vmem:[%s1584_s0 + $0x34] ss:$24 sps:$4 sm:$0xff]   ;;  %v1184_v42 = vld [vmem:[%s1584_s0 + $0x30] ss:$24 sps:$4 sm:$0xff]   ;;  %v1188_v46 = vld [vmem:[%s1584_s0 + $0x64] ss:$24 sps:$4 sm:$0xff]  }
   0xf   :  { %v1181_v40 = vld [vmem:[%s1584_s0 + $0x3c] ss:$24 sps:$4 sm:$0xff]   ;;  %v1183_v41 = vld [vmem:[%s1583_s1 + $0x108] sm:$0xff]   ;;  %v1185_v43 = vld [vmem:[%s1584_s0 + $0x38] ss:$24 sps:$4 sm:$0xff]  }
  0x10   :  { %973 = vmatpush3.bf16.msra.mxu0 %v1152_v14  ;;  %v1186_v44 = vld [vmem:[%s1583_s1 + $0x150] sm:$0xff]   ;;  %v1190_v47 = vld [vmem:[%s1584_s0 + $0x6c] ss:$24 sps:$4 sm:$0xff]   ;;  %v1192_v48 = vld [vmem:[%s1584_s0 + $0x60] ss:$24 sps:$4 sm:$0xff]  }
  0x11   :  { %1025 = vmatpush3.bf16.msra.mxu1 %v1153_v15  ;;  %974 = vmatprep.subr.bf16.mxu0 %v1154_v16  ;;  %v1187_v45 = vld [vmem:[%s1583_s1 + $0x110] sm:$0xff]   ;;  %v1194_v49 = vld [vmem:[%s1583_s1 + $0x158] sm:$0xff]   ;;  %v1193_v51 = vld [vmem:[%s1584_s0 + $0x68] ss:$24 sps:$4 sm:$0xff]  }
  0x12   :  { %1026 = vmatprep.subr.bf16.mxu1 %v1155_v17  ;;  %v1195_v50 = vld [vmem:[%s1583_s1 + $0x118] sm:$0xff]   ;;  %v1196_v52 = vld [vmem:[%s1584_s0 + $0x94] ss:$24 sps:$4 sm:$0xff]   ;;  %v1202_v54 = vld [vmem:[%s1583_s1 + $0x160] sm:$0xff]  }
  0x13   :  { %v1198_v53 = vld [vmem:[%s1584_s0 + $0x9c] ss:$24 sps:$4 sm:$0xff]   ;;  %v1203_v55 = vld [vmem:[%s1583_s1 + $0x120] sm:$0xff]   ;;  %v1204_v56 = vld [vmem:[%s1583_s1 + $0x168] sm:$0xff]  }
  0x14   :  { %975 = vmatpush3.bf16.msra.mxu0 %v1156_v18  ;;  %v1200_v57 = vld [vmem:[%s1584_s0 + $0x90] ss:$24 sps:$4 sm:$0xff]   ;;  %v1205_v59 = vld [vmem:[%s1584_s0 + $0xc4] ss:$24 sps:$4 sm:$0xff]   ;;  %v1210_v0 = vld [vmem:[%s1584_s0 + $0xc0] ss:$24 sps:$4 sm:$0xff]  }
  0x15   :  { %1027 = vmatpush3.bf16.msra.mxu1 %v1157_v19  ;;  %976 = vmatprep.subr.bf16.mxu0 %v1158_v20  ;;  %v1201_v58 = vld [vmem:[%s1584_s0 + $0x98] ss:$24 sps:$4 sm:$0xff]   ;;  %v1209_v60 = vld [vmem:[%s1583_s1 + $0x128] sm:$0xff]   ;;  %v1216_v5 = vld [vmem:[%s1584_s0 + $0xfc] ss:$24 sps:$4 sm:$0xff]  }
  0x16   :  { %1028 = vmatprep.subr.bf16.mxu1 %v1159_v21  ;;  %v1207_v61 = vld [vmem:[%s1584_s0 + $0xcc] ss:$24 sps:$4 sm:$0xff]   ;;  %v1212_v62 = vld [vmem:[%s1583_s1 + $0x170] sm:$0xff]   ;;  %v1220_v1 = vld [vmem:[%s1583_s1 + $0x178] sm:$0xff]  }
  0x17   :  { %v1213_v63 = vld [vmem:[%s1583_s1 + $0x130] sm:$0xff]   ;;  %v1221_v2 = vld [vmem:[%s1583_s1 + $0x138] sm:$0xff]   ;;  %v1211_v3 = vld [vmem:[%s1584_s0 + $0xc8] ss:$24 sps:$4 sm:$0xff]  }
  0x18   :  { %977 = vmatpush3.bf16.msra.mxu0 %v1160_v22  ;;  %v1214_v4 = vld [vmem:[%s1584_s0 + $0xf4] ss:$24 sps:$4 sm:$0xff]   ;;  %v1218_v6 = vld [vmem:[%s1584_s0 + $0xf0] ss:$24 sps:$4 sm:$0xff]   ;;  %v1227_v9 = vld [vmem:[%s1584_s0 + $0xa4] ss:$24 sps:$4 sm:$0xff]  }
  0x19   :  { %1029 = vmatpush3.bf16.msra.mxu1 %v1161_v23  ;;  %978 = vmatprep.subr.bf16.mxu0 %v1162_v24  ;;  %v1219_v7 = vld [vmem:[%s1584_s0 + $0xf8] ss:$24 sps:$4 sm:$0xff]   ;;  %v1224_v8 = vld [vmem:[%s1584_s0 + $0x14] ss:$24 sps:$4 sm:$0xff]   ;;  %v1228_v12 = vld [vmem:[%s1584_s0 + $0x44] ss:$24 sps:$4 sm:$0xff]  }
  0x1a   :  { %1030 = vmatprep.subr.bf16.mxu1 %v1163_v25  ;;  %v1222_v10 = vld [vmem:[%s1584_s0 + $0x10] ss:$24 sps:$4 sm:$0xff]   ;;  %v1225_v11 = vld [vmem:[%s1584_s0 + $0xa0] ss:$24 sps:$4 sm:$0xff]   ;;  %v1230_v13 = vld [vmem:[%s1584_s0 + $0xd4] ss:$24 sps:$4 sm:$0xff]  }
  0x1b   :  { %v1232_v14 = vld [vmem:[%s1584_s0 + $0x40] ss:$24 sps:$4 sm:$0xff]   ;;  %v1233_v15 = vld [vmem:[%s1584_s0 + $0xd0] ss:$24 sps:$4 sm:$0xff]   ;;  %v1234_v16 = vld [vmem:[%s1584_s0 + $0x74] ss:$24 sps:$4 sm:$0xff]  }
  0x1c   :  { %979 = vmatpush3.bf16.msra.mxu0 %v1164_v26  ;;  %v1236_v17 = vld [vmem:[%s1584_s0 + $0x104] ss:$24 sps:$4 sm:$0xff]   ;;  %v1238_v18 = vld [vmem:[%s1584_s0 + $0x70] ss:$24 sps:$4 sm:$0xff]   ;;  %v1239_v19 = vld [vmem:[%s1584_s0 + $0x100] ss:$24 sps:$4 sm:$0xff]  }
  0x1d   :  { %1031 = vmatpush3.bf16.msra.mxu1 %v1165_v27  ;;  %980 = vmatprep.subr.bf16.mxu0 %v1166_v28  ;;  %v1515_v22 = vld [vmem:[%s1585_s2] ss:$0 sm:$0xff] }
  0x1e   :  { %1032 = vmatprep.subr.bf16.mxu1 %v1167_v29 }
  0x20   :  { %981 = vmatpush3.bf16.msra.mxu0 %v1168_v30 }
  0x21   :  { %1033 = vmatpush3.bf16.msra.mxu1 %v1169_v31  ;;  %1070 = vmatprep.subr.bf16.mxu0 %v1176_v36 }
  0x22   :  { %1122 = vmatprep.subr.bf16.mxu1 %v1176_v36 }
  0x23   :  { %655 = vmatmul.mubr.bf16.vlgmr.msra.gmra.mrb[0].mxu0 %v1170_v32 }
  0x24   :  { %736 = vmatmul.mubr.bf16.vlgmr.msra.gmra.mrb[0].mxu1 %v1173_v34  ;;  %1071 = vmatpush3.bf16.msra.mxu0 %v1177_v37 }
  0x25   :  { %1130 = vmatpush3.bf16.msra.mxu1 %v1177_v37  ;;  %1072 = vmatprep.subr.bf16.mxu0 %v1178_v38 }
  0x26   :  { %1123 = vmatprep.subr.bf16.mxu1 %v1178_v38  ;;  %662 = vmatprep.mubr.bf16.mxu0 %v1179_v39 }
  0x27   :  { %743 = vmatprep.mubr.bf16.mxu1 %v1181_v40 }
  0x28   :  { %1073 = vmatpush3.bf16.msra.mxu0 %v1183_v41 }
  0x29   :  { %1131 = vmatpush3.bf16.msra.mxu1 %v1183_v41  ;;  %1074 = vmatprep.subr.bf16.mxu0 %v1186_v44 }
  0x2a   :  { %1124 = vmatprep.subr.bf16.mxu1 %v1186_v44 }
  0x2b   :  { %663 = vmatmul.mubr.bf16.gmra.mrb[4].mxu0 %v1184_v42 }
  0x2c   :  { %744 = vmatmul.mubr.bf16.gmra.mrb[4].mxu1 %v1185_v43  ;;  %1075 = vmatpush3.bf16.msra.mxu0 %v1187_v45 }
  0x2d   :  { %670 = vmatprep.mubr.bf16.mxu0 %v1188_v46  ;;  %1132 = vmatpush3.bf16.msra.mxu1 %v1187_v45 }
  0x2e   :  { %751 = vmatprep.mubr.bf16.mxu1 %v1190_v47  ;;  %1076 = vmatprep.subr.bf16.mxu0 %v1194_v49 }
  0x2f   :  { %1125 = vmatprep.subr.bf16.mxu1 %v1194_v49 }
  0x30   :  { %1077 = vmatpush3.bf16.msra.mxu0 %v1195_v50 }
  0x31   :  { %1133 = vmatpush3.bf16.msra.mxu1 %v1195_v50  ;;  %1078 = vmatprep.subr.bf16.mxu0 %v1202_v54 }
  0x32   :  { %1126 = vmatprep.subr.bf16.mxu1 %v1202_v54 }
  0x33   :  { %671 = vmatmul.mubr.bf16.gmra.mrb[8].mxu0 %v1192_v48 }
  0x34   :  { %752 = vmatmul.mubr.bf16.gmra.mrb[8].mxu1 %v1193_v51  ;;  %678 = vmatprep.mubr.bf16.mxu0 %v1196_v52 }
  0x35   :  { %759 = vmatprep.mubr.bf16.mxu1 %v1198_v53  ;;  %1079 = vmatpush3.bf16.msra.mxu0 %v1203_v55 }
  0x36   :  { %1134 = vmatpush3.bf16.msra.mxu1 %v1203_v55  ;;  %1080 = vmatprep.subr.bf16.mxu0 %v1204_v56 }
  0x37   :  { %1127 = vmatprep.subr.bf16.mxu1 %v1204_v56 }
  0x39   :  { %1081 = vmatpush3.bf16.msra.mxu0 %v1209_v60 }
  0x3a   :  { %1135 = vmatpush3.bf16.msra.mxu1 %v1209_v60  ;;  %1082 = vmatprep.subr.bf16.mxu0 %v1212_v62 }
  0x3b   :  { %679 = vmatmul.mubr.bf16.gmra.mrb[12].mxu0 %v1200_v57  ;;  %1128 = vmatprep.subr.bf16.mxu1 %v1212_v62 }
  0x3c   :  { %760 = vmatmul.mubr.bf16.gmra.mrb[12].mxu1 %v1201_v58  ;;  %686 = vmatprep.mubr.bf16.mxu0 %v1205_v59 }
  0x3d   :  { %767 = vmatprep.mubr.bf16.mxu1 %v1207_v61  ;;  %1083 = vmatpush3.bf16.msra.mxu0 %v1213_v63 }
  0x3e   :  { %1136 = vmatpush3.bf16.msra.mxu1 %v1213_v63  ;;  %1084 = vmatprep.subr.bf16.mxu0 %v1220_v1 }
  0x3f   :  { %1129 = vmatprep.subr.bf16.mxu1 %v1220_v1 }
  0x41   :  { %1085 = vmatpush3.bf16.msra.mxu0 %v1221_v2 }
  0x42   :  { %1137 = vmatpush3.bf16.msra.mxu1 %v1221_v2 }
  0x43   :  { %687 = vmatmul.mubr.bf16.gmra.mrb[16].mxu0 %v1210_v0 }
  0x44   :  { %768 = vmatmul.mubr.bf16.gmra.mrb[16].mxu1 %v1211_v3  ;;  %694 = vmatprep.mubr.bf16.mxu0 %v1214_v4 }
  0x45   :  { %775 = vmatprep.mubr.bf16.mxu1 %v1216_v5 }
  0x4b   :  { %695 = vmatmul.mubr.bf16.gmra.mrb[20].mxu0 %v1218_v6 }
  0x4c   :  { %776 = vmatmul.mubr.bf16.gmra.mrb[20].mxu1 %v1219_v7  ;;  %816 = vmatprep.mubr.bf16.mxu0 %v1224_v8 }
  0x4d   :  { %840 = vmatprep.mubr.bf16.mxu1 %v1227_v9 }
  0x53   :  { %817 = vmatmul.mubr.bf16.vlgmr.msra.gmra.mrb[24].mxu0 %v1222_v10 }
  0x54   :  { %841 = vmatmul.mubr.bf16.vlgmr.msra.gmra.mrb[24].mxu1 %v1225_v11  ;;  %824 = vmatprep.mubr.bf16.mxu0 %v1228_v12 }
  0x55   :  { %848 = vmatprep.mubr.bf16.mxu1 %v1230_v13 }
  0x5b   :  { %825 = vmatmul.mubr.bf16.gmra.mrb[28].mxu0 %v1232_v14 }
  0x5c   :  { %849 = vmatmul.mubr.bf16.gmra.mrb[28].mxu1 %v1233_v15  ;;  %832 = vmatprep.mubr.bf16.mxu0 %v1234_v16 }
  0x5d   :  { %856 = vmatprep.mubr.bf16.mxu1 %v1236_v17 }
  0x63   :  { %833 = vmatmul.mubr.bf16.gmra.mrb[32].mxu0 %v1238_v18 }
  0x64   :  { %857 = vmatmul.mubr.bf16.gmra.mrb[32].mxu1 %v1239_v19 }
  0xf6   :  { %v982_v20 = vpop.f32.mrb[0].mxu0 }
  0xf7   :  { %v1034_v21 = vpop.f32.mrb[0].mxu1  ;;  %v983_v23 = vpop.f32.mrb[1].mxu0 }
  0xf8   :  { %v984_v24 = vadd.f32 %v983_v23, %v982_v20  ;;  %v1035_v25 = vpop.f32.mrb[1].mxu1  ;;  %v985_v26 = vpop.f32.mrb[2].mxu0 }
  0xf9   :  { %v1036_v27 = vadd.f32 %v1035_v25, %v1034_v21  ;;  %v1037_v28 = vpop.f32.mrb[2].mxu1  ;;  %v986_v29 = vpop.f32.mrb[3].mxu0 }
  0xfa   :  { %v657_v30 = vadd.f32 %v984_v24, %v1515_v22  ;;  %v987_v31 = vadd.f32 %v986_v29, %v985_v26  ;;  %v1038_v32 = vpop.f32.mrb[3].mxu1 }
  0xfb   :  { %v1039_v33 = vadd.f32 %v1038_v32, %v1037_v28 }
  0xfc   :  { %v1518_v34 = vadd.f32 %v1036_v27, %v657_v30  ;;  %v660_v35 = vadd.f32 %v987_v31, %v1515_v22 }
  0xfe   :  { %v1521_v36 = vadd.f32 %v1039_v33, %v660_v35  ;;  %v988_v37 = vpop.f32.mrb[4].mxu0 }
  0xff   :  { %v1040_v38 = vpop.f32.mrb[4].mxu1  ;;  %v989_v39 = vpop.f32.mrb[5].mxu0 }
 0x100   :  { %v990_v40 = vadd.f32 %v989_v39, %v988_v37  ;;  %v1041_v41 = vpop.f32.mrb[5].mxu1  ;;  %v991_v42 = vpop.f32.mrb[6].mxu0 }
 0x101   :  { %v1042_v43 = vadd.f32 %v1041_v41, %v1040_v38  ;;  %v1043_v44 = vpop.f32.mrb[6].mxu1  ;;  %v992_v45 = vpop.f32.mrb[7].mxu0 }
 0x102   :  { %v665_v46 = vadd.f32 %v990_v40, %v1515_v22  ;;  %v993_v47 = vadd.f32 %v992_v45, %v991_v42  ;;  %v1044_v48 = vpop.f32.mrb[7].mxu1 }
 0x103   :  { %v1045_v49 = vadd.f32 %v1044_v48, %v1043_v44 }
 0x104   :  { %v1524_v50 = vadd.f32 %v1042_v43, %v665_v46  ;;  %v668_v51 = vadd.f32 %v993_v47, %v1515_v22 }
 0x106   :  { %v1527_v52 = vadd.f32 %v1045_v49, %v668_v51  ;;  %v994_v53 = vpop.f32.mrb[8].mxu0 }
 0x107   :  { %v1046_v54 = vpop.f32.mrb[8].mxu1  ;;  %v995_v55 = vpop.f32.mrb[9].mxu0 }
 0x108   :  { %v996_v56 = vadd.f32 %v995_v55, %v994_v53  ;;  %v1047_v57 = vpop.f32.mrb[9].mxu1  ;;  %v997_v58 = vpop.f32.mrb[10].mxu0 }
 0x109   :  { %v1048_v59 = vadd.f32 %v1047_v57, %v1046_v54  ;;  %v1049_v60 = vpop.f32.mrb[10].mxu1  ;;  %v998_v61 = vpop.f32.mrb[11].mxu0 }
 0x10a   :  { %v673_v62 = vadd.f32 %v996_v56, %v1515_v22  ;;  %v999_v63 = vadd.f32 %v998_v61, %v997_v58  ;;  %v1050_v0 = vpop.f32.mrb[11].mxu1 }
 0x10b   :  { %v1051_v1 = vadd.f32 %v1050_v0, %v1049_v60 }
 0x10c   :  { %v1530_v2 = vadd.f32 %v1048_v59, %v673_v62  ;;  %v676_v3 = vadd.f32 %v999_v63, %v1515_v22 }
 0x10e   :  { %v1533_v4 = vadd.f32 %v1051_v1, %v676_v3  ;;  %v1000_v5 = vpop.f32.mrb[12].mxu0 }
 0x10f   :  { %v1052_v6 = vpop.f32.mrb[12].mxu1  ;;  %v1001_v7 = vpop.f32.mrb[13].mxu0 }
 0x110   :  { %v1002_v8 = vadd.f32 %v1001_v7, %v1000_v5  ;;  %v1053_v9 = vpop.f32.mrb[13].mxu1  ;;  %v1003_v10 = vpop.f32.mrb[14].mxu0 }
 0x111   :  { %v1054_v11 = vadd.f32 %v1053_v9, %v1052_v6  ;;  %v1055_v12 = vpop.f32.mrb[14].mxu1  ;;  %v1004_v13 = vpop.f32.mrb[15].mxu0 }
 0x112   :  { %v681_v14 = vadd.f32 %v1002_v8, %v1515_v22  ;;  %v1005_v15 = vadd.f32 %v1004_v13, %v1003_v10  ;;  %v1056_v16 = vpop.f32.mrb[15].mxu1 }
 0x113   :  { %v1057_v17 = vadd.f32 %v1056_v16, %v1055_v12 }
 0x114   :  { %v762_v18 = vadd.f32 %v1054_v11, %v681_v14  ;;  %v684_v19 = vadd.f32 %v1005_v15, %v1515_v22 }
 0x116   :  { %v765_v20 = vadd.f32 %v1057_v17, %v684_v19  ;;  %v1006_v21 = vpop.f32.mrb[16].mxu0 }
 0x117   :  { %v1058_v23 = vpop.f32.mrb[16].mxu1  ;;  %v1007_v24 = vpop.f32.mrb[17].mxu0 }
 0x118   :  { %v1008_v25 = vadd.f32 %v1007_v24, %v1006_v21  ;;  %v1059_v26 = vpop.f32.mrb[17].mxu1  ;;  %v1009_v27 = vpop.f32.mrb[18].mxu0 }
 0x119   :  { %v1060_v28 = vadd.f32 %v1059_v26, %v1058_v23  ;;  %v1061_v29 = vpop.f32.mrb[18].mxu1  ;;  %v1010_v30 = vpop.f32.mrb[19].mxu0 }
 0x11a   :  { %v689_v31 = vadd.f32 %v1008_v25, %v1515_v22  ;;  %v1011_v32 = vadd.f32 %v1010_v30, %v1009_v27  ;;  %v1062_v33 = vpop.f32.mrb[19].mxu1 }
 0x11b   :  { %v1063_v35 = vadd.f32 %v1062_v33, %v1061_v29 }
 0x11c   :  { %v770_v37 = vadd.f32 %v1060_v28, %v689_v31  ;;  %v692_v38 = vadd.f32 %v1011_v32, %v1515_v22 }
 0x11e   :  { %v773_v39 = vadd.f32 %v1063_v35, %v692_v38  ;;  %v1012_v40 = vpop.f32.mrb[20].mxu0 }
 0x11f   :  { %v1064_v41 = vpop.f32.mrb[20].mxu1  ;;  %v1013_v42 = vpop.f32.mrb[21].mxu0 }
 0x120   :  { %v1014_v43 = vadd.f32 %v1013_v42, %v1012_v40  ;;  %v1065_v44 = vpop.f32.mrb[21].mxu1  ;;  %v1015_v45 = vpop.f32.mrb[22].mxu0 }
 0x121   :  { %v1066_v46 = vadd.f32 %v1065_v44, %v1064_v41  ;;  %v1067_v47 = vpop.f32.mrb[22].mxu1  ;;  %v1016_v48 = vpop.f32.mrb[23].mxu0 }
 0x122   :  { %v697_v49 = vadd.f32 %v1014_v43, %v1515_v22  ;;  %v1017_v51 = vadd.f32 %v1016_v48, %v1015_v45  ;;  %v1068_v53 = vpop.f32.mrb[23].mxu1 }
 0x123   :  { %v1069_v54 = vadd.f32 %v1068_v53, %v1067_v47 }
 0x124   :  { %v778_v55 = vadd.f32 %v1066_v46, %v697_v49  ;;  %v700_v56 = vadd.f32 %v1017_v51, %v1515_v22 }
 0x126   :  { %v781_v57 = vadd.f32 %v1069_v54, %v700_v56  ;;  %v1086_v58 = vpop.f32.mrb[24].mxu0 }
 0x127   :  { %v1104_v59 = vpop.f32.mrb[24].mxu1  ;;  %v1087_v60 = vpop.f32.mrb[25].mxu0 }
 0x128   :  { %v1088_v61 = vadd.f32 %v1087_v60, %v1086_v58  ;;  %v1105_v62 = vpop.f32.mrb[25].mxu1  ;;  %v1089_v63 = vpop.f32.mrb[26].mxu0 }
 0x129   :  { %v1106_v0 = vadd.f32 %v1105_v62, %v1104_v59  ;;  %v1107_v1 = vpop.f32.mrb[26].mxu1  ;;  %v1090_v3 = vpop.f32.mrb[27].mxu0 }
 0x12a   :  { %v819_v5 = vadd.f32 %v1088_v61, %v1518_v34  ;;  %v1091_v6 = vadd.f32 %v1090_v3, %v1089_v63  ;;  %v1108_v7 = vpop.f32.mrb[27].mxu1 }
 0x12b   :  { %v843_v8 = vadd.f32 %v1106_v0, %v762_v18  ;;  %v1109_v9 = vadd.f32 %v1108_v7, %v1107_v1 }
 0x12c   :  { %865 = vst [vmem:[%s1586_s3] sm:$0xff] %v819_v5  ;;  %v822_v22 = vadd.f32 %v1091_v6, %v1521_v36 }
 0x12d   :  { %871 = vst [vmem:[%s1586_s3 + $0x30] sm:$0xff] %v843_v8  ;;  %v846_v10 = vadd.f32 %v1109_v9, %v765_v20 }
 0x12e   :  { %866 = vst [vmem:[%s1586_s3 + $0x8] sm:$0xff] %v822_v22  ;;  %v1092_v34 = vpop.f32.mrb[28].mxu0 }
 0x12f   :  { %872 = vst [vmem:[%s1586_s3 + $0x38] sm:$0xff] %v846_v10  ;;  %v1110_v11 = vpop.f32.mrb[28].mxu1  ;;  %v1093_v12 = vpop.f32.mrb[29].mxu0 }
 0x130   :  { %v1094_v13 = vadd.f32 %v1093_v12, %v1092_v34  ;;  %v1111_v14 = vpop.f32.mrb[29].mxu1  ;;  %v1095_v15 = vpop.f32.mrb[30].mxu0 }
 0x131   :  { %v1112_v36 = vadd.f32 %v1111_v14, %v1110_v11  ;;  %v1113_v16 = vpop.f32.mrb[30].mxu1  ;;  %v1096_v17 = vpop.f32.mrb[31].mxu0 }
 0x132   :  { %v827_v18 = vadd.f32 %v1094_v13, %v1524_v50  ;;  %v1097_v19 = vadd.f32 %v1096_v17, %v1095_v15  ;;  %v1114_v20 = vpop.f32.mrb[31].mxu1 }
 0x133   :  { %v851_v21 = vadd.f32 %v1112_v36, %v770_v37  ;;  %v1115_v23 = vadd.f32 %v1114_v20, %v1113_v16 }
 0x134   :  { %867 = vst [vmem:[%s1586_s3 + $0x10] sm:$0xff] %v827_v18  ;;  %v830_v24 = vadd.f32 %v1097_v19, %v1527_v52 }
 0x135   :  { %873 = vst [vmem:[%s1586_s3 + $0x40] sm:$0xff] %v851_v21  ;;  %v854_v25 = vadd.f32 %v1115_v23, %v773_v39 }
 0x136   :  { %868 = vst [vmem:[%s1586_s3 + $0x18] sm:$0xff] %v830_v24  ;;  %v1098_v50 = vpop.f32.mrb[32].mxu0 }
 0x137   :  { %874 = vst [vmem:[%s1586_s3 + $0x48] sm:$0xff] %v854_v25  ;;  %v1116_v26 = vpop.f32.mrb[32].mxu1  ;;  %v1099_v27 = vpop.f32.mrb[33].mxu0 }
 0x138   :  { %v1100_v28 = vadd.f32 %v1099_v27, %v1098_v50  ;;  %v1117_v29 = vpop.f32.mrb[33].mxu1  ;;  %v1101_v30 = vpop.f32.mrb[34].mxu0 }
 0x139   :  { %v1118_v52 = vadd.f32 %v1117_v29, %v1116_v26  ;;  %v1119_v31 = vpop.f32.mrb[34].mxu1  ;;  %v1102_v32 = vpop.f32.mrb[35].mxu0 }
 0x13a   :  { %v835_v33 = vadd.f32 %v1100_v28, %v1530_v2  ;;  %v1103_v35 = vadd.f32 %v1102_v32, %v1101_v30  ;;  %v1120_v37 = vpop.f32.mrb[35].mxu1 }
 0x13b   :  { %v859_v38 = vadd.f32 %v1118_v52, %v778_v55  ;;  %v1121_v39 = vadd.f32 %v1120_v37, %v1119_v31 }
 0x13c   :  { %869 = vst [vmem:[%s1586_s3 + $0x20] sm:$0xff] %v835_v33  ;;  %v838_v40 = vadd.f32 %v1103_v35, %v1533_v4 }
 0x13d   :  { %875 = vst [vmem:[%s1586_s3 + $0x50] sm:$0xff] %v859_v38  ;;  %v862_v41 = vadd.f32 %v1121_v39, %v781_v57 }
 0x13e   :  { %870 = vst [vmem:[%s1586_s3 + $0x28] sm:$0xff] %v838_v40 }
 0x13f   :  { %876 = vst [vmem:[%s1586_s3 + $0x58] sm:$0xff] %v862_v41 }

// kernel: prog_sic_forward.22
= control target key start
LH: loop header
LB: loop body
LE: loop exit
PB: predicated region body
PF: predicated region fallthrough
CT: control target
= control target key end

     0   :  { %s440_s9 = smov 0   ;;  %s559_s0 = inlined_call_operand.vmem [shape: f32[32,768], index: 0, kind: input, shape index: {}]   ;;  %s560_s1 = inlined_call_operand.vmem [shape: f32[3,32,768], index: 1, kind: input, shape index: {}]   ;;  %s561_s2 = inlined_call_operand.vmem [shape: f32[3,1,768], index: 2, kind: output, shape index: {}]  }
   0x1 LB: > { %s397_s10 = sadd.s32 4294967295, %s422_s9   ;;  %p401_p0 = scmp.ge.s32.totalorder %s422_s9, 1  ;;  %s422_s9 = sphi %s440_s9, %s12_s9  }
   0x2   : > { %p112_p1 = scmp.lt.s32.totalorder %s422_s9, 4 }
   0x4   : > { %p113_p2 = pnand %p401_p0, %p112_p1 }
   0x5   : > { %p133_p3 = scmp.lt.s32.totalorder (!%p113_p2), %s397_s10, 2  ;;  %v166_v0 = vld [vmem:[%s559_s0] sm:$0xff] (!%p113_p2)  ;;  %v167_v1 = vld [vmem:[%s559_s0 + $0x8] sm:$0xff] (!%p113_p2)  ;;  %v168_v2 = vld [vmem:[%s559_s0 + $0x10] sm:$0xff] (!%p113_p2) }
   0x6   : > { %116 = sbr.rel (%p113_p2) target bundleno = 60 (0x3c), region = 28  ;;  %v169_v3 = vld [vmem:[%s559_s0 + $0x18] sm:$0xff] (!%p113_p2)  ;;  %v170_v4 = vld [vmem:[%s559_s0 + $0x20] sm:$0xff] (!%p113_p2)  ;;  %v171_v5 = vld [vmem:[%s559_s0 + $0x28] sm:$0xff] (!%p113_p2) }
   0x7   : > { %v172_v6 = vld [vmem:[%s559_s0 + $0x30] sm:$0xff] (!%p113_p2)  ;;  %v173_v7 = vld [vmem:[%s559_s0 + $0x38] sm:$0xff] (!%p113_p2)  ;;  %v174_v8 = vld [vmem:[%s559_s0 + $0x40] sm:$0xff] (!%p113_p2) }
   0x8   : > { %v175_v9 = vld [vmem:[%s559_s0 + $0x48] sm:$0xff] (!%p113_p2)  ;;  %v176_v10 = vld [vmem:[%s559_s0 + $0x50] sm:$0xff] (!%p113_p2)  ;;  %v177_v11 = vld [vmem:[%s559_s0 + $0x58] sm:$0xff] (!%p113_p2) }
   0x9   : > { %v178_v15 = vld [vmem:[%s559_s0 + $0x60] sm:$0xff] (!%p113_p2)  ;;  %v179_v16 = vld [vmem:[%s559_s0 + $0x68] sm:$0xff] (!%p113_p2)  ;;  %v180_v17 = vld [vmem:[%s559_s0 + $0x70] sm:$0xff] (!%p113_p2) }
   0xa   : > { %v181_v21 = vld [vmem:[%s559_s0 + $0x78] sm:$0xff] (!%p113_p2)  ;;  %v182_v22 = vld [vmem:[%s559_s0 + $0x80] sm:$0xff] (!%p113_p2)  ;;  %v183_v23 = vld [vmem:[%s559_s0 + $0x88] sm:$0xff] (!%p113_p2) }
   0xb   : > { %v184_v30 = vld [vmem:[%s559_s0 + $0x90] sm:$0xff] (!%p113_p2)  ;;  %v185_v31 = vld [vmem:[%s559_s0 + $0x98] sm:$0xff] (!%p113_p2)  ;;  %v186_v32 = vld [vmem:[%s559_s0 + $0xa0] sm:$0xff] (!%p113_p2) }
   0xd   : > { %s563_s10 = smov (!%p133_p3, %s397_s10), 2 }
   0xe   : > { %s405_s17 = smul.u32 192, %s563_s10 }
  0x10   : > { %s481_s4 = scalar_lea.vmem %s560_s1, %s405_s17 }
  0x11   : > { %v142_v12 = vld [vmem:[%s481_s4] sm:$0xff]  ;;  %v143_v13 = vld [vmem:[%s481_s4 + $0x8] sm:$0xff]  ;;  %v144_v14 = vld [vmem:[%s481_s4 + $0x10] sm:$0xff] }
  0x12   : > { %v145_v18 = vld [vmem:[%s481_s4 + $0x18] sm:$0xff]  ;;  %v146_v19 = vld [vmem:[%s481_s4 + $0x20] sm:$0xff]  ;;  %v147_v20 = vld [vmem:[%s481_s4 + $0x28] sm:$0xff]  ;;  %v190_v24 = vsub.f32 %v142_v12, %v166_v0  ;;  %v191_v25 = vsub.f32 %v143_v13, %v167_v1  ;;  %v192_v26 = vsub.f32 %v144_v14, %v168_v2 }
  0x13   : > { %v148_v27 = vld [vmem:[%s481_s4 + $0x30] sm:$0xff]  ;;  %v149_v28 = vld [vmem:[%s481_s4 + $0x38] sm:$0xff]  ;;  %v150_v29 = vld [vmem:[%s481_s4 + $0x40] sm:$0xff]  ;;  %v193_v33 = vsub.f32 %v145_v18, %v169_v3  ;;  %v194_v34 = vsub.f32 %v146_v19, %v170_v4  ;;  %v195_v35 = vsub.f32 %v147_v20, %v171_v5 }
  0x14   : > { %v151_v36 = vld [vmem:[%s481_s4 + $0x48] sm:$0xff]  ;;  %v152_v37 = vld [vmem:[%s481_s4 + $0x50] sm:$0xff]  ;;  %v153_v38 = vld [vmem:[%s481_s4 + $0x58] sm:$0xff]  ;;  %v196_v39 = vsub.f32 %v148_v27, %v172_v6  ;;  %v197_v40 = vsub.f32 %v149_v28, %v173_v7  ;;  %v198_v41 = vsub.f32 %v150_v29, %v174_v8  ;;  %v214_v42 = vmul.f32 %v190_v24, %v190_v24 }
  0x15   : > { %v154_v43 = vld [vmem:[%s481_s4 + $0x60] sm:$0xff]  ;;  %v155_v44 = vld [vmem:[%s481_s4 + $0x68] sm:$0xff]  ;;  %v156_v45 = vld [vmem:[%s481_s4 + $0x70] sm:$0xff]  ;;  %v199_v46 = vsub.f32 %v151_v36, %v175_v9  ;;  %v200_v47 = vsub.f32 %v152_v37, %v176_v10  ;;  %v201_v48 = vsub.f32 %v153_v38, %v177_v11  ;;  %v215_v49 = vmul.f32 %v191_v25, %v191_v25 }
  0x16   : > { %v157_v50 = vld [vmem:[%s481_s4 + $0x78] sm:$0xff]  ;;  %v158_v51 = vld [vmem:[%s481_s4 + $0x80] sm:$0xff]  ;;  %v159_v52 = vld [vmem:[%s481_s4 + $0x88] sm:$0xff]  ;;  %v202_v53 = vsub.f32 %v154_v43, %v178_v15  ;;  %v203_v54 = vsub.f32 %v155_v44, %v179_v16  ;;  %v204_v55 = vsub.f32 %v156_v45, %v180_v17  ;;  %v216_v56 = vmul.f32 %v192_v26, %v192_v26 }
  0x17   : > { %v160_v57 = vld [vmem:[%s481_s4 + $0x90] sm:$0xff]  ;;  %v161_v58 = vld [vmem:[%s481_s4 + $0x98] sm:$0xff]  ;;  %v162_v59 = vld [vmem:[%s481_s4 + $0xa0] sm:$0xff]  ;;  %v205_v60 = vsub.f32 %v157_v50, %v181_v21  ;;  %v206_v61 = vsub.f32 %v158_v51, %v182_v22  ;;  %v207_v62 = vsub.f32 %v159_v52, %v183_v23  ;;  %v217_v63 = vmul.f32 %v193_v33, %v193_v33 }
  0x18   : > { %v163_v0 = vld [vmem:[%s481_s4 + $0xa8] sm:$0xff]  ;;  %v164_v1 = vld [vmem:[%s481_s4 + $0xb0] sm:$0xff]  ;;  %v165_v2 = vld [vmem:[%s481_s4 + $0xb8] sm:$0xff]  ;;  %v208_v3 = vsub.f32 %v160_v57, %v184_v30  ;;  %v209_v4 = vsub.f32 %v161_v58, %v185_v31  ;;  %v210_v5 = vsub.f32 %v162_v59, %v186_v32  ;;  %v218_v6 = vmul.f32 %v194_v34, %v194_v34  ;;  %s406_s4 = smul.u32 6, %s563_s10 }
  0x19   : > { %v187_v7 = vld [vmem:[%s559_s0 + $0xa8] sm:$0xff]  ;;  %v188_v8 = vld [vmem:[%s559_s0 + $0xb0] sm:$0xff]  ;;  %v189_v9 = vld [vmem:[%s559_s0 + $0xb8] sm:$0xff]  ;;  %v219_v10 = vmul.f32 %v195_v35, %v195_v35  ;;  %v220_v11 = vmul.f32 %v196_v39, %v196_v39  ;;  %v221_v12 = vmul.f32 %v197_v40, %v197_v40  ;;  %v222_v13 = vmul.f32 %v198_v41, %v198_v41 }
  0x1a   : > { %v211_v14 = vsub.f32 %v163_v0, %v187_v7  ;;  %v212_v15 = vsub.f32 %v164_v1, %v188_v8  ;;  %v213_v16 = vsub.f32 %v165_v2, %v189_v9  ;;  %v223_v17 = vmul.f32 %v199_v46, %v199_v46  ;;  %s141_s14 = scalar_lea.vmem %s561_s2, %s406_s4 }
  0x1b   : > { %v224_v18 = vmul.f32 %v200_v47, %v200_v47  ;;  %v225_v19 = vmul.f32 %v201_v48, %v201_v48  ;;  %v226_v20 = vmul.f32 %v202_v53, %v202_v53  ;;  %v227_v21 = vmul.f32 %v203_v54, %v203_v54 }
  0x1c   : > { %v228_v22 = vmul.f32 %v204_v55, %v204_v55  ;;  %v229_v23 = vmul.f32 %v205_v60, %v205_v60  ;;  %v230_v24 = vmul.f32 %v206_v61, %v206_v61  ;;  %v231_v25 = vmul.f32 %v207_v62, %v207_v62 }
  0x1d   : > { %v232_v26 = vmul.f32 %v208_v3, %v208_v3  ;;  %v233_v27 = vmul.f32 %v209_v4, %v209_v4  ;;  %v234_v28 = vmul.f32 %v210_v5, %v210_v5  ;;  %v235_v29 = vmul.f32 %v211_v14, %v211_v14 }
  0x1e   : > { %v236_v30 = vmul.f32 %v212_v15, %v212_v15  ;;  %v237_v31 = vmul.f32 %v213_v16, %v213_v16  ;;  %v238_v32 = vadd.f32 %v220_v11, %v214_v42  ;;  %v247_v33 = vadd.f32 %v221_v12, %v215_v49 }
  0x1f   : > { %v256_v34 = vadd.f32 %v222_v13, %v216_v56  ;;  %v265_v35 = vadd.f32 %v223_v17, %v217_v63  ;;  %v274_v36 = vadd.f32 %v224_v18, %v218_v6  ;;  %v283_v37 = vadd.f32 %v225_v19, %v219_v10 }
  0x20   : > { %v239_v38 = vadd.f32 %v238_v32, %v226_v20  ;;  %v248_v39 = vadd.f32 %v247_v33, %v227_v21  ;;  %v424_v58 = vmov 1966171168   ;;  %v304_v60 = vlaneseq }
  0x21   : > { %v257_v40 = vadd.f32 %v256_v34, %v228_v22  ;;  %v266_v41 = vadd.f32 %v265_v35, %v229_v23  ;;  %v275_v43 = vadd.f32 %v274_v36, %v230_v24  ;;  %v284_v44 = vadd.f32 %v283_v37, %v231_v25 }
  0x22   : > { %v240_v45 = vadd.f32 %v239_v38, %v232_v26  ;;  %v249_v46 = vadd.f32 %v248_v39, %v233_v27  ;;  %v302_v59 = vunpack.c.l.s4 %v424_v58  ;;  %v305_v10 = vshrl.u32 %v304_v60, 7 }
  0x23   : > { %v258_v47 = vadd.f32 %v257_v40, %v234_v28  ;;  %v267_v48 = vadd.f32 %v266_v41, %v235_v29  ;;  %v276_v50 = vadd.f32 %v275_v43, %v236_v30  ;;  %v285_v51 = vadd.f32 %v284_v44, %v237_v31 }
  0x24   : > { %v241_v52 = vrot.slane %v240_v45, 4  ;;  %v250_v53 = vrot.slane %v249_v46, 4  ;;  %v303_v9 = vunpack.c.0.s8 %v302_v59  ;;  %vm341_vm0 = vcmp.lt.s32.totalorder %v304_v60, 768 }
  0x25   : > { %v259_v42 = vrot.slane %v258_v47, 4  ;;  %v268_v49 = vrot.slane %v267_v48, 4  ;;  %v277_v54 = vrot.slane %v276_v50, 4  ;;  %v286_v55 = vrot.slane %v285_v51, 4 }
  0x26   : > { %v242_v56 = vadd.f32 %v241_v52, %v240_v45  ;;  %v251_v57 = vadd.f32 %v250_v53, %v249_v46  ;;  %v306_v23 = vsub.s32 %v303_v9, %v305_v10 }
  0x27   : > { %v260_v61 = vadd.f32 %v259_v42, %v258_v47  ;;  %v269_v62 = vadd.f32 %v268_v49, %v267_v48  ;;  %v278_v63 = vadd.f32 %v277_v54, %v276_v50  ;;  %v287_v0 = vadd.f32 %v286_v55, %v285_v51 }
  0x28   : > { %v243_v1 = vrot.slane %v242_v56, 2  ;;  %v252_v2 = vrot.slane %v251_v57, 2 }
  0x29   : > { %v261_v3 = vrot.slane %v260_v61, 2  ;;  %v270_v4 = vrot.slane %v269_v62, 2  ;;  %v279_v5 = vrot.slane %v278_v63, 2  ;;  %v288_v6 = vrot.slane %v287_v0, 2 }
  0x2a   : > { %v244_v7 = vadd.f32 %v243_v1, %v242_v56  ;;  %v253_v8 = vadd.f32 %v252_v2, %v251_v57 }
  0x2b   : > { %v262_v11 = vadd.f32 %v261_v3, %v260_v61  ;;  %v271_v12 = vadd.f32 %v270_v4, %v269_v62  ;;  %v280_v13 = vadd.f32 %v279_v5, %v278_v63  ;;  %v289_v14 = vadd.f32 %v288_v6, %v287_v0 }
  0x2c   : > { %v245_v15 = vrot.slane %v244_v7, 1  ;;  %v254_v16 = vrot.slane %v253_v8, 1 }
  0x2d   : > { %v263_v17 = vrot.slane %v262_v11, 1  ;;  %v272_v18 = vrot.slane %v271_v12, 1  ;;  %v281_v19 = vrot.slane %v280_v13, 1  ;;  %v290_v20 = vrot.slane %v289_v14, 1 }
  0x2e   : > { %v246_v21 = vadd.f32 %v245_v15, %v244_v7  ;;  %v255_v22 = vadd.f32 %v254_v16, %v253_v8 }
  0x2f   : > { %v264_v24 = vadd.f32 %v263_v17, %v262_v11  ;;  %v273_v25 = vadd.f32 %v272_v18, %v271_v12  ;;  %v282_v26 = vadd.f32 %v281_v19, %v280_v13  ;;  %v291_v27 = vadd.f32 %v290_v20, %v289_v14 }
  0x30   : > { %v298_v28 = vcombine.low %v246_v21, %v255_v22 }
  0x31   : > { %v299_v29 = vcombine.low %v264_v24, %v273_v25  ;;  %v300_v30 = vcombine.low %v282_v26, %v291_v27 }
  0x32   : > { %v307_v31 = vrot.slane %v298_v28, %v306_v23 }
  0x33   : > { %v314_v32 = vrot.slane %v299_v29, %v306_v23  ;;  %v321_v33 = vrot.slane %v300_v30, %v306_v23 }
  0x35   : > { %v322_v34 = vcombine.low %v307_v31, %v314_v32  ;;  %v336_v35 = vrot.slane %v321_v33, %v306_v23 }
  0x37   : > { %v329_v36 = vrot.slane %v322_v34, %v306_v23 }
  0x39   : > { %v337_v37 = vcombine.low %v329_v36, %v336_v35 }
  0x3b   : > { %343 = vst.msk [vmem:[%s141_s14] sm:$0x3f] %vm341_vm0, %v337_v37 }
  0x3c PF: > { %s12_s9 = sadd.s32 1, %s422_s9  }
  0x3d   : > { %p9_p4 = scmp.ge.s32.totalorder %s12_s9, 5  }
  0x3f   :  { %11 = sbr.rel (!%p9_p4) target bundleno = 1 (0x1), region = 58 }

</bundles_post_ra>
